<compile_context>
chip_gen: v7x
topology: tpu7x:2x2x1
jax: 0.10.0
libtpu: 0.0.40
codegen_flags: <defaults>
</compile_context>

<pallas_src>
import jax
import jax.numpy as jnp
from jax import lax
from jax.experimental import pallas as pl
from jax.experimental.pallas import tpu as pltpu

K = 4                            # every ConvTranspose2d uses kernel_size=4
BN_EPS = 1e-5


# ----------------------------------------------------------------------------
# Generation-aware budgets
# ----------------------------------------------------------------------------
def _device_kind():
    try:
        return jax.devices()[0].device_kind.lower()
    except Exception:
        return ""


_KIND = _device_kind()
_IS_V7 = "v7" in _KIND
_BIG_VMEM = (("v5" in _KIND) or ("v6" in _KIND)) and not _IS_V7

if _BIG_VMEM:                       # v5e / v6e: 128 MiB physical VMEM
    VMEM_LIMIT = 96 * 1024 * 1024
    MATMUL_BUDGET = 40 << 20
    ROWS_BUDGET = 32 << 20
    MATMUL_ROW_CAP = 4096
    ROWS_ROW_CAP = 2048
else:                               # v7x (64 MiB) or unknown: stay conservative
    VMEM_LIMIT = 48 * 1024 * 1024
    MATMUL_BUDGET = 20 << 20
    ROWS_BUDGET = 12 << 20
    MATMUL_ROW_CAP = 1024
    ROWS_ROW_CAP = 1024


# ----------------------------------------------------------------------------
# Small helpers
# ----------------------------------------------------------------------------
def _round_up(x, m):
    return (x + m - 1) // m * m


def _pad_rows(a, mult):
    rp = _round_up(a.shape[0], mult)
    if rp != a.shape[0]:
        a = jnp.pad(a, ((0, rp - a.shape[0]), (0, 0)))
    return a


def _maybe_split_for_megacore(t, rows8):
    # On v7x keep >=2 grid steps on "parallel" row grids so both TCs get work.
    if _IS_V7 and rows8 >= 16:
        t = min(t, _round_up(rows8 // 2, 8))
    return t


def _pick_matmul_tile(rows, cin, n):
    # Budget: double-buffered bf16 X tile + double-buffered bf16 out tile,
    # with the (resident, broadcast) bf16 weight block subtracted first.
    w_bytes = 2 * cin * n
    budget = max(MATMUL_BUDGET - 2 * w_bytes, 2 << 20)
    per_row = 2 * 2 * cin + 2 * 2 * n
    tm = max(8, min(MATMUL_ROW_CAP, budget // per_row))
    tm = (tm // 8) * 8
    rows8 = _round_up(rows, 8)
    tm = rows8 if rows8 <= tm else tm
    return _maybe_split_for_megacore(tm, rows8)


def _pick_rows_tile(rows, bytes_per_row):
    t = max(8, min(ROWS_ROW_CAP, ROWS_BUDGET // max(bytes_per_row, 1)))
    t = (t // 8) * 8
    rows8 = _round_up(rows, 8)
    t = rows8 if rows8 <= t else t
    return _maybe_split_for_megacore(t, rows8)


def _compiler_params(sem):
    return pltpu.CompilerParams(dimension_semantics=sem,
                                vmem_limit_bytes=VMEM_LIMIT)


# ----------------------------------------------------------------------------
# Pallas kernels
# ----------------------------------------------------------------------------
def matmul_kernel(x_ref, w_ref, o_ref):
    # bf16 x bf16 -> f32 accumulate on the MXU; store bf16 (halves P traffic).
    o_ref[...] = jnp.dot(x_ref[...], w_ref[...],
                         preferred_element_type=jnp.float32).astype(o_ref.dtype)


def bn_stats_kernel(y_ref, s_ref):
    # Per-tile partial sums (row 0) and sums-of-squares (row 1); the tiny
    # cross-tile reduce happens in XLA, so the row grid stays fully parallel.
    y = y_ref[...]
    s_ref[...] = jnp.zeros_like(s_ref)
    s_ref[0:1, :] = jnp.sum(y, axis=0, keepdims=True)
    s_ref[1:2, :] = jnp.sum(y * y, axis=0, keepdims=True)


def bn_apply_relu_kernel(y_ref, sc_ref, sh_ref, o_ref):
    # Fused normalize*gamma + beta, ReLU, cast to bf16 for the next matmul.
    y = y_ref[...]
    o_ref[...] = jnp.maximum(y * sc_ref[...] + sh_ref[...], 0.0).astype(o_ref.dtype)


def bias_tanh_kernel(y_ref, b_ref, o_ref):
    o_ref[...] = jnp.tanh(y_ref[...] + b_ref[...])


# ----------------------------------------------------------------------------
# Pallas wrappers (grids + BlockSpecs)
# ----------------------------------------------------------------------------
def _deconv_matmul(x2d, wmat):
    """x2d: (rows, Cin) bf16, wmat: (Cin, K*K*Cpad) bf16 -> (rows, K*K*Cpad) bf16."""
    rows, cin = x2d.shape
    n = wmat.shape[1]
    tm = _pick_matmul_tile(rows, cin, n)
    xp = _pad_rows(x2d, tm)
    grid = xp.shape[0] // tm
    out = pl.pallas_call(
        matmul_kernel,
        out_shape=jax.ShapeDtypeStruct((xp.shape[0], n), jnp.bfloat16),
        grid=(grid,),
        in_specs=[pl.BlockSpec((tm, cin), lambda i: (i, 0)),
                  pl.BlockSpec((cin, n), lambda i: (0, 0))],   # weights broadcast
        out_specs=pl.BlockSpec((tm, n), lambda i: (i, 0)),
        compiler_params=_compiler_params(("parallel",)),
    )(xp, wmat)
    return out[:rows]


def _bn_stats(y2d):
    rows, lanes = y2d.shape
    ts = _pick_rows_tile(rows, 2 * 4 * lanes)
    yp = _pad_rows(y2d, ts)              # zero rows don't perturb sums
    grid = yp.shape[0] // ts
    parts = pl.pallas_call(
        bn_stats_kernel,
        out_shape=jax.ShapeDtypeStruct((grid * 8, lanes), jnp.float32),
        grid=(grid,),
        in_specs=[pl.BlockSpec((ts, lanes), lambda i: (i, 0))],
        out_specs=pl.BlockSpec((8, lanes), lambda i: (i, 0)),   # per-tile partials
        compiler_params=_compiler_params(("parallel",)),
    )(yp)
    parts = parts.reshape(grid, 8, lanes)
    return parts[:, 0, :].sum(axis=0), parts[:, 1, :].sum(axis=0)


def _bn_apply_relu(y2d, scale_row, shift_row):
    rows, lanes = y2d.shape
    ts = _pick_rows_tile(rows, 2 * 4 * lanes + 2 * 2 * lanes)
    yp = _pad_rows(y2d, ts)
    grid = yp.shape[0] // ts
    out = pl.pallas_call(
        bn_apply_relu_kernel,
        out_shape=jax.ShapeDtypeStruct((yp.shape[0], lanes), jnp.bfloat16),
        grid=(grid,),
        in_specs=[pl.BlockSpec((ts, lanes), lambda i: (i, 0)),
                  pl.BlockSpec((1, lanes), lambda i: (0, 0)),
                  pl.BlockSpec((1, lanes), lambda i: (0, 0))],
        out_specs=pl.BlockSpec((ts, lanes), lambda i: (i, 0)),
        compiler_params=_compiler_params(("parallel",)),
    )(yp, scale_row, shift_row)
    return out[:rows]


def _bias_tanh(y2d, bias_row):
    rows, lanes = y2d.shape
    ts = _pick_rows_tile(rows, 2 * 4 * lanes + 2 * 4 * lanes)
    yp = _pad_rows(y2d, ts)
    grid = yp.shape[0] // ts
    out = pl.pallas_call(
        bias_tanh_kernel,
        out_shape=jax.ShapeDtypeStruct((yp.shape[0], lanes), jnp.float32),
        grid=(grid,),
        in_specs=[pl.BlockSpec((ts, lanes), lambda i: (i, 0)),
                  pl.BlockSpec((1, lanes), lambda i: (0, 0))],
        out_specs=pl.BlockSpec((ts, lanes), lambda i: (i, 0)),
        compiler_params=_compiler_params(("parallel",)),
    )(yp, bias_row)
    return out[:rows]


# ----------------------------------------------------------------------------
# JAX glue: sub-pixel col2im and layer composition
# ----------------------------------------------------------------------------
# TODO(synk): the embedding gather and the (now 4-phase) col2im combine stay in
# XLA; the final layer (matmul -> in-VMEM col2im -> bias+tanh) could later be
# fused into a single per-image Pallas kernel.
def _shift_fwd(x, axis):
    # result[j] = x[j-1], zero at j=0
    pad = [(0, 0)] * x.ndim
    pad[axis] = (1, 0)
    return lax.slice_in_dim(jnp.pad(x, pad), 0, x.shape[axis], axis=axis)


def _shift_bwd(x, axis):
    # result[j] = x[j+1], zero at j=last
    pad = [(0, 0)] * x.ndim
    pad[axis] = (0, 1)
    return lax.slice_in_dim(jnp.pad(x, pad), 1, x.shape[axis] + 1, axis=axis)


def _col2im(p, B, H, W, C, stride, padding):
    # p: (B*H*W, K*K*C) bf16 laid out (kh, kw, c) along lanes; accumulate in f32.
    p = p.reshape(B, H, W, K, K, C).astype(jnp.float32)
    if stride == 1 and padding == 0 and H == 1 and W == 1:
        # First block: no overlap -> pure reshape (output is the kernel window).
        return p.reshape(B, K, K, C)
    assert stride == 2 and padding == 1
    # 4-phase sub-pixel decomposition (output row/col parity):
    #   even out-rows <- kh=1 @ h=j,   kh=3 @ h=j-1
    #   odd  out-rows <- kh=2 @ h=j,   kh=0 @ h=j+1   (analogous for columns)
    r0 = p[:, :, :, 1, :, :] + _shift_fwd(p[:, :, :, 3, :, :], axis=1)
    r1 = p[:, :, :, 2, :, :] + _shift_bwd(p[:, :, :, 0, :, :], axis=1)
    y00 = r0[:, :, :, 1, :] + _shift_fwd(r0[:, :, :, 3, :], axis=2)
    y01 = r0[:, :, :, 2, :] + _shift_bwd(r0[:, :, :, 0, :], axis=2)
    y10 = r1[:, :, :, 1, :] + _shift_fwd(r1[:, :, :, 3, :], axis=2)
    y11 = r1[:, :, :, 2, :] + _shift_bwd(r1[:, :, :, 0, :], axis=2)
    ye = jnp.stack([y00, y01], axis=3)         # (B, H, W, 2, C)
    yo = jnp.stack([y10, y11], axis=3)
    y = jnp.stack([ye, yo], axis=2)            # (B, H, 2, W, 2, C)
    return y.reshape(B, 2 * H, 2 * W, C)       # depth-to-space interleave


def _deconv(x2d, B, H, W, wmat, stride, padding, cout):
    p = _deconv_matmul(x2d, wmat)                        # (B*H*W, K*K*Cpad) bf16
    cpad = wmat.shape[1] // (K * K)
    y = _col2im(p, B, H, W, cpad, stride, padding)       # (B, Ho, Wo, Cpad) f32
    return y[..., :cout]


def _bn_scale_shift(sum_row, sumsq_row, gamma, beta, wo, c, n):
    s = sum_row.reshape(wo, c).sum(axis=0)
    ss = sumsq_row.reshape(wo, c).sum(axis=0)
    mean = s / n
    var = jnp.maximum(ss / n - mean * mean, 0.0)         # clamp vs cancellation
    scale = gamma * lax.rsqrt(var + BN_EPS)
    shift = beta - mean * scale
    return (jnp.tile(scale, wo).reshape(1, wo * c),
            jnp.tile(shift, wo).reshape(1, wo * c))


def _block_forward(x2d, B, H, W, layer, stride, padding):
    gamma, beta = layer["gamma"], layer["beta"]
    cout = gamma.shape[0]
    y = _deconv(x2d, B, H, W, layer["wmat"], stride, padding, cout)
    _, Ho, Wo, C = y.shape
    y2d = y.reshape(B * Ho, Wo * C)                      # lane-dense layout
    sum_row, sumsq_row = _bn_stats(y2d)
    scale_row, shift_row = _bn_scale_shift(sum_row, sumsq_row, gamma, beta,
                                           Wo, C, B * Ho * Wo)
    a2d = _bn_apply_relu(y2d, scale_row, shift_row)      # (B*Ho, Wo*C) bf16
    return a2d.reshape(B * Ho * Wo, C), Ho, Wo


# ----------------------------------------------------------------------------
# Generator forward
# ----------------------------------------------------------------------------
def generator_forward(params, z, labels):
    # z: (B, latent_dim, 1, 1) NCHW like PyTorch; labels: (B,) int32
    B = z.shape[0]
    emb = params["embed"][labels]                         # nn.Embedding lookup
    x = jnp.concatenate([z.reshape(B, -1), emb], axis=1)  # cat along channel dim
    x2d = x.astype(jnp.bfloat16)                          # (B*1*1, latent+emb)
    H = W = 1

    strides = (1, 2, 2, 2)
    paddings = (0, 1, 1, 1)
    for i in range(4):                                    # four ConvT+BN+ReLU blocks
        x2d, H, W = _block_forward(x2d, B, H, W, params["blocks"][i],
                                   strides[i], paddings[i])

    fin = params["final"]                                 # ConvT (bias) + Tanh
    cimg = fin["bias"].shape[0]
    cpad = fin["wmat"].shape[1] // (K * K)
    y = _deconv(x2d, B, H, W, fin["wmat"], 2, 1, cpad)    # keep padded channels
    _, Ho, Wo, C = y.shape
    bias_row = jnp.tile(jnp.pad(fin["bias"], (0, cpad - cimg)), Wo).reshape(1, Wo * C)
    img2d = _bias_tanh(y.reshape(B * Ho, Wo * C), bias_row)
    img = img2d.reshape(B, Ho, Wo, C)[..., :cimg]
    return jnp.transpose(img, (0, 3, 1, 2))               # back to NCHW


# ----------------------------------------------------------------------------
# Parameters: synthetic PyTorch-layout params + one-time kernel-ready prep
# ----------------------------------------------------------------------------
def make_params(latent_dim, channels_img, features_g, num_classes, embedding_dim):
    """Synthetic params in the PyTorch layouts (ConvT weight = (Cin, Cout, K, K))."""
    key = jax.random.PRNGKey(0)
    ks = jax.random.split(key, 16)
    cin0 = latent_dim + embedding_dim
    chans = [cin0, features_g * 16, features_g * 8, features_g * 4, features_g * 2]

    blocks = []
    for i in range(4):
        w = 0.02 * jax.random.normal(ks[i], (chans[i], chans[i + 1], K, K), jnp.float32)
        g = 1.0 + 0.1 * jax.random.normal(ks[4 + i], (chans[i + 1],), jnp.float32)
        b = 0.1 * jax.random.normal(ks[8 + i], (chans[i + 1],), jnp.float32)
        blocks.append((w, g, b))

    w_fin = 0.02 * jax.random.normal(ks[12], (chans[4], channels_img, K, K), jnp.float32)
    b_fin = 0.02 * jax.random.normal(ks[13], (channels_img,), jnp.float32)
    embed = jax.random.normal(ks[14], (num_classes, embedding_dim), jnp.float32)
    return {"blocks": blocks, "final": (w_fin, b_fin), "embed": embed}


def prepare_params(raw):
    """One-time weight prep hoisted out of the per-call forward: transpose to
    (Cin, K, K, Cout), pad Cout to a multiple of 8 (lane-dense K*K*Cout),
    flatten to (Cin, K*K*Cout) and cast to bf16.  No kernel flip is needed in
    the output-side transposed-conv formulation."""
    blocks = []
    for (w, g, b) in raw["blocks"]:
        cin, cout = w.shape[0], w.shape[1]
        cpad = _round_up(cout, 8)
        wp = jnp.pad(w, ((0, 0), (0, cpad - cout), (0, 0), (0, 0)))
        wmat = jnp.transpose(wp, (0, 2, 3, 1)).reshape(cin, K * K * cpad)
        blocks.append({"wmat": wmat.astype(jnp.bfloat16),
                       "gamma": g.astype(jnp.float32),
                       "beta": b.astype(jnp.float32)})
    w, b = raw["final"]
    cin, cimg = w.shape[0], w.shape[1]
    cpad = _round_up(cimg, 8)
    wp = jnp.pad(w, ((0, 0), (0, cpad - cimg), (0, 0), (0, 0)))
    wmat = jnp.transpose(wp, (0, 2, 3, 1)).reshape(cin, K * K * cpad)
    return {"blocks": blocks,
            "final": {"wmat": wmat.astype(jnp.bfloat16), "bias": b.astype(jnp.float32)},
            "embed": raw["embed"].astype(jnp.float32)}


if __name__ == "__main__":
    latent_dim, channels_img, features_g = 32, 3, 4
    num_classes, embedding_dim = 10, 16
    batch = 2

    raw = make_params(latent_dim, channels_img, features_g, num_classes, embedding_dim)
    params = prepare_params(raw)

    key = jax.random.PRNGKey(0)
    kz, kl = jax.random.split(key)
    z = jax.random.normal(kz, (batch, latent_dim, 1, 1), jnp.float32)
    labels = jax.random.randint(kl, (batch,), 0, num_classes, jnp.int32)

    img = jax.jit(generator_forward)(params, z, labels)
    img = jax.block_until_ready(img)

    assert img.shape == (batch, channels_img, 64, 64), img.shape
    assert bool(jnp.all(jnp.isfinite(img)))
    assert bool(jnp.all(jnp.abs(img) <= 1.0))   # Tanh output range
    print("KERNEL_OK")
</pallas_src>

<mosaic_0001>
module attributes {stable_mosaic.version = 11 : i64} {
  func.func @bn_stats_kernel(%arg0: i32, %arg1: memref<8x256xf32, #tpu.memory_space<vmem>>, %arg2: memref<8x256xf32, #tpu.memory_space<vmem>>) attributes {dimension_semantics = [#tpu.dimension_semantics<parallel>], iteration_bounds = array<i64: 1>, scalar_prefetch = 0 : i64, scratch_operands = 0 : i64, tpu.core_type = #tpu.core_type<tc>, window_params = [{transform_indices = @transform_0, window_bounds = array<i64: 8, 256>}, {transform_indices = @transform_1, window_bounds = array<i64: 8, 256>}]} {
    %c0 = arith.constant 0 : index
    %c0_0 = arith.constant 0 : index
    %0 = vector.load %arg1[%c0, %c0_0] : memref<8x256xf32, #tpu.memory_space<vmem>>, vector<8x256xf32>
    %cst = arith.constant 0.000000e+00 : f32
    %1 = vector.broadcast %cst : f32 to vector<8x256xf32>
    %c0_1 = arith.constant 0 : index
    %c0_2 = arith.constant 0 : index
    %2 = vector.load %arg2[%c0_1, %c0_2] : memref<8x256xf32, #tpu.memory_space<vmem>>, vector<8x256xf32>
    tpu.vector_store %arg2[%c0_1, %c0_2], %1 {strides = array<i32>} : memref<8x256xf32, #tpu.memory_space<vmem>>, vector<8x256xf32>,
    %cst_3 = arith.constant dense<0.000000e+00> : vector<256xf32>
    %3 = vector.multi_reduction <add>, %0, %cst_3 [0] : vector<8x256xf32> to vector<256xf32>
    %4 = vector.shape_cast %3 : vector<256xf32> to vector<1x256xf32>
    %c0_4 = arith.constant 0 : index
    %c0_5 = arith.constant 0 : index
    %5 = vector.load %arg2[%c0_4, %c0_5] : memref<8x256xf32, #tpu.memory_space<vmem>>, vector<1x256xf32>
    tpu.vector_store %arg2[%c0_4, %c0_5], %4 {strides = array<i32>} : memref<8x256xf32, #tpu.memory_space<vmem>>, vector<1x256xf32>,
    %6 = arith.mulf %0, %0 : vector<8x256xf32>
    %cst_6 = arith.constant dense<0.000000e+00> : vector<256xf32>
    %7 = vector.multi_reduction <add>, %6, %cst_6 [0] : vector<8x256xf32> to vector<256xf32>
    %8 = vector.shape_cast %7 : vector<256xf32> to vector<1x256xf32>
    %c1 = arith.constant 1 : index
    %c0_7 = arith.constant 0 : index
    %9 = vector.load %arg2[%c1, %c0_7] : memref<8x256xf32, #tpu.memory_space<vmem>>, vector<1x256xf32>
    tpu.vector_store %arg2[%c1, %c0_7], %8 {strides = array<i32>} : memref<8x256xf32, #tpu.memory_space<vmem>>, vector<1x256xf32>,
    return
  }
  func.func @transform_0(%arg0: i32) -> (i32, i32) {
    %c0_i32 = arith.constant 0 : i32
    %c0_i32_0 = arith.constant 0 : i32
    return %arg0, %c0_i32 : i32, i32
  }
  func.func @transform_1(%arg0: i32) -> (i32, i32) {
    %c0_i32 = arith.constant 0 : i32
    %c0_i32_0 = arith.constant 0 : i32
    return %arg0, %c0_i32 : i32, i32
  }
}

module attributes {stable_mosaic.version = 11 : i64} {
  func.func @matmul_kernel(%arg0: i32, %arg1: memref<8x48xbf16, #tpu.memory_space<vmem>>, %arg2: memref<48x1024xbf16, #tpu.memory_space<vmem>>, %arg3: memref<8x1024xbf16, #tpu.memory_space<vmem>>) attributes {dimension_semantics = [#tpu.dimension_semantics<parallel>], iteration_bounds = array<i64: 1>, scalar_prefetch = 0 : i64, scratch_operands = 0 : i64, tpu.core_type = #tpu.core_type<tc>, window_params = [{transform_indices = @transform_0, window_bounds = array<i64: 8, 48>}, {pipeline_mode = #tpu.pipeline_mode<synchronous>, transform_indices = @transform_1, window_bounds = array<i64: 48, 1024>}, {transform_indices = @transform_2, window_bounds = array<i64: 8, 1024>}]} {
    %c0 = arith.constant 0 : index
    %c0_0 = arith.constant 0 : index
    %0 = vector.load %arg1[%c0, %c0_0] : memref<8x48xbf16, #tpu.memory_space<vmem>>, vector<8x48xbf16>
    %c0_1 = arith.constant 0 : index
    %c0_2 = arith.constant 0 : index
    %1 = vector.load %arg2[%c0_1, %c0_2] : memref<48x1024xbf16, #tpu.memory_space<vmem>>, vector<48x1024xbf16>
    %cst = arith.constant dense<0.000000e+00> : vector<8x1024xf32>
    %2 = tpu.matmul %0, %1, %cst {dimension_numbers = #tpu.dot_dimension_numbers<[1], [0], [0], [1], [0, 0, 1, 1], [], []>} : vector<8x48xbf16>, vector<48x1024xbf16>, vector<8x1024xf32> -> vector<8x1024xf32>
    %3 = arith.truncf %2 : vector<8x1024xf32> to vector<8x1024xbf16>
    %c0_3 = arith.constant 0 : index
    %c0_4 = arith.constant 0 : index
    %4 = vector.load %arg3[%c0_3, %c0_4] : memref<8x1024xbf16, #tpu.memory_space<vmem>>, vector<8x1024xbf16>
    tpu.vector_store %arg3[%c0_3, %c0_4], %3 {strides = array<i32>} : memref<8x1024xbf16, #tpu.memory_space<vmem>>, vector<8x1024xbf16>,
    return
  }
  func.func @transform_0(%arg0: i32) -> (i32, i32) {
    %c0_i32 = arith.constant 0 : i32
    %c0_i32_0 = arith.constant 0 : i32
    return %arg0, %c0_i32 : i32, i32
  }
  func.func @transform_1(%arg0: i32) -> (i32, i32) {
    %c0_i32 = arith.constant 0 : i32
    %c0_i32_0 = arith.constant 0 : i32
    %c0_i32_1 = arith.constant 0 : i32
    return %c0_i32, %c0_i32_0 : i32, i32
  }
  func.func @transform_2(%arg0: i32) -> (i32, i32) {
    %c0_i32 = arith.constant 0 : i32
    %c0_i32_0 = arith.constant 0 : i32
    return %arg0, %c0_i32 : i32, i32
  }
}

module attributes {stable_mosaic.version = 11 : i64} {
  func.func @bn_apply_relu_kernel(%arg0: i32, %arg1: memref<8x256xf32, #tpu.memory_space<vmem>>, %arg2: memref<1x256xf32, #tpu.memory_space<vmem>>, %arg3: memref<1x256xf32, #tpu.memory_space<vmem>>, %arg4: memref<8x256xbf16, #tpu.memory_space<vmem>>) attributes {dimension_semantics = [#tpu.dimension_semantics<parallel>], iteration_bounds = array<i64: 1>, scalar_prefetch = 0 : i64, scratch_operands = 0 : i64, tpu.core_type = #tpu.core_type<tc>, window_params = [{transform_indices = @transform_0, window_bounds = array<i64: 8, 256>}, {pipeline_mode = #tpu.pipeline_mode<synchronous>, transform_indices = @transform_1, window_bounds = array<i64: 1, 256>}, {pipeline_mode = #tpu.pipeline_mode<synchronous>, transform_indices = @transform_2, window_bounds = array<i64: 1, 256>}, {transform_indices = @transform_3, window_bounds = array<i64: 8, 256>}]} {
    %c0 = arith.constant 0 : index
    %c0_0 = arith.constant 0 : index
    %0 = vector.load %arg1[%c0, %c0_0] : memref<8x256xf32, #tpu.memory_space<vmem>>, vector<8x256xf32>
    %c0_1 = arith.constant 0 : index
    %c0_2 = arith.constant 0 : index
    %1 = vector.load %arg2[%c0_1, %c0_2] : memref<1x256xf32, #tpu.memory_space<vmem>>, vector<1x256xf32>
    %2 = vector.broadcast %1 : vector<1x256xf32> to vector<8x256xf32>
    %3 = arith.mulf %0, %2 : vector<8x256xf32>
    %c0_3 = arith.constant 0 : index
    %c0_4 = arith.constant 0 : index
    %4 = vector.load %arg3[%c0_3, %c0_4] : memref<1x256xf32, #tpu.memory_space<vmem>>, vector<1x256xf32>
    %5 = vector.broadcast %4 : vector<1x256xf32> to vector<8x256xf32>
    %6 = arith.addf %3, %5 : vector<8x256xf32>
    %cst = arith.constant 0.000000e+00 : f32
    %7 = vector.broadcast %cst : f32 to vector<8x256xf32>
    %8 = arith.maximumf %6, %7 : vector<8x256xf32>
    %9 = arith.truncf %8 : vector<8x256xf32> to vector<8x256xbf16>
    %c0_5 = arith.constant 0 : index
    %c0_6 = arith.constant 0 : index
    %10 = vector.load %arg4[%c0_5, %c0_6] : memref<8x256xbf16, #tpu.memory_space<vmem>>, vector<8x256xbf16>
    tpu.vector_store %arg4[%c0_5, %c0_6], %9 {strides = array<i32>} : memref<8x256xbf16, #tpu.memory_space<vmem>>, vector<8x256xbf16>,
    return
  }
  func.func @transform_0(%arg0: i32) -> (i32, i32) {
    %c0_i32 = arith.constant 0 : i32
    %c0_i32_0 = arith.constant 0 : i32
    return %arg0, %c0_i32 : i32, i32
  }
  func.func @transform_1(%arg0: i32) -> (i32, i32) {
    %c0_i32 = arith.constant 0 : i32
    %c0_i32_0 = arith.constant 0 : i32
    %c0_i32_1 = arith.constant 0 : i32
    return %c0_i32, %c0_i32_0 : i32, i32
  }
  func.func @transform_2(%arg0: i32) -> (i32, i32) {
    %c0_i32 = arith.constant 0 : i32
    %c0_i32_0 = arith.constant 0 : i32
    %c0_i32_1 = arith.constant 0 : i32
    return %c0_i32, %c0_i32_0 : i32, i32
  }
  func.func @transform_3(%arg0: i32) -> (i32, i32) {
    %c0_i32 = arith.constant 0 : i32
    %c0_i32_0 = arith.constant 0 : i32
    return %arg0, %c0_i32 : i32, i32
  }
}

module attributes {stable_mosaic.version = 11 : i64} {
  func.func @matmul_kernel(%arg0: i32, %arg1: memref<32x64xbf16, #tpu.memory_space<vmem>>, %arg2: memref<64x512xbf16, #tpu.memory_space<vmem>>, %arg3: memref<32x512xbf16, #tpu.memory_space<vmem>>) attributes {dimension_semantics = [#tpu.dimension_semantics<parallel>], iteration_bounds = array<i64: 1>, scalar_prefetch = 0 : i64, scratch_operands = 0 : i64, tpu.core_type = #tpu.core_type<tc>, window_params = [{transform_indices = @transform_0, window_bounds = array<i64: 32, 64>}, {pipeline_mode = #tpu.pipeline_mode<synchronous>, transform_indices = @transform_1, window_bounds = array<i64: 64, 512>}, {transform_indices = @transform_2, window_bounds = array<i64: 32, 512>}]} {
    %c0 = arith.constant 0 : index
    %c0_0 = arith.constant 0 : index
    %0 = vector.load %arg1[%c0, %c0_0] : memref<32x64xbf16, #tpu.memory_space<vmem>>, vector<32x64xbf16>
    %c0_1 = arith.constant 0 : index
    %c0_2 = arith.constant 0 : index
    %1 = vector.load %arg2[%c0_1, %c0_2] : memref<64x512xbf16, #tpu.memory_space<vmem>>, vector<64x512xbf16>
    %cst = arith.constant dense<0.000000e+00> : vector<32x512xf32>
    %2 = tpu.matmul %0, %1, %cst {dimension_numbers = #tpu.dot_dimension_numbers<[1], [0], [0], [1], [0, 0, 1, 1], [], []>} : vector<32x64xbf16>, vector<64x512xbf16>, vector<32x512xf32> -> vector<32x512xf32>
    %3 = arith.truncf %2 : vector<32x512xf32> to vector<32x512xbf16>
    %c0_3 = arith.constant 0 : index
    %c0_4 = arith.constant 0 : index
    %4 = vector.load %arg3[%c0_3, %c0_4] : memref<32x512xbf16, #tpu.memory_space<vmem>>, vector<32x512xbf16>
    tpu.vector_store %arg3[%c0_3, %c0_4], %3 {strides = array<i32>} : memref<32x512xbf16, #tpu.memory_space<vmem>>, vector<32x512xbf16>,
    return
  }
  func.func @transform_0(%arg0: i32) -> (i32, i32) {
    %c0_i32 = arith.constant 0 : i32
    %c0_i32_0 = arith.constant 0 : i32
    return %arg0, %c0_i32 : i32, i32
  }
  func.func @transform_1(%arg0: i32) -> (i32, i32) {
    %c0_i32 = arith.constant 0 : i32
    %c0_i32_0 = arith.constant 0 : i32
    %c0_i32_1 = arith.constant 0 : i32
    return %c0_i32, %c0_i32_0 : i32, i32
  }
  func.func @transform_2(%arg0: i32) -> (i32, i32) {
    %c0_i32 = arith.constant 0 : i32
    %c0_i32_0 = arith.constant 0 : i32
    return %arg0, %c0_i32 : i32, i32
  }
}

module attributes {stable_mosaic.version = 11 : i64} {
  func.func @bn_stats_kernel(%arg0: i32, %arg1: memref<16x256xf32, #tpu.memory_space<vmem>>, %arg2: memref<8x256xf32, #tpu.memory_space<vmem>>) attributes {dimension_semantics = [#tpu.dimension_semantics<parallel>], iteration_bounds = array<i64: 1>, scalar_prefetch = 0 : i64, scratch_operands = 0 : i64, tpu.core_type = #tpu.core_type<tc>, window_params = [{transform_indices = @transform_0, window_bounds = array<i64: 16, 256>}, {transform_indices = @transform_1, window_bounds = array<i64: 8, 256>}]} {
    %c0 = arith.constant 0 : index
    %c0_0 = arith.constant 0 : index
    %0 = vector.load %arg1[%c0, %c0_0] : memref<16x256xf32, #tpu.memory_space<vmem>>, vector<16x256xf32>
    %cst = arith.constant 0.000000e+00 : f32
    %1 = vector.broadcast %cst : f32 to vector<8x256xf32>
    %c0_1 = arith.constant 0 : index
    %c0_2 = arith.constant 0 : index
    %2 = vector.load %arg2[%c0_1, %c0_2] : memref<8x256xf32, #tpu.memory_space<vmem>>, vector<8x256xf32>
    tpu.vector_store %arg2[%c0_1, %c0_2], %1 {strides = array<i32>} : memref<8x256xf32, #tpu.memory_space<vmem>>, vector<8x256xf32>,
    %cst_3 = arith.constant dense<0.000000e+00> : vector<256xf32>
    %3 = vector.multi_reduction <add>, %0, %cst_3 [0] : vector<16x256xf32> to vector<256xf32>
    %4 = vector.shape_cast %3 : vector<256xf32> to vector<1x256xf32>
    %c0_4 = arith.constant 0 : index
    %c0_5 = arith.constant 0 : index
    %5 = vector.load %arg2[%c0_4, %c0_5] : memref<8x256xf32, #tpu.memory_space<vmem>>, vector<1x256xf32>
    tpu.vector_store %arg2[%c0_4, %c0_5], %4 {strides = array<i32>} : memref<8x256xf32, #tpu.memory_space<vmem>>, vector<1x256xf32>,
    %6 = arith.mulf %0, %0 : vector<16x256xf32>
    %cst_6 = arith.constant dense<0.000000e+00> : vector<256xf32>
    %7 = vector.multi_reduction <add>, %6, %cst_6 [0] : vector<16x256xf32> to vector<256xf32>
    %8 = vector.shape_cast %7 : vector<256xf32> to vector<1x256xf32>
    %c1 = arith.constant 1 : index
    %c0_7 = arith.constant 0 : index
    %9 = vector.load %arg2[%c1, %c0_7] : memref<8x256xf32, #tpu.memory_space<vmem>>, vector<1x256xf32>
    tpu.vector_store %arg2[%c1, %c0_7], %8 {strides = array<i32>} : memref<8x256xf32, #tpu.memory_space<vmem>>, vector<1x256xf32>,
    return
  }
  func.func @transform_0(%arg0: i32) -> (i32, i32) {
    %c0_i32 = arith.constant 0 : i32
    %c0_i32_0 = arith.constant 0 : i32
    return %arg0, %c0_i32 : i32, i32
  }
  func.func @transform_1(%arg0: i32) -> (i32, i32) {
    %c0_i32 = arith.constant 0 : i32
    %c0_i32_0 = arith.constant 0 : i32
    return %arg0, %c0_i32 : i32, i32
  }
}

module attributes {stable_mosaic.version = 11 : i64} {
  func.func @matmul_kernel(%arg0: i32, %arg1: memref<128x32xbf16, #tpu.memory_space<vmem>>, %arg2: memref<32x256xbf16, #tpu.memory_space<vmem>>, %arg3: memref<128x256xbf16, #tpu.memory_space<vmem>>) attributes {dimension_semantics = [#tpu.dimension_semantics<parallel>], iteration_bounds = array<i64: 1>, scalar_prefetch = 0 : i64, scratch_operands = 0 : i64, tpu.core_type = #tpu.core_type<tc>, window_params = [{transform_indices = @transform_0, window_bounds = array<i64: 128, 32>}, {pipeline_mode = #tpu.pipeline_mode<synchronous>, transform_indices = @transform_1, window_bounds = array<i64: 32, 256>}, {transform_indices = @transform_2, window_bounds = array<i64: 128, 256>}]} {
    %c0 = arith.constant 0 : index
    %c0_0 = arith.constant 0 : index
    %0 = vector.load %arg1[%c0, %c0_0] : memref<128x32xbf16, #tpu.memory_space<vmem>>, vector<128x32xbf16>
    %c0_1 = arith.constant 0 : index
    %c0_2 = arith.constant 0 : index
    %1 = vector.load %arg2[%c0_1, %c0_2] : memref<32x256xbf16, #tpu.memory_space<vmem>>, vector<32x256xbf16>
    %cst = arith.constant dense<0.000000e+00> : vector<128x256xf32>
    %2 = tpu.matmul %0, %1, %cst {dimension_numbers = #tpu.dot_dimension_numbers<[1], [0], [0], [1], [0, 0, 1, 1], [], []>} : vector<128x32xbf16>, vector<32x256xbf16>, vector<128x256xf32> -> vector<128x256xf32>
    %3 = arith.truncf %2 : vector<128x256xf32> to vector<128x256xbf16>
    %c0_3 = arith.constant 0 : index
    %c0_4 = arith.constant 0 : index
    %4 = vector.load %arg3[%c0_3, %c0_4] : memref<128x256xbf16, #tpu.memory_space<vmem>>, vector<128x256xbf16>
    tpu.vector_store %arg3[%c0_3, %c0_4], %3 {strides = array<i32>} : memref<128x256xbf16, #tpu.memory_space<vmem>>, vector<128x256xbf16>,
    return
  }
  func.func @transform_0(%arg0: i32) -> (i32, i32) {
    %c0_i32 = arith.constant 0 : i32
    %c0_i32_0 = arith.constant 0 : i32
    return %arg0, %c0_i32 : i32, i32
  }
  func.func @transform_1(%arg0: i32) -> (i32, i32) {
    %c0_i32 = arith.constant 0 : i32
    %c0_i32_0 = arith.constant 0 : i32
    %c0_i32_1 = arith.constant 0 : i32
    return %c0_i32, %c0_i32_0 : i32, i32
  }
  func.func @transform_2(%arg0: i32) -> (i32, i32) {
    %c0_i32 = arith.constant 0 : i32
    %c0_i32_0 = arith.constant 0 : i32
    return %arg0, %c0_i32 : i32, i32
  }
}

module attributes {stable_mosaic.version = 11 : i64} {
  func.func @bn_apply_relu_kernel(%arg0: i32, %arg1: memref<16x256xf32, #tpu.memory_space<vmem>>, %arg2: memref<1x256xf32, #tpu.memory_space<vmem>>, %arg3: memref<1x256xf32, #tpu.memory_space<vmem>>, %arg4: memref<16x256xbf16, #tpu.memory_space<vmem>>) attributes {dimension_semantics = [#tpu.dimension_semantics<parallel>], iteration_bounds = array<i64: 1>, scalar_prefetch = 0 : i64, scratch_operands = 0 : i64, tpu.core_type = #tpu.core_type<tc>, window_params = [{transform_indices = @transform_0, window_bounds = array<i64: 16, 256>}, {pipeline_mode = #tpu.pipeline_mode<synchronous>, transform_indices = @transform_1, window_bounds = array<i64: 1, 256>}, {pipeline_mode = #tpu.pipeline_mode<synchronous>, transform_indices = @transform_2, window_bounds = array<i64: 1, 256>}, {transform_indices = @transform_3, window_bounds = array<i64: 16, 256>}]} {
    %c0 = arith.constant 0 : index
    %c0_0 = arith.constant 0 : index
    %0 = vector.load %arg1[%c0, %c0_0] : memref<16x256xf32, #tpu.memory_space<vmem>>, vector<16x256xf32>
    %c0_1 = arith.constant 0 : index
    %c0_2 = arith.constant 0 : index
    %1 = vector.load %arg2[%c0_1, %c0_2] : memref<1x256xf32, #tpu.memory_space<vmem>>, vector<1x256xf32>
    %2 = vector.broadcast %1 : vector<1x256xf32> to vector<16x256xf32>
    %3 = arith.mulf %0, %2 : vector<16x256xf32>
    %c0_3 = arith.constant 0 : index
    %c0_4 = arith.constant 0 : index
    %4 = vector.load %arg3[%c0_3, %c0_4] : memref<1x256xf32, #tpu.memory_space<vmem>>, vector<1x256xf32>
    %5 = vector.broadcast %4 : vector<1x256xf32> to vector<16x256xf32>
    %6 = arith.addf %3, %5 : vector<16x256xf32>
    %cst = arith.constant 0.000000e+00 : f32
    %7 = vector.broadcast %cst : f32 to vector<16x256xf32>
    %8 = arith.maximumf %6, %7 : vector<16x256xf32>
    %9 = arith.truncf %8 : vector<16x256xf32> to vector<16x256xbf16>
    %c0_5 = arith.constant 0 : index
    %c0_6 = arith.constant 0 : index
    %10 = vector.load %arg4[%c0_5, %c0_6] : memref<16x256xbf16, #tpu.memory_space<vmem>>, vector<16x256xbf16>
    tpu.vector_store %arg4[%c0_5, %c0_6], %9 {strides = array<i32>} : memref<16x256xbf16, #tpu.memory_space<vmem>>, vector<16x256xbf16>,
    return
  }
  func.func @transform_0(%arg0: i32) -> (i32, i32) {
    %c0_i32 = arith.constant 0 : i32
    %c0_i32_0 = arith.constant 0 : i32
    return %arg0, %c0_i32 : i32, i32
  }
  func.func @transform_1(%arg0: i32) -> (i32, i32) {
    %c0_i32 = arith.constant 0 : i32
    %c0_i32_0 = arith.constant 0 : i32
    %c0_i32_1 = arith.constant 0 : i32
    return %c0_i32, %c0_i32_0 : i32, i32
  }
  func.func @transform_2(%arg0: i32) -> (i32, i32) {
    %c0_i32 = arith.constant 0 : i32
    %c0_i32_0 = arith.constant 0 : i32
    %c0_i32_1 = arith.constant 0 : i32
    return %c0_i32, %c0_i32_0 : i32, i32
  }
  func.func @transform_3(%arg0: i32) -> (i32, i32) {
    %c0_i32 = arith.constant 0 : i32
    %c0_i32_0 = arith.constant 0 : i32
    return %arg0, %c0_i32 : i32, i32
  }
}

module attributes {stable_mosaic.version = 11 : i64} {
  func.func @bn_stats_kernel(%arg0: i32, %arg1: memref<32x256xf32, #tpu.memory_space<vmem>>, %arg2: memref<8x256xf32, #tpu.memory_space<vmem>>) attributes {dimension_semantics = [#tpu.dimension_semantics<parallel>], iteration_bounds = array<i64: 1>, scalar_prefetch = 0 : i64, scratch_operands = 0 : i64, tpu.core_type = #tpu.core_type<tc>, window_params = [{transform_indices = @transform_0, window_bounds = array<i64: 32, 256>}, {transform_indices = @transform_1, window_bounds = array<i64: 8, 256>}]} {
    %c0 = arith.constant 0 : index
    %c0_0 = arith.constant 0 : index
    %0 = vector.load %arg1[%c0, %c0_0] : memref<32x256xf32, #tpu.memory_space<vmem>>, vector<32x256xf32>
    %cst = arith.constant 0.000000e+00 : f32
    %1 = vector.broadcast %cst : f32 to vector<8x256xf32>
    %c0_1 = arith.constant 0 : index
    %c0_2 = arith.constant 0 : index
    %2 = vector.load %arg2[%c0_1, %c0_2] : memref<8x256xf32, #tpu.memory_space<vmem>>, vector<8x256xf32>
    tpu.vector_store %arg2[%c0_1, %c0_2], %1 {strides = array<i32>} : memref<8x256xf32, #tpu.memory_space<vmem>>, vector<8x256xf32>,
    %cst_3 = arith.constant dense<0.000000e+00> : vector<256xf32>
    %3 = vector.multi_reduction <add>, %0, %cst_3 [0] : vector<32x256xf32> to vector<256xf32>
    %4 = vector.shape_cast %3 : vector<256xf32> to vector<1x256xf32>
    %c0_4 = arith.constant 0 : index
    %c0_5 = arith.constant 0 : index
    %5 = vector.load %arg2[%c0_4, %c0_5] : memref<8x256xf32, #tpu.memory_space<vmem>>, vector<1x256xf32>
    tpu.vector_store %arg2[%c0_4, %c0_5], %4 {strides = array<i32>} : memref<8x256xf32, #tpu.memory_space<vmem>>, vector<1x256xf32>,
    %6 = arith.mulf %0, %0 : vector<32x256xf32>
    %cst_6 = arith.constant dense<0.000000e+00> : vector<256xf32>
    %7 = vector.multi_reduction <add>, %6, %cst_6 [0] : vector<32x256xf32> to vector<256xf32>
    %8 = vector.shape_cast %7 : vector<256xf32> to vector<1x256xf32>
    %c1 = arith.constant 1 : index
    %c0_7 = arith.constant 0 : index
    %9 = vector.load %arg2[%c1, %c0_7] : memref<8x256xf32, #tpu.memory_space<vmem>>, vector<1x256xf32>
    tpu.vector_store %arg2[%c1, %c0_7], %8 {strides = array<i32>} : memref<8x256xf32, #tpu.memory_space<vmem>>, vector<1x256xf32>,
    return
  }
  func.func @transform_0(%arg0: i32) -> (i32, i32) {
    %c0_i32 = arith.constant 0 : i32
    %c0_i32_0 = arith.constant 0 : i32
    return %arg0, %c0_i32 : i32, i32
  }
  func.func @transform_1(%arg0: i32) -> (i32, i32) {
    %c0_i32 = arith.constant 0 : i32
    %c0_i32_0 = arith.constant 0 : i32
    return %arg0, %c0_i32 : i32, i32
  }
}

module attributes {stable_mosaic.version = 11 : i64} {
  func.func @bn_apply_relu_kernel(%arg0: i32, %arg1: memref<32x256xf32, #tpu.memory_space<vmem>>, %arg2: memref<1x256xf32, #tpu.memory_space<vmem>>, %arg3: memref<1x256xf32, #tpu.memory_space<vmem>>, %arg4: memref<32x256xbf16, #tpu.memory_space<vmem>>) attributes {dimension_semantics = [#tpu.dimension_semantics<parallel>], iteration_bounds = array<i64: 1>, scalar_prefetch = 0 : i64, scratch_operands = 0 : i64, tpu.core_type = #tpu.core_type<tc>, window_params = [{transform_indices = @transform_0, window_bounds = array<i64: 32, 256>}, {pipeline_mode = #tpu.pipeline_mode<synchronous>, transform_indices = @transform_1, window_bounds = array<i64: 1, 256>}, {pipeline_mode = #tpu.pipeline_mode<synchronous>, transform_indices = @transform_2, window_bounds = array<i64: 1, 256>}, {transform_indices = @transform_3, window_bounds = array<i64: 32, 256>}]} {
    %c0 = arith.constant 0 : index
    %c0_0 = arith.constant 0 : index
    %0 = vector.load %arg1[%c0, %c0_0] : memref<32x256xf32, #tpu.memory_space<vmem>>, vector<32x256xf32>
    %c0_1 = arith.constant 0 : index
    %c0_2 = arith.constant 0 : index
    %1 = vector.load %arg2[%c0_1, %c0_2] : memref<1x256xf32, #tpu.memory_space<vmem>>, vector<1x256xf32>
    %2 = vector.broadcast %1 : vector<1x256xf32> to vector<32x256xf32>
    %3 = arith.mulf %0, %2 : vector<32x256xf32>
    %c0_3 = arith.constant 0 : index
    %c0_4 = arith.constant 0 : index
    %4 = vector.load %arg3[%c0_3, %c0_4] : memref<1x256xf32, #tpu.memory_space<vmem>>, vector<1x256xf32>
    %5 = vector.broadcast %4 : vector<1x256xf32> to vector<32x256xf32>
    %6 = arith.addf %3, %5 : vector<32x256xf32>
    %cst = arith.constant 0.000000e+00 : f32
    %7 = vector.broadcast %cst : f32 to vector<32x256xf32>
    %8 = arith.maximumf %6, %7 : vector<32x256xf32>
    %9 = arith.truncf %8 : vector<32x256xf32> to vector<32x256xbf16>
    %c0_5 = arith.constant 0 : index
    %c0_6 = arith.constant 0 : index
    %10 = vector.load %arg4[%c0_5, %c0_6] : memref<32x256xbf16, #tpu.memory_space<vmem>>, vector<32x256xbf16>
    tpu.vector_store %arg4[%c0_5, %c0_6], %9 {strides = array<i32>} : memref<32x256xbf16, #tpu.memory_space<vmem>>, vector<32x256xbf16>,
    return
  }
  func.func @transform_0(%arg0: i32) -> (i32, i32) {
    %c0_i32 = arith.constant 0 : i32
    %c0_i32_0 = arith.constant 0 : i32
    return %arg0, %c0_i32 : i32, i32
  }
  func.func @transform_1(%arg0: i32) -> (i32, i32) {
    %c0_i32 = arith.constant 0 : i32
    %c0_i32_0 = arith.constant 0 : i32
    %c0_i32_1 = arith.constant 0 : i32
    return %c0_i32, %c0_i32_0 : i32, i32
  }
  func.func @transform_2(%arg0: i32) -> (i32, i32) {
    %c0_i32 = arith.constant 0 : i32
    %c0_i32_0 = arith.constant 0 : i32
    %c0_i32_1 = arith.constant 0 : i32
    return %c0_i32, %c0_i32_0 : i32, i32
  }
  func.func @transform_3(%arg0: i32) -> (i32, i32) {
    %c0_i32 = arith.constant 0 : i32
    %c0_i32_0 = arith.constant 0 : i32
    return %arg0, %c0_i32 : i32, i32
  }
}

module attributes {stable_mosaic.version = 11 : i64} {
  func.func @matmul_kernel(%arg0: i32, %arg1: memref<512x16xbf16, #tpu.memory_space<vmem>>, %arg2: memref<16x128xbf16, #tpu.memory_space<vmem>>, %arg3: memref<512x128xbf16, #tpu.memory_space<vmem>>) attributes {dimension_semantics = [#tpu.dimension_semantics<parallel>], iteration_bounds = array<i64: 1>, scalar_prefetch = 0 : i64, scratch_operands = 0 : i64, tpu.core_type = #tpu.core_type<tc>, window_params = [{transform_indices = @transform_0, window_bounds = array<i64: 512, 16>}, {pipeline_mode = #tpu.pipeline_mode<synchronous>, transform_indices = @transform_1, window_bounds = array<i64: 16, 128>}, {transform_indices = @transform_2, window_bounds = array<i64: 512, 128>}]} {
    %c0 = arith.constant 0 : index
    %c0_0 = arith.constant 0 : index
    %0 = vector.load %arg1[%c0, %c0_0] : memref<512x16xbf16, #tpu.memory_space<vmem>>, vector<512x16xbf16>
    %c0_1 = arith.constant 0 : index
    %c0_2 = arith.constant 0 : index
    %1 = vector.load %arg2[%c0_1, %c0_2] : memref<16x128xbf16, #tpu.memory_space<vmem>>, vector<16x128xbf16>
    %cst = arith.constant dense<0.000000e+00> : vector<512x128xf32>
    %2 = tpu.matmul %0, %1, %cst {dimension_numbers = #tpu.dot_dimension_numbers<[1], [0], [0], [1], [0, 0, 1, 1], [], []>} : vector<512x16xbf16>, vector<16x128xbf16>, vector<512x128xf32> -> vector<512x128xf32>
    %3 = arith.truncf %2 : vector<512x128xf32> to vector<512x128xbf16>
    %c0_3 = arith.constant 0 : index
    %c0_4 = arith.constant 0 : index
    %4 = vector.load %arg3[%c0_3, %c0_4] : memref<512x128xbf16, #tpu.memory_space<vmem>>, vector<512x128xbf16>
    tpu.vector_store %arg3[%c0_3, %c0_4], %3 {strides = array<i32>} : memref<512x128xbf16, #tpu.memory_space<vmem>>, vector<512x128xbf16>,
    return
  }
  func.func @transform_0(%arg0: i32) -> (i32, i32) {
    %c0_i32 = arith.constant 0 : i32
    %c0_i32_0 = arith.constant 0 : i32
    return %arg0, %c0_i32 : i32, i32
  }
  func.func @transform_1(%arg0: i32) -> (i32, i32) {
    %c0_i32 = arith.constant 0 : i32
    %c0_i32_0 = arith.constant 0 : i32
    %c0_i32_1 = arith.constant 0 : i32
    return %c0_i32, %c0_i32_0 : i32, i32
  }
  func.func @transform_2(%arg0: i32) -> (i32, i32) {
    %c0_i32 = arith.constant 0 : i32
    %c0_i32_0 = arith.constant 0 : i32
    return %arg0, %c0_i32 : i32, i32
  }
}

module attributes {stable_mosaic.version = 11 : i64} {
  func.func @bn_stats_kernel(%arg0: i32, %arg1: memref<64x256xf32, #tpu.memory_space<vmem>>, %arg2: memref<8x256xf32, #tpu.memory_space<vmem>>) attributes {dimension_semantics = [#tpu.dimension_semantics<parallel>], iteration_bounds = array<i64: 1>, scalar_prefetch = 0 : i64, scratch_operands = 0 : i64, tpu.core_type = #tpu.core_type<tc>, window_params = [{transform_indices = @transform_0, window_bounds = array<i64: 64, 256>}, {transform_indices = @transform_1, window_bounds = array<i64: 8, 256>}]} {
    %c0 = arith.constant 0 : index
    %c0_0 = arith.constant 0 : index
    %0 = vector.load %arg1[%c0, %c0_0] : memref<64x256xf32, #tpu.memory_space<vmem>>, vector<64x256xf32>
    %cst = arith.constant 0.000000e+00 : f32
    %1 = vector.broadcast %cst : f32 to vector<8x256xf32>
    %c0_1 = arith.constant 0 : index
    %c0_2 = arith.constant 0 : index
    %2 = vector.load %arg2[%c0_1, %c0_2] : memref<8x256xf32, #tpu.memory_space<vmem>>, vector<8x256xf32>
    tpu.vector_store %arg2[%c0_1, %c0_2], %1 {strides = array<i32>} : memref<8x256xf32, #tpu.memory_space<vmem>>, vector<8x256xf32>,
    %cst_3 = arith.constant dense<0.000000e+00> : vector<256xf32>
    %3 = vector.multi_reduction <add>, %0, %cst_3 [0] : vector<64x256xf32> to vector<256xf32>
    %4 = vector.shape_cast %3 : vector<256xf32> to vector<1x256xf32>
    %c0_4 = arith.constant 0 : index
    %c0_5 = arith.constant 0 : index
    %5 = vector.load %arg2[%c0_4, %c0_5] : memref<8x256xf32, #tpu.memory_space<vmem>>, vector<1x256xf32>
    tpu.vector_store %arg2[%c0_4, %c0_5], %4 {strides = array<i32>} : memref<8x256xf32, #tpu.memory_space<vmem>>, vector<1x256xf32>,
    %6 = arith.mulf %0, %0 : vector<64x256xf32>
    %cst_6 = arith.constant dense<0.000000e+00> : vector<256xf32>
    %7 = vector.multi_reduction <add>, %6, %cst_6 [0] : vector<64x256xf32> to vector<256xf32>
    %8 = vector.shape_cast %7 : vector<256xf32> to vector<1x256xf32>
    %c1 = arith.constant 1 : index
    %c0_7 = arith.constant 0 : index
    %9 = vector.load %arg2[%c1, %c0_7] : memref<8x256xf32, #tpu.memory_space<vmem>>, vector<1x256xf32>
    tpu.vector_store %arg2[%c1, %c0_7], %8 {strides = array<i32>} : memref<8x256xf32, #tpu.memory_space<vmem>>, vector<1x256xf32>,
    return
  }
  func.func @transform_0(%arg0: i32) -> (i32, i32) {
    %c0_i32 = arith.constant 0 : i32
    %c0_i32_0 = arith.constant 0 : i32
    return %arg0, %c0_i32 : i32, i32
  }
  func.func @transform_1(%arg0: i32) -> (i32, i32) {
    %c0_i32 = arith.constant 0 : i32
    %c0_i32_0 = arith.constant 0 : i32
    return %arg0, %c0_i32 : i32, i32
  }
}

module attributes {stable_mosaic.version = 11 : i64} {
  func.func @bn_apply_relu_kernel(%arg0: i32, %arg1: memref<64x256xf32, #tpu.memory_space<vmem>>, %arg2: memref<1x256xf32, #tpu.memory_space<vmem>>, %arg3: memref<1x256xf32, #tpu.memory_space<vmem>>, %arg4: memref<64x256xbf16, #tpu.memory_space<vmem>>) attributes {dimension_semantics = [#tpu.dimension_semantics<parallel>], iteration_bounds = array<i64: 1>, scalar_prefetch = 0 : i64, scratch_operands = 0 : i64, tpu.core_type = #tpu.core_type<tc>, window_params = [{transform_indices = @transform_0, window_bounds = array<i64: 64, 256>}, {pipeline_mode = #tpu.pipeline_mode<synchronous>, transform_indices = @transform_1, window_bounds = array<i64: 1, 256>}, {pipeline_mode = #tpu.pipeline_mode<synchronous>, transform_indices = @transform_2, window_bounds = array<i64: 1, 256>}, {transform_indices = @transform_3, window_bounds = array<i64: 64, 256>}]} {
    %c0 = arith.constant 0 : index
    %c0_0 = arith.constant 0 : index
    %0 = vector.load %arg1[%c0, %c0_0] : memref<64x256xf32, #tpu.memory_space<vmem>>, vector<64x256xf32>
    %c0_1 = arith.constant 0 : index
    %c0_2 = arith.constant 0 : index
    %1 = vector.load %arg2[%c0_1, %c0_2] : memref<1x256xf32, #tpu.memory_space<vmem>>, vector<1x256xf32>
    %2 = vector.broadcast %1 : vector<1x256xf32> to vector<64x256xf32>
    %3 = arith.mulf %0, %2 : vector<64x256xf32>
    %c0_3 = arith.constant 0 : index
    %c0_4 = arith.constant 0 : index
    %4 = vector.load %arg3[%c0_3, %c0_4] : memref<1x256xf32, #tpu.memory_space<vmem>>, vector<1x256xf32>
    %5 = vector.broadcast %4 : vector<1x256xf32> to vector<64x256xf32>
    %6 = arith.addf %3, %5 : vector<64x256xf32>
    %cst = arith.constant 0.000000e+00 : f32
    %7 = vector.broadcast %cst : f32 to vector<64x256xf32>
    %8 = arith.maximumf %6, %7 : vector<64x256xf32>
    %9 = arith.truncf %8 : vector<64x256xf32> to vector<64x256xbf16>
    %c0_5 = arith.constant 0 : index
    %c0_6 = arith.constant 0 : index
    %10 = vector.load %arg4[%c0_5, %c0_6] : memref<64x256xbf16, #tpu.memory_space<vmem>>, vector<64x256xbf16>
    tpu.vector_store %arg4[%c0_5, %c0_6], %9 {strides = array<i32>} : memref<64x256xbf16, #tpu.memory_space<vmem>>, vector<64x256xbf16>,
    return
  }
  func.func @transform_0(%arg0: i32) -> (i32, i32) {
    %c0_i32 = arith.constant 0 : i32
    %c0_i32_0 = arith.constant 0 : i32
    return %arg0, %c0_i32 : i32, i32
  }
  func.func @transform_1(%arg0: i32) -> (i32, i32) {
    %c0_i32 = arith.constant 0 : i32
    %c0_i32_0 = arith.constant 0 : i32
    %c0_i32_1 = arith.constant 0 : i32
    return %c0_i32, %c0_i32_0 : i32, i32
  }
  func.func @transform_2(%arg0: i32) -> (i32, i32) {
    %c0_i32 = arith.constant 0 : i32
    %c0_i32_0 = arith.constant 0 : i32
    %c0_i32_1 = arith.constant 0 : i32
    return %c0_i32, %c0_i32_0 : i32, i32
  }
  func.func @transform_3(%arg0: i32) -> (i32, i32) {
    %c0_i32 = arith.constant 0 : i32
    %c0_i32_0 = arith.constant 0 : i32
    return %arg0, %c0_i32 : i32, i32
  }
}

module attributes {stable_mosaic.version = 11 : i64} {
  func.func @matmul_kernel(%arg0: i32, %arg1: memref<1024x8xbf16, #tpu.memory_space<vmem>>, %arg2: memref<8x128xbf16, #tpu.memory_space<vmem>>, %arg3: memref<1024x128xbf16, #tpu.memory_space<vmem>>) attributes {dimension_semantics = [#tpu.dimension_semantics<parallel>], iteration_bounds = array<i64: 2>, scalar_prefetch = 0 : i64, scratch_operands = 0 : i64, tpu.core_type = #tpu.core_type<tc>, window_params = [{transform_indices = @transform_0, window_bounds = array<i64: 1024, 8>}, {pipeline_mode = #tpu.pipeline_mode<synchronous>, transform_indices = @transform_1, window_bounds = array<i64: 8, 128>}, {transform_indices = @transform_2, window_bounds = array<i64: 1024, 128>}]} {
    %c0 = arith.constant 0 : index
    %c0_0 = arith.constant 0 : index
    %0 = vector.load %arg1[%c0, %c0_0] : memref<1024x8xbf16, #tpu.memory_space<vmem>>, vector<1024x8xbf16>
    %c0_1 = arith.constant 0 : index
    %c0_2 = arith.constant 0 : index
    %1 = vector.load %arg2[%c0_1, %c0_2] : memref<8x128xbf16, #tpu.memory_space<vmem>>, vector<8x128xbf16>
    %cst = arith.constant dense<0.000000e+00> : vector<1024x128xf32>
    %2 = tpu.matmul %0, %1, %cst {dimension_numbers = #tpu.dot_dimension_numbers<[1], [0], [0], [1], [0, 0, 1, 1], [], []>} : vector<1024x8xbf16>, vector<8x128xbf16>, vector<1024x128xf32> -> vector<1024x128xf32>
    %3 = arith.truncf %2 : vector<1024x128xf32> to vector<1024x128xbf16>
    %c0_3 = arith.constant 0 : index
    %c0_4 = arith.constant 0 : index
    %4 = vector.load %arg3[%c0_3, %c0_4] : memref<1024x128xbf16, #tpu.memory_space<vmem>>, vector<1024x128xbf16>
    tpu.vector_store %arg3[%c0_3, %c0_4], %3 {strides = array<i32>} : memref<1024x128xbf16, #tpu.memory_space<vmem>>, vector<1024x128xbf16>,
    return
  }
  func.func @transform_0(%arg0: i32) -> (i32, i32) {
    %c0_i32 = arith.constant 0 : i32
    %c0_i32_0 = arith.constant 0 : i32
    return %arg0, %c0_i32 : i32, i32
  }
  func.func @transform_1(%arg0: i32) -> (i32, i32) {
    %c0_i32 = arith.constant 0 : i32
    %c0_i32_0 = arith.constant 0 : i32
    %c0_i32_1 = arith.constant 0 : i32
    return %c0_i32, %c0_i32_0 : i32, i32
  }
  func.func @transform_2(%arg0: i32) -> (i32, i32) {
    %c0_i32 = arith.constant 0 : i32
    %c0_i32_0 = arith.constant 0 : i32
    return %arg0, %c0_i32 : i32, i32
  }
}

module attributes {stable_mosaic.version = 11 : i64} {
  func.func @bias_tanh_kernel(%arg0: i32, %arg1: memref<128x512xf32, #tpu.memory_space<vmem>>, %arg2: memref<1x512xf32, #tpu.memory_space<vmem>>, %arg3: memref<128x512xf32, #tpu.memory_space<vmem>>) attributes {dimension_semantics = [#tpu.dimension_semantics<parallel>], iteration_bounds = array<i64: 1>, scalar_prefetch = 0 : i64, scratch_operands = 0 : i64, tpu.core_type = #tpu.core_type<tc>, window_params = [{transform_indices = @transform_0, window_bounds = array<i64: 128, 512>}, {pipeline_mode = #tpu.pipeline_mode<synchronous>, transform_indices = @transform_1, window_bounds = array<i64: 1, 512>}, {transform_indices = @transform_2, window_bounds = array<i64: 128, 512>}]} {
    %c0 = arith.constant 0 : index
    %c0_0 = arith.constant 0 : index
    %0 = vector.load %arg1[%c0, %c0_0] : memref<128x512xf32, #tpu.memory_space<vmem>>, vector<128x512xf32>
    %c0_1 = arith.constant 0 : index
    %c0_2 = arith.constant 0 : index
    %1 = vector.load %arg2[%c0_1, %c0_2] : memref<1x512xf32, #tpu.memory_space<vmem>>, vector<1x512xf32>
    %2 = vector.broadcast %1 : vector<1x512xf32> to vector<128x512xf32>
    %3 = arith.addf %0, %2 : vector<128x512xf32>
    %4 = math.tanh %3 : vector<128x512xf32>
    %c0_3 = arith.constant 0 : index
    %c0_4 = arith.constant 0 : index
    %5 = vector.load %arg3[%c0_3, %c0_4] : memref<128x512xf32, #tpu.memory_space<vmem>>, vector<128x512xf32>
    tpu.vector_store %arg3[%c0_3, %c0_4], %4 {strides = array<i32>} : memref<128x512xf32, #tpu.memory_space<vmem>>, vector<128x512xf32>,
    return
  }
  func.func @transform_0(%arg0: i32) -> (i32, i32) {
    %c0_i32 = arith.constant 0 : i32
    %c0_i32_0 = arith.constant 0 : i32
    return %arg0, %c0_i32 : i32, i32
  }
  func.func @transform_1(%arg0: i32) -> (i32, i32) {
    %c0_i32 = arith.constant 0 : i32
    %c0_i32_0 = arith.constant 0 : i32
    %c0_i32_1 = arith.constant 0 : i32
    return %c0_i32, %c0_i32_0 : i32, i32
  }
  func.func @transform_2(%arg0: i32) -> (i32, i32) {
    %c0_i32 = arith.constant 0 : i32
    %c0_i32_0 = arith.constant 0 : i32
    return %arg0, %c0_i32 : i32, i32
  }
}

</mosaic_0001>

<bundles_post_ra>
// kernel: tile.48
= control target key start
LH: loop header
LB: loop body
LE: loop exit
PB: predicated region body
PF: predicated region fallthrough
CT: control target
= control target key end

     0   :  { %s22_s0 = inlined_call_operand.vmem [shape: f32[64], index: 0, kind: input, shape index: {}]   ;;  %s23_s1 = inlined_call_operand.vmem [shape: f32[4,64], index: 1, kind: output, shape index: {}]  }
   0x1   :  { %v4_v0 = vld [vmem:[%s22_s0] ss:$0 sm:$0xff] }
   0x2   :  { %5 = vst [vmem:[%s23_s1] sm:$0xf] %v4_v0 }

// kernel: tile.49
= control target key start
LH: loop header
LB: loop body
LE: loop exit
PB: predicated region body
PF: predicated region fallthrough
CT: control target
= control target key end

     0   :  { %s6_s8 = smov 3  ;;  %vm8_vm0 = vcmask 523264   ;;  %s30_s9 = smov 64   ;;  %vm15_vm1 = vcmask 1048064   ;;  %s50_s0 = inlined_call_operand.vmem [shape: f32[4,64], index: 0, kind: input, shape index: {}]   ;;  %s51_s1 = inlined_call_operand.vmem [shape: f32[1,256], index: 1, kind: output, shape index: {}]  }
   0x1   :  { %v4_v0 = vld [vmem:[%s50_s0] sm:$0xf]  ;;  %s11_s0 = smov 3 }
   0x2   :  { %5 = vst [vmem:[#allocation1] sm:$0xf] %v4_v0 }
   0x9   :  { %v12_v1 = vld [vmem:[#allocation1 + $0x1] ss:$2 sm:%s11_s0]   ;;  %v7_v2 = vld [vmem:[#allocation1] ss:$2 sm:%s6_s8]  }
   0xa   :  { %13 = vrot.lane.b32.xlu0 %v12_v1, %s30_s9  ;;  %9 = vst.msk [vmem:[#allocation0] ss:$8 sm:$0x3] %vm8_vm0, %v7_v2  }
  0x7c   :  { %v14_v3 = vpop.permute.xlu0 %13  }
  0x7d   :  { %16 = vst.msk [vmem:[#allocation0] ss:$8 sm:$0x3] %vm15_vm1, %v14_v3  }
  0x84   :  { %v20_v4 = vld [vmem:[#allocation0] sm:$0x1]  ;;  %v24_v5 = vld [vmem:[#allocation0 + $0x8] sm:$0x1] }
  0x85   :  { %22 = vst [vmem:[%s51_s1] sm:$0x1] %v20_v4  ;;  %28 = vst [vmem:[%s51_s1 + $0x1] sm:$0x1] %v24_v5 }

// kernel: generator_forward.15
= control target key start
LH: loop header
LB: loop body
LE: loop exit
PB: predicated region body
PF: predicated region fallthrough
CT: control target
= control target key end

     0   :  { %v90_v0 = vmov 0.0   ;;  %v91_v9 = vmov 1966171168   ;;  %v30_v11 = vlaneseq  ;;  %s120_s1 = inlined_call_operand.vmem [shape: f32[8,256], index: 1, kind: output, shape index: {}]   ;;  %s121_s0 = inlined_call_operand.vmem [shape: f32[8,256], index: 0, kind: input, shape index: {}]  }
   0x1   :  { %10 = vst [vmem:[%s120_s1] sm:$0xff] %v90_v0  ;;  %11 = vst [vmem:[%s120_s1 + $0x8] sm:$0xff] %v90_v0  ;;  %v8_v1 = vld [vmem:[%s121_s0] sm:$0xff]  ;;  %v9_v2 = vld [vmem:[%s121_s0 + $0x8] sm:$0xff]  ;;  %v28_v10 = vunpack.c.l.s4 %v91_v9 }
   0x2   :  { %v12_v3 = vrot.slane %v8_v1, 4  ;;  %v18_v4 = vrot.slane %v9_v2, 4  ;;  %v48_v5 = vmul.f32 %v8_v1, %v8_v1  ;;  %v49_v6 = vmul.f32 %v9_v2, %v9_v2 }
   0x3   :  { %v29_v20 = vunpack.c.0.s8 %v28_v10  ;;  %v31_v21 = vshrl.u32 %v30_v11, 7  ;;  %vm44_vm0 = vcmp.lt.s32.totalorder %v30_v11, 256 }
   0x4   :  { %v13_v7 = vadd.f32 %v12_v3, %v8_v1  ;;  %v19_v8 = vadd.f32 %v18_v4, %v9_v2  ;;  %v50_v12 = vrot.slane %v48_v5, 4  ;;  %v56_v13 = vrot.slane %v49_v6, 4 }
   0x5   :  { %v32_v30 = vsub.s32 %v29_v20, %v31_v21 }
   0x6   :  { %v14_v14 = vrot.slane %v13_v7, 2  ;;  %v20_v15 = vrot.slane %v19_v8, 2  ;;  %v51_v16 = vadd.f32 %v50_v12, %v48_v5  ;;  %v57_v17 = vadd.f32 %v56_v13, %v49_v6 }
   0x8   :  { %v15_v18 = vadd.f32 %v14_v14, %v13_v7  ;;  %v21_v19 = vadd.f32 %v20_v15, %v19_v8  ;;  %v52_v22 = vrot.slane %v51_v16, 2  ;;  %v58_v23 = vrot.slane %v57_v17, 2 }
   0xa   :  { %v16_v24 = vrot.slane %v15_v18, 1  ;;  %v22_v25 = vrot.slane %v21_v19, 1  ;;  %v53_v26 = vadd.f32 %v52_v22, %v51_v16  ;;  %v59_v27 = vadd.f32 %v58_v23, %v57_v17 }
   0xc   :  { %v17_v28 = vadd.f32 %v16_v24, %v15_v18  ;;  %v23_v29 = vadd.f32 %v22_v25, %v21_v19  ;;  %v54_v31 = vrot.slane %v53_v26, 1  ;;  %v60_v32 = vrot.slane %v59_v27, 1 }
   0xe   :  { %v26_v33 = vcombine.low %v17_v28, %v23_v29  ;;  %v55_v34 = vadd.f32 %v54_v31, %v53_v26  ;;  %v61_v35 = vadd.f32 %v60_v32, %v59_v27 }
  0x10   :  { %v33_v36 = vrot.slane %v26_v33, %v32_v30  ;;  %v64_v37 = vcombine.low %v55_v34, %v61_v35 }
  0x12   :  { %v40_v38 = vrot.slane %v33_v36, %v32_v30  ;;  %v71_v39 = vrot.slane %v64_v37, %v32_v30 }
  0x14   :  { %46 = vst.msk [vmem:[%s120_s1] ss:$8 sm:$0x3] %vm44_vm0, %v40_v38  ;;  %v78_v40 = vrot.slane %v71_v39, %v32_v30 }
  0x16   :  { %87 = vst.msk [vmem:[%s120_s1 + $0x1] ss:$8 sm:$0x3] %vm44_vm0, %v78_v40 }

// kernel: generator_forward.16
= control target key start
LH: loop header
LB: loop body
LE: loop exit
PB: predicated region body
PF: predicated region fallthrough
CT: control target
= control target key end

     0   :  { %v18_v0 = vlaneseq  ;;  %s96_s1 = inlined_call_operand.vmem [shape: f32[1,256], index: 1, kind: input, shape index: {}]   ;;  %s97_s2 = inlined_call_operand.vmem [shape: f32[1,256], index: 2, kind: input, shape index: {}]   ;;  %s98_s0 = inlined_call_operand.vmem [shape: f32[8,256], index: 0, kind: input, shape index: {}]   ;;  %s99_s3 = inlined_call_operand.vmem [shape: bf16[8,256], index: 3, kind: output, shape index: {}]  }
   0x1   :  { %v16_v2 = vld [vmem:[%s96_s1] sm:$0x3]  ;;  %v15_v7 = vld [vmem:[%s98_s0 + $0x8] sm:$0xff] }
   0x2   :  { %v19_v1 = vshrl.u32 %v18_v0, 7  ;;  %v30_v3 = vld [vmem:[%s97_s2] sm:$0x3] }
   0x3   :  { %v14_v6 = vld [vmem:[%s98_s0] sm:$0xff] }
   0x4   :  { %v20_v4 = vsub.s32 0, %v19_v1  ;;  %v24_v5 = vsub.s32 1, %v19_v1 }
   0x6   :  { %v21_v8 = vrot.slane %v16_v2, %v20_v4  ;;  %v25_v9 = vrot.slane %v16_v2, %v24_v5  ;;  %v35_v10 = vrot.slane %v30_v3, %v20_v4  ;;  %v39_v11 = vrot.slane %v30_v3, %v24_v5 }
   0x8   :  { %v28_v12 = vmul.f32 %v21_v8, %v14_v6  ;;  %v29_v13 = vmul.f32 %v25_v9, %v15_v7 }
   0xa   :  { %v42_v14 = vadd.f32 %v35_v10, %v28_v12  ;;  %v43_v15 = vadd.f32 %v39_v11, %v29_v13 }
   0xc   :  { %v44_v16 = vmax.f32 %v42_v14, 0.0  ;;  %v45_v17 = vmax.f32 %v43_v15, 0.0 }
   0xe   :  { %v60_v18 = vpack.c.bf16 %v45_v17, %v44_v16 }
  0x10   :  { %54 = vst [vmem:[%s99_s3] sm:$0xff] %v60_v18 }

// kernel: generator_forward.14
= control target key start
LH: loop header
LB: loop body
LE: loop exit
PB: predicated region body
PF: predicated region fallthrough
CT: control target
= control target key end

     0   :  { %7 = vsyncpa [#allocation3], 0  ;;  %s444_s9 = smov [#allocation2]   ;;  %s498_s0 = inlined_call_operand.vmem [shape: bf16[8,48], index: 0, kind: input, shape index: {}]   ;;  %s499_s1 = inlined_call_operand.hbm [shape: bf16[48,1024], index: 1, kind: input, shape index: {}]   ;;  %s500_s2 = inlined_call_operand.vmem [shape: bf16[8,1024], index: 2, kind: output, shape index: {}]  }
   0x1   :  { %s15_s10 = sshll.u32 %s444_s9, 4  ;;  %s420_s13 = scalar_lea.hbm %s499_s1, 3072  ;;  %s16_s10 = int_to_ptr.vmem [resolvable:$true] %s15_s10 }
   0x2   :  { %p421_p0 = scmp.ne.s32.totalorder %s499_s1, %s420_s13  ;;  %p424_p1 = scmp.lt.u32.totalorder %s420_s13, %s499_s1 }
   0x4   :  { %p426_p2 = pnand %p424_p1, %p421_p0 }
   0x6   :  { %429 = shalt.err (!%p426_p2)
}
   0x7   :  { %s430_s18 = scalar_lea.vmem %s16_s10, 3072  ;;  %p435_p4 = scmp.lt.s32.totalorder %s16_s10, %s16_s10 }
   0x8   :  { %p431_p3 = scmp.ne.s32.totalorder %s16_s10, %s430_s18  ;;  %p436_p5 = scmp.lt.s32.totalorder %s430_s18, %s430_s18 }
   0xa   :  { %p437_p6 = por %p436_p5, %p435_p4 }
   0xc   :  { %p438_p7 = pnand %p437_p6, %p431_p3 }
   0xe   :  { %441 = shalt.err (!%p438_p7)
}
   0xf   :  { %s445_s19 = smov 512   ;;  %s446_s20 = smov 32  }
  0x10   :  { %21 = dma.hbm_to_vmem [thread:$0]  %s499_s1, 3072, %s16_s10, [#allocation3], %s445_s19, %s445_s19, %s446_s20  }
  0x11   :  { %442 = dma.done.wait [#allocation3], 3072  }
  0x12   :  { %443 = vsyncadd [#allocation3], 4294964224  ;;  %v447_v0 = vmov 0   ;;  %v27_v1 = vld [vmem:[#allocation2] sm:$0xff]  ;;  %v28_v3 = vld [vmem:[#allocation2 + $0x8] sm:$0xff]  ;;  %vm171_vm0 = vcmask 392192  }
  0x13   :  { %207 = vmatprep.mubr.bf16.mxu0 %v447_v0  ;;  %248 = vmatprep.mubr.bf16.mxu1 %v447_v0  ;;  %v31_v2 = vld [vmem:[#allocation2 + $0x20] sm:$0xff]  ;;  %v32_v5 = vld [vmem:[#allocation2 + $0x28] sm:$0xff]  ;;  %v29_v23 = vld [vmem:[#allocation2 + $0x10] sm:$0xff] }
  0x14   :  { %v381_v4 = vcombine.high %v27_v1, %v31_v2  ;;  %v380_v6 = vcombine.low %v27_v1, %v31_v2  ;;  %v35_v7 = vld [vmem:[#allocation2 + $0x40] sm:$0xff]  ;;  %v383_v9 = vcombine.high %v28_v3, %v32_v5  ;;  %v382_v10 = vcombine.low %v28_v3, %v32_v5  ;;  %v36_v12 = vld [vmem:[#allocation2 + $0x48] sm:$0xff]  ;;  %v33_v24 = vld [vmem:[#allocation2 + $0x30] sm:$0xff] }
  0x15   :  { %v39_v8 = vld [vmem:[#allocation2 + $0x60] sm:$0xff]  ;;  %v40_v13 = vld [vmem:[#allocation2 + $0x68] sm:$0xff]  ;;  %v30_v25 = vld [vmem:[#allocation2 + $0x18] sm:$0xff]  ;;  %v385_v29 = vcombine.high %v29_v23, %v33_v24  ;;  %v384_v36 = vcombine.low %v29_v23, %v33_v24 }
  0x16   :  { %v389_v11 = vcombine.high %v35_v7, %v39_v8  ;;  %v43_v14 = vld [vmem:[#allocation2 + $0x80] sm:$0xff]  ;;  %175 = vmatprep.subr.bf16.mxu0 %v381_v4  ;;  %v391_v15 = vcombine.high %v36_v12, %v40_v13  ;;  %v44_v17 = vld [vmem:[#allocation2 + $0x88] sm:$0xff]  ;;  %216 = vmatprep.subr.bf16.mxu1 %v383_v9  ;;  %v388_v19 = vcombine.low %v35_v7, %v39_v8  ;;  %v34_v26 = vld [vmem:[#allocation2 + $0x38] sm:$0xff] }
  0x17   :  { %v47_v16 = vld [vmem:[#allocation2 + $0xa0] sm:$0xff]  ;;  %v48_v18 = vld [vmem:[#allocation2 + $0xa8] sm:$0xff]  ;;  %176 = vmatpush1.bf16.msra.mxu0 %v380_v6  ;;  %217 = vmatpush1.bf16.msra.mxu1 %v382_v10  ;;  %v390_v20 = vcombine.low %v36_v12, %v40_v13  ;;  %v387_v30 = vcombine.high %v30_v25, %v34_v26  ;;  %v37_v31 = vld [vmem:[#allocation2 + $0x50] sm:$0xff]  ;;  %v386_v37 = vcombine.low %v30_v25, %v34_v26 }
  0x18   :  { %177 = vmatprep.subr.bf16.mxu0 %v389_v11  ;;  %v397_v21 = vcombine.high %v43_v14, %v47_v16  ;;  %218 = vmatprep.subr.bf16.mxu1 %v391_v15  ;;  %v399_v22 = vcombine.high %v44_v17, %v48_v18  ;;  %v396_v27 = vcombine.low %v43_v14, %v47_v16  ;;  %v41_v32 = vld [vmem:[#allocation2 + $0x70] sm:$0xff]  ;;  %v38_v33 = vld [vmem:[#allocation2 + $0x58] sm:$0xff]  ;;  %v26_v35 = vld [vmem:[%s498_s0] sm:$0xf] }
  0x19   :  { %v398_v28 = vcombine.low %v44_v17, %v48_v18  ;;  %v42_v34 = vld [vmem:[#allocation2 + $0x78] sm:$0xff]  ;;  %v393_v38 = vcombine.high %v37_v31, %v41_v32  ;;  %v45_v40 = vld [vmem:[#allocation2 + $0x90] sm:$0xff]  ;;  %v392_v44 = vcombine.low %v37_v31, %v41_v32 }
  0x1a   :  { %v395_v39 = vcombine.high %v38_v33, %v42_v34  ;;  %v49_v41 = vld [vmem:[#allocation2 + $0xb0] sm:$0xff]  ;;  %v46_v42 = vld [vmem:[#allocation2 + $0x98] sm:$0xff]  ;;  %v394_v45 = vcombine.low %v38_v33, %v42_v34 }
  0x1b   :  { %178 = vmatpush1.bf16.msra.mxu0 %v388_v19  ;;  %219 = vmatpush1.bf16.msra.mxu1 %v390_v20  ;;  %v50_v43 = vld [vmem:[#allocation2 + $0xb8] sm:$0xff]  ;;  %v401_v46 = vcombine.high %v45_v40, %v49_v41  ;;  %v400_v48 = vcombine.low %v45_v40, %v49_v41 }
  0x1c   :  { %179 = vmatprep.subr.bf16.mxu0 %v397_v21  ;;  %220 = vmatprep.subr.bf16.mxu1 %v399_v22  ;;  %v403_v47 = vcombine.high %v46_v42, %v50_v43  ;;  %v402_v49 = vcombine.low %v46_v42, %v50_v43 }
  0x1f   :  { %180 = vmatpush1.bf16.msra.mxu0 %v396_v27  ;;  %221 = vmatpush1.bf16.msra.mxu1 %v398_v28 }
  0x20   :  { %257 = vmatprep.subr.bf16.mxu0 %v385_v29  ;;  %298 = vmatprep.subr.bf16.mxu1 %v387_v30 }
  0x22   :  { %404 = vmatmul.mubr.msk.bf16.vlgmr.msra.gmra.mrb[0].mxu0 %vm171_vm0, %v26_v35  ;;  %405 = vmatmul.mubr.msk.bf16.vlgmr.msra.gmra.mrb[0].mxu1 %vm171_vm0, %v26_v35 }
  0x23   :  { %258 = vmatpush1.bf16.msra.mxu0 %v384_v36  ;;  %299 = vmatpush1.bf16.msra.mxu1 %v386_v37 }
  0x24   :  { %259 = vmatprep.subr.bf16.mxu0 %v393_v38  ;;  %300 = vmatprep.subr.bf16.mxu1 %v395_v39 }
  0x25   :  { %289 = vmatprep.mubr.bf16.mxu0 %v447_v0  ;;  %330 = vmatprep.mubr.bf16.mxu1 %v447_v0 }
  0x27   :  { %260 = vmatpush1.bf16.msra.mxu0 %v392_v44  ;;  %301 = vmatpush1.bf16.msra.mxu1 %v394_v45 }
  0x28   :  { %261 = vmatprep.subr.bf16.mxu0 %v401_v46  ;;  %302 = vmatprep.subr.bf16.mxu1 %v403_v47 }
  0x2b   :  { %262 = vmatpush1.bf16.msra.mxu0 %v400_v48  ;;  %303 = vmatpush1.bf16.msra.mxu1 %v402_v49 }
  0x2e   :  { %406 = vmatmul.mubr.msk.bf16.vlgmr.msra.gmra.mrb[4].mxu0 %vm171_vm0, %v26_v35  ;;  %407 = vmatmul.mubr.msk.bf16.vlgmr.msra.gmra.mrb[4].mxu1 %vm171_vm0, %v26_v35 }
  0xf5   :  { %v209_v50 = vpop.f32.mrb[0].mxu0  ;;  %v250_v51 = vpop.f32.mrb[0].mxu1 }
  0xf6   :  { %v211_v52 = vpop.f32.mrb[1].mxu0  ;;  %v252_v54 = vpop.f32.mrb[1].mxu1 }
  0xf7   :  { %v412_v53 = vpack.c.bf16 %v211_v52, %v209_v50  ;;  %v213_v55 = vpop.f32.mrb[2].mxu0  ;;  %v413_v56 = vpack.c.bf16 %v252_v54, %v250_v51  ;;  %v254_v57 = vpop.f32.mrb[2].mxu1 }
  0xf8   :  { %v214_v58 = vpop.f32.mrb[3].mxu0  ;;  %v255_v59 = vpop.f32.mrb[3].mxu1 }
  0xf9   :  { %371 = vst [vmem:[%s500_s2] sm:$0xff] %v412_v53  ;;  %372 = vst [vmem:[%s500_s2 + $0x8] sm:$0xff] %v413_v56 }
 0x101   :  { %v291_v60 = vpop.f32.mrb[4].mxu0  ;;  %v332_v61 = vpop.f32.mrb[4].mxu1 }
 0x102   :  { %v293_v62 = vpop.f32.mrb[5].mxu0  ;;  %v334_v0 = vpop.f32.mrb[5].mxu1 }
 0x103   :  { %v414_v63 = vpack.c.bf16 %v293_v62, %v291_v60  ;;  %v295_v1 = vpop.f32.mrb[6].mxu0  ;;  %v415_v2 = vpack.c.bf16 %v334_v0, %v332_v61  ;;  %v336_v3 = vpop.f32.mrb[6].mxu1 }
 0x104   :  { %v296_v4 = vpop.f32.mrb[7].mxu0  ;;  %v337_v5 = vpop.f32.mrb[7].mxu1 }
 0x105   :  { %373 = vst [vmem:[%s500_s2 + $0x10] sm:$0xff] %v414_v63  ;;  %374 = vst [vmem:[%s500_s2 + $0x18] sm:$0xff] %v415_v2 }
 0x106   :  { %379 = vsyncpa [#allocation3], 1 }

// kernel: generator_forward.17
= control target key start
LH: loop header
LB: loop body
LE: loop exit
PB: predicated region body
PF: predicated region fallthrough
CT: control target
= control target key end

     0   :  { %7 = vsyncpa [#allocation3], 0  ;;  %s402_s9 = smov [#allocation2]   ;;  %s463_s0 = inlined_call_operand.vmem [shape: bf16[32,64], index: 0, kind: input, shape index: {}]   ;;  %s464_s1 = inlined_call_operand.hbm [shape: bf16[64,512], index: 1, kind: input, shape index: {}]   ;;  %s465_s2 = inlined_call_operand.vmem [shape: bf16[32,512], index: 2, kind: output, shape index: {}]  }
   0x1   :  { %s15_s10 = sshll.u32 %s402_s9, 4  ;;  %s378_s13 = scalar_lea.hbm %s464_s1, 2048  ;;  %s16_s10 = int_to_ptr.vmem [resolvable:$true] %s15_s10 }
   0x2   :  { %p379_p0 = scmp.ne.s32.totalorder %s464_s1, %s378_s13  ;;  %p382_p1 = scmp.lt.u32.totalorder %s378_s13, %s464_s1 }
   0x4   :  { %p384_p2 = pnand %p382_p1, %p379_p0 }
   0x6   :  { %387 = shalt.err (!%p384_p2)
}
   0x7   :  { %s388_s18 = scalar_lea.vmem %s16_s10, 2048  ;;  %p393_p4 = scmp.lt.s32.totalorder %s16_s10, %s16_s10 }
   0x8   :  { %p389_p3 = scmp.ne.s32.totalorder %s16_s10, %s388_s18  ;;  %p394_p5 = scmp.lt.s32.totalorder %s388_s18, %s388_s18 }
   0xa   :  { %p395_p6 = por %p394_p5, %p393_p4 }
   0xc   :  { %p396_p7 = pnand %p395_p6, %p389_p3 }
   0xe   :  { %399 = shalt.err (!%p396_p7)
}
   0xf   :  { %s403_s19 = smov 256   ;;  %s404_s20 = smov 16  }
  0x10   :  { %21 = dma.hbm_to_vmem [thread:$0]  %s464_s1, 2048, %s16_s10, [#allocation3], %s403_s19, %s403_s19, %s404_s20  }
  0x11   :  { %400 = dma.done.wait [#allocation3], 2048  }
  0x12   :  { %401 = vsyncadd [#allocation3], 4294965248  ;;  %v405_v0 = vmov 0   ;;  %v352_v1 = vld [vmem:[#allocation2 + $0x4] ss:$16 sps:$4 sm:$0xff]   ;;  %vm136_vm0 = vcmask 523264  }
  0x13   :  { %175 = vmatprep.mubr.bf16.mxu0 %v405_v0  ;;  %228 = vmatprep.mubr.bf16.mxu1 %v405_v0  ;;  %v354_v2 = vld [vmem:[#allocation2 + $0xc] ss:$16 sps:$4 sm:$0xff]   ;;  %v356_v3 = vld [vmem:[#allocation2] ss:$16 sps:$4 sm:$0xff]   ;;  %v357_v4 = vld [vmem:[#allocation2 + $0x8] ss:$16 sps:$4 sm:$0xff]  }
  0x14   :  { %143 = vmatprep.subr.bf16.mxu0 %v352_v1  ;;  %196 = vmatprep.subr.bf16.mxu1 %v354_v2  ;;  %v358_v5 = vld [vmem:[#allocation2 + $0x24] ss:$16 sps:$4 sm:$0xff]   ;;  %v360_v6 = vld [vmem:[#allocation2 + $0x2c] ss:$16 sps:$4 sm:$0xff]   ;;  %v362_v7 = vld [vmem:[#allocation2 + $0x20] ss:$16 sps:$4 sm:$0xff]  }
  0x15   :  { %144 = vmatpush1.bf16.msra.mxu0 %v356_v3  ;;  %197 = vmatpush1.bf16.msra.mxu1 %v357_v4  ;;  %v363_v8 = vld [vmem:[#allocation2 + $0x28] ss:$16 sps:$4 sm:$0xff]   ;;  %v364_v9 = vld [vmem:[#allocation2 + $0x44] ss:$16 sps:$4 sm:$0xff]   ;;  %v366_v10 = vld [vmem:[#allocation2 + $0x4c] ss:$16 sps:$4 sm:$0xff]  }
  0x16   :  { %145 = vmatprep.subr.bf16.mxu0 %v358_v5  ;;  %198 = vmatprep.subr.bf16.mxu1 %v360_v6  ;;  %v368_v11 = vld [vmem:[#allocation2 + $0x40] ss:$16 sps:$4 sm:$0xff]   ;;  %v369_v12 = vld [vmem:[#allocation2 + $0x48] ss:$16 sps:$4 sm:$0xff]   ;;  %v370_v13 = vld [vmem:[#allocation2 + $0x64] ss:$16 sps:$4 sm:$0xff]  }
  0x17   :  { %v372_v14 = vld [vmem:[#allocation2 + $0x6c] ss:$16 sps:$4 sm:$0xff]   ;;  %v374_v15 = vld [vmem:[#allocation2 + $0x60] ss:$16 sps:$4 sm:$0xff]   ;;  %v375_v16 = vld [vmem:[#allocation2 + $0x68] ss:$16 sps:$4 sm:$0xff]  }
  0x18   :  { %v376_v17 = vld [vmem:[%s463_s0] sm:$0xff]   ;;  %v377_v18 = vld [vmem:[%s463_s0 + $0x8] sm:$0xff]  }
  0x19   :  { %146 = vmatpush1.bf16.msra.mxu0 %v362_v7  ;;  %199 = vmatpush1.bf16.msra.mxu1 %v363_v8 }
  0x1a   :  { %147 = vmatprep.subr.bf16.mxu0 %v364_v9  ;;  %200 = vmatprep.subr.bf16.mxu1 %v366_v10 }
  0x1d   :  { %148 = vmatpush1.bf16.msra.mxu0 %v368_v11  ;;  %201 = vmatpush1.bf16.msra.mxu1 %v369_v12 }
  0x1e   :  { %149 = vmatprep.subr.bf16.mxu0 %v370_v13  ;;  %202 = vmatprep.subr.bf16.mxu1 %v372_v14 }
  0x21   :  { %150 = vmatpush1.bf16.msra.mxu0 %v374_v15  ;;  %203 = vmatpush1.bf16.msra.mxu1 %v375_v16 }
  0x24   :  { %328 = vmatmul.mubr.msk.bf16.vlgmr.msra.gmra.mrb[0].mxu0 %vm136_vm0, %v376_v17  ;;  %330 = vmatmul.mubr.msk.bf16.vlgmr.msra.gmra.mrb[0].mxu1 %vm136_vm0, %v376_v17 }
  0x25   :  { %185 = vmatprep.mubr.bf16.mxu0 %v405_v0  ;;  %238 = vmatprep.mubr.bf16.mxu1 %v405_v0 }
  0x2c   :  { %329 = vmatmul.mubr.msk.bf16.gmra.mrb[4].mxu0 %vm136_vm0, %v377_v18  ;;  %331 = vmatmul.mubr.msk.bf16.gmra.mrb[4].mxu1 %vm136_vm0, %v377_v18 }
  0xf7   :  { %v177_v19 = vpop.f32.mrb[0].mxu0  ;;  %v230_v20 = vpop.f32.mrb[0].mxu1 }
  0xf8   :  { %v179_v21 = vpop.f32.mrb[1].mxu0  ;;  %v232_v22 = vpop.f32.mrb[1].mxu1 }
  0xf9   :  { %v340_v23 = vpack.c.bf16 %v179_v21, %v177_v19  ;;  %v341_v24 = vpack.c.bf16 %v232_v22, %v230_v20  ;;  %v181_v25 = vpop.f32.mrb[2].mxu0  ;;  %v234_v26 = vpop.f32.mrb[2].mxu1 }
  0xfa   :  { %v183_v27 = vpop.f32.mrb[3].mxu0  ;;  %v236_v28 = vpop.f32.mrb[3].mxu1 }
  0xfb   :  { %297 = vst [vmem:[%s465_s2] sm:$0xff] %v340_v23  ;;  %298 = vst [vmem:[%s465_s2 + $0x8] sm:$0xff] %v341_v24  ;;  %v342_v29 = vpack.c.bf16 %v183_v27, %v181_v25  ;;  %v343_v30 = vpack.c.bf16 %v236_v28, %v234_v26 }
  0xfd   :  { %299 = vst [vmem:[%s465_s2 + $0x10] sm:$0xff] %v342_v29  ;;  %300 = vst [vmem:[%s465_s2 + $0x18] sm:$0xff] %v343_v30 }
  0xff   :  { %v187_v31 = vpop.f32.mrb[4].mxu0  ;;  %v240_v32 = vpop.f32.mrb[4].mxu1 }
 0x100   :  { %v189_v33 = vpop.f32.mrb[5].mxu0  ;;  %v242_v34 = vpop.f32.mrb[5].mxu1 }
 0x101   :  { %v344_v35 = vpack.c.bf16 %v189_v33, %v187_v31  ;;  %v345_v36 = vpack.c.bf16 %v242_v34, %v240_v32  ;;  %v191_v37 = vpop.f32.mrb[6].mxu0  ;;  %v244_v38 = vpop.f32.mrb[6].mxu1 }
 0x102   :  { %v193_v39 = vpop.f32.mrb[7].mxu0  ;;  %v246_v40 = vpop.f32.mrb[7].mxu1 }
 0x103   :  { %301 = vst [vmem:[%s465_s2 + $0x20] sm:$0xff] %v344_v35  ;;  %302 = vst [vmem:[%s465_s2 + $0x28] sm:$0xff] %v345_v36  ;;  %v346_v41 = vpack.c.bf16 %v193_v39, %v191_v37  ;;  %v347_v42 = vpack.c.bf16 %v246_v40, %v244_v38 }
 0x105   :  { %303 = vst [vmem:[%s465_s2 + $0x30] sm:$0xff] %v346_v41  ;;  %304 = vst [vmem:[%s465_s2 + $0x38] sm:$0xff] %v347_v42 }
 0x106   :  { %309 = vsyncpa [#allocation3], 1 }

// kernel: tile.59
= control target key start
LH: loop header
LB: loop body
LE: loop exit
PB: predicated region body
PF: predicated region fallthrough
CT: control target
= control target key end

     0   :  { %s7_s6 = smov 3  ;;  %s14_s9 = smov 3  ;;  %vm4_vm0 = vcmask 261120   ;;  %vm11_vm1 = vcmask 1048320   ;;  %vm18_vm2 = vcmask 785920   ;;  %vm25_vm3 = vcmask 523520   ;;  %s76_s0 = inlined_call_operand.vmem [shape: f32[8,32], index: 0, kind: input, shape index: {}]   ;;  %s77_s1 = inlined_call_operand.vmem [shape: f32[1,256], index: 1, kind: output, shape index: {}]  }
   0x1   :  { %v38_v0 = vld [vmem:[%s76_s0 + $0x3] ss:$4 sm:%s7_s6]   ;;  %s45_s10 = smov 96   ;;  %s21_s11 = smov 3  ;;  %v39_v1 = vld [vmem:[%s76_s0 + $0x2] ss:$4 sm:%s14_s9]  }
   0x2   :  { %9 = vrot.lane.b32.xlu0 %v38_v0, %s45_s10  ;;  %v40_v2 = vld [vmem:[%s76_s0 + $0x1] ss:$4 sm:%s21_s11]   ;;  %s2_s16 = smov 3  ;;  %s46_s17 = smov 32  }
   0x3   :  { %23 = vrot.lane.b32.xlu1 %v40_v2, %s46_s17  ;;  %v3_v3 = vld [vmem:[%s76_s0] ss:$4 sm:%s2_s16]   ;;  %s47_s0 = smov 64  }
   0x4   :  { %5 = vst.msk [vmem:[#allocation0] ss:$8 sm:$0x3] %vm4_vm0, %v3_v3  }
   0x6   :  { %16 = vrot.lane.b32.xlu0 %v39_v1, %s47_s0 }
  0x74   :  { %v10_v4 = vpop.permute.xlu0 %9  }
  0x75   :  { %12 = vst.msk [vmem:[#allocation0] ss:$8 sm:$0x3] %vm11_vm1, %v10_v4   ;;  %v24_v5 = vpop.permute.xlu1 %23  }
  0x78   :  { %v17_v6 = vpop.permute.xlu0 %16  }
  0x79   :  { %19 = vst.msk [vmem:[#allocation0] ss:$8 sm:$0x3] %vm18_vm2, %v17_v6  }
  0x7a   :  { %26 = vst.msk [vmem:[#allocation0] ss:$8 sm:$0x3] %vm25_vm3, %v24_v5  }
  0x81   :  { %v30_v7 = vld [vmem:[#allocation0] sm:$0x1]  ;;  %v34_v8 = vld [vmem:[#allocation0 + $0x8] sm:$0x1] }
  0x82   :  { %32 = vst [vmem:[%s77_s1] sm:$0x1] %v30_v7  ;;  %41 = vst [vmem:[%s77_s1 + $0x1] sm:$0x1] %v34_v8 }

// kernel: tile.58
= control target key start
LH: loop header
LB: loop body
LE: loop exit
PB: predicated region body
PF: predicated region fallthrough
CT: control target
= control target key end

     0   :  { %s22_s0 = inlined_call_operand.vmem [shape: f32[32], index: 0, kind: input, shape index: {}]   ;;  %s23_s1 = inlined_call_operand.vmem [shape: f32[8,32], index: 1, kind: output, shape index: {}]  }
   0x1   :  { %v4_v0 = vld [vmem:[%s22_s0] ss:$0 sm:$0xff] }
   0x2   :  { %5 = vst [vmem:[%s23_s1] sm:$0xff] %v4_v0 }

// kernel: generator_forward.18
= control target key start
LH: loop header
LB: loop body
LE: loop exit
PB: predicated region body
PF: predicated region fallthrough
CT: control target
= control target key end

     0   :  { %v98_v0 = vmov 0.0   ;;  %v99_v17 = vmov 1966171168   ;;  %v34_v19 = vlaneseq  ;;  %s134_s1 = inlined_call_operand.vmem [shape: f32[8,256], index: 1, kind: output, shape index: {}]   ;;  %s135_s0 = inlined_call_operand.vmem [shape: f32[16,256], index: 0, kind: input, shape index: {}]  }
   0x1   :  { %12 = vst [vmem:[%s134_s1] sm:$0xff] %v98_v0  ;;  %13 = vst [vmem:[%s134_s1 + $0x8] sm:$0xff] %v98_v0  ;;  %v8_v1 = vld [vmem:[%s135_s0] sm:$0xff]  ;;  %v9_v2 = vld [vmem:[%s135_s0 + $0x8] sm:$0xff]  ;;  %v32_v18 = vunpack.c.l.s4 %v99_v17 }
   0x2   :  { %v10_v3 = vld [vmem:[%s135_s0 + $0x10] sm:$0xff]  ;;  %v11_v4 = vld [vmem:[%s135_s0 + $0x18] sm:$0xff]  ;;  %v52_v6 = vmul.f32 %v8_v1, %v8_v1  ;;  %v53_v8 = vmul.f32 %v9_v2, %v9_v2  ;;  %v35_v29 = vshrl.u32 %v34_v19, 7  ;;  %vm48_vm0 = vcmp.lt.s32.totalorder %v34_v19, 256 }
   0x3   :  { %v14_v5 = vadd.f32 %v10_v3, %v8_v1  ;;  %v21_v7 = vadd.f32 %v11_v4, %v9_v2  ;;  %v54_v9 = vmul.f32 %v10_v3, %v10_v3  ;;  %v55_v11 = vmul.f32 %v11_v4, %v11_v4 }
   0x4   :  { %v33_v28 = vunpack.c.0.s8 %v32_v18 }
   0x5   :  { %v15_v10 = vrot.slane %v14_v5, 4  ;;  %v22_v12 = vrot.slane %v21_v7, 4  ;;  %v56_v13 = vadd.f32 %v54_v9, %v52_v6  ;;  %v63_v15 = vadd.f32 %v55_v11, %v53_v8 }
   0x6   :  { %v36_v38 = vsub.s32 %v33_v28, %v35_v29 }
   0x7   :  { %v16_v14 = vadd.f32 %v15_v10, %v14_v5  ;;  %v23_v16 = vadd.f32 %v22_v12, %v21_v7  ;;  %v57_v20 = vrot.slane %v56_v13, 4  ;;  %v64_v22 = vrot.slane %v63_v15, 4 }
   0x9   :  { %v17_v21 = vrot.slane %v16_v14, 2  ;;  %v24_v23 = vrot.slane %v23_v16, 2  ;;  %v58_v24 = vadd.f32 %v57_v20, %v56_v13  ;;  %v65_v26 = vadd.f32 %v64_v22, %v63_v15 }
   0xb   :  { %v18_v25 = vadd.f32 %v17_v21, %v16_v14  ;;  %v25_v27 = vadd.f32 %v24_v23, %v23_v16  ;;  %v59_v30 = vrot.slane %v58_v24, 2  ;;  %v66_v32 = vrot.slane %v65_v26, 2 }
   0xd   :  { %v19_v31 = vrot.slane %v18_v25, 1  ;;  %v26_v33 = vrot.slane %v25_v27, 1  ;;  %v60_v34 = vadd.f32 %v59_v30, %v58_v24  ;;  %v67_v36 = vadd.f32 %v66_v32, %v65_v26 }
   0xf   :  { %v20_v35 = vadd.f32 %v19_v31, %v18_v25  ;;  %v27_v37 = vadd.f32 %v26_v33, %v25_v27  ;;  %v61_v39 = vrot.slane %v60_v34, 1  ;;  %v68_v40 = vrot.slane %v67_v36, 1 }
  0x11   :  { %v30_v41 = vcombine.low %v20_v35, %v27_v37  ;;  %v62_v42 = vadd.f32 %v61_v39, %v60_v34  ;;  %v69_v43 = vadd.f32 %v68_v40, %v67_v36 }
  0x13   :  { %v37_v44 = vrot.slane %v30_v41, %v36_v38  ;;  %v72_v45 = vcombine.low %v62_v42, %v69_v43 }
  0x15   :  { %v44_v46 = vrot.slane %v37_v44, %v36_v38  ;;  %v79_v47 = vrot.slane %v72_v45, %v36_v38 }
  0x17   :  { %50 = vst.msk [vmem:[%s134_s1] ss:$8 sm:$0x3] %vm48_vm0, %v44_v46  ;;  %v86_v48 = vrot.slane %v79_v47, %v36_v38 }
  0x19   :  { %95 = vst.msk [vmem:[%s134_s1 + $0x1] ss:$8 sm:$0x3] %vm48_vm0, %v86_v48 }

// kernel: generator_forward.19
= control target key start
LH: loop header
LB: loop body
LE: loop exit
PB: predicated region body
PF: predicated region fallthrough
CT: control target
= control target key end

     0   :  { %v20_v0 = vlaneseq  ;;  %s120_s1 = inlined_call_operand.vmem [shape: f32[1,256], index: 1, kind: input, shape index: {}]   ;;  %s121_s2 = inlined_call_operand.vmem [shape: f32[1,256], index: 2, kind: input, shape index: {}]   ;;  %s122_s0 = inlined_call_operand.vmem [shape: f32[16,256], index: 0, kind: input, shape index: {}]   ;;  %s123_s3 = inlined_call_operand.vmem [shape: bf16[16,256], index: 3, kind: output, shape index: {}]  }
   0x1   :  { %v18_v2 = vld [vmem:[%s120_s1] sm:$0x3]  ;;  %v15_v7 = vld [vmem:[%s122_s0 + $0x8] sm:$0xff]  ;;  %v16_v8 = vld [vmem:[%s122_s0 + $0x10] sm:$0xff] }
   0x2   :  { %v21_v1 = vshrl.u32 %v20_v0, 7  ;;  %v34_v3 = vld [vmem:[%s121_s2] sm:$0x3]  ;;  %v17_v9 = vld [vmem:[%s122_s0 + $0x18] sm:$0xff] }
   0x3   :  { %v14_v4 = vld [vmem:[%s122_s0] sm:$0xff] }
   0x4   :  { %v22_v5 = vsub.s32 0, %v21_v1  ;;  %v26_v6 = vsub.s32 1, %v21_v1 }
   0x6   :  { %v23_v10 = vrot.slane %v18_v2, %v22_v5  ;;  %v27_v11 = vrot.slane %v18_v2, %v26_v6  ;;  %v39_v12 = vrot.slane %v34_v3, %v22_v5  ;;  %v43_v13 = vrot.slane %v34_v3, %v26_v6 }
   0x8   :  { %v30_v14 = vmul.f32 %v23_v10, %v14_v4  ;;  %v31_v15 = vmul.f32 %v27_v11, %v15_v7  ;;  %v32_v16 = vmul.f32 %v23_v10, %v16_v8  ;;  %v33_v17 = vmul.f32 %v27_v11, %v17_v9 }
   0xa   :  { %v46_v18 = vadd.f32 %v39_v12, %v30_v14  ;;  %v47_v19 = vadd.f32 %v43_v13, %v31_v15  ;;  %v48_v20 = vadd.f32 %v39_v12, %v32_v16  ;;  %v49_v21 = vadd.f32 %v43_v13, %v33_v17 }
   0xc   :  { %v50_v22 = vmax.f32 %v46_v18, 0.0  ;;  %v51_v23 = vmax.f32 %v47_v19, 0.0  ;;  %v52_v24 = vmax.f32 %v48_v20, 0.0  ;;  %v53_v25 = vmax.f32 %v49_v21, 0.0 }
   0xe   :  { %v74_v26 = vpack.c.bf16 %v51_v23, %v50_v22  ;;  %v75_v27 = vpack.c.bf16 %v53_v25, %v52_v24 }
  0x10   :  { %66 = vst [vmem:[%s123_s3] sm:$0xff] %v74_v26  ;;  %67 = vst [vmem:[%s123_s3 + $0x8] sm:$0xff] %v75_v27 }

// kernel: generator_forward.20
= control target key start
LH: loop header
LB: loop body
LE: loop exit
PB: predicated region body
PF: predicated region fallthrough
CT: control target
= control target key end

     0   :  { %v417_v1 = vmov 0   ;;  %vm92_vm0 = vcmask 261120   ;;  %s525_s1 = inlined_call_operand.vmem [shape: bf16[32,256], index: 1, kind: input, shape index: {}]   ;;  %s526_s0 = inlined_call_operand.vmem [shape: bf16[128,32], index: 0, kind: input, shape index: {}]   ;;  %s527_s2 = inlined_call_operand.vmem [shape: bf16[128,256], index: 2, kind: output, shape index: {}]  }
   0x1   :  { %v403_v0 = vld [vmem:[%s525_s1 + $0x4] ss:$8 sps:$4 sm:$0xff]   ;;  %149 = vmatprep.mubr.bf16.mxu0 %v417_v1  ;;  %189 = vmatprep.mubr.bf16.mxu1 %v417_v1  ;;  %v405_v2 = vld [vmem:[%s525_s1] ss:$8 sps:$4 sm:$0xff]   ;;  %v406_v3 = vld [vmem:[%s525_s1 + $0x14] ss:$8 sps:$4 sm:$0xff]  }
   0x2   :  { %117 = vmatprep.subr.bf16.mxu0 %v403_v0  ;;  %398 = vmatprep.subr.bf16.mxu1 %v403_v0  ;;  %v408_v4 = vld [vmem:[%s525_s1 + $0x10] ss:$8 sps:$4 sm:$0xff]   ;;  %v409_v5 = vld [vmem:[%s526_s0] sm:$0xff]   ;;  %v411_v7 = vld [vmem:[%s526_s0 + $0x8] sm:$0xff]  }
   0x3   :  { %118 = vmatpush1.bf16.msra.mxu0 %v405_v2  ;;  %400 = vmatpush1.bf16.msra.mxu1 %v405_v2  ;;  %v410_v6 = vld [vmem:[%s526_s0 + $0x20] sm:$0xff]   ;;  %v412_v8 = vld [vmem:[%s526_s0 + $0x28] sm:$0xff]   ;;  %v413_v9 = vld [vmem:[%s526_s0 + $0x10] sm:$0xff]  }
   0x4   :  { %119 = vmatprep.subr.bf16.mxu0 %v406_v3  ;;  %399 = vmatprep.subr.bf16.mxu1 %v406_v3  ;;  %v414_v10 = vld [vmem:[%s526_s0 + $0x30] sm:$0xff]   ;;  %v415_v11 = vld [vmem:[%s526_s0 + $0x18] sm:$0xff]  }
   0x5   :  { %v416_v12 = vld [vmem:[%s526_s0 + $0x38] sm:$0xff]  }
   0x7   :  { %120 = vmatpush1.bf16.msra.mxu0 %v408_v4  ;;  %401 = vmatpush1.bf16.msra.mxu1 %v408_v4 }
   0xa   :  { %358 = vmatmul.mubr.msk.bf16.vlgmr.msra.gmra.mrb[0].mxu0 %vm92_vm0, %v409_v5  ;;  %362 = vmatmul.mubr.msk.bf16.vlgmr.msra.gmra.mrb[0].mxu1 %vm92_vm0, %v410_v6 }
   0xb   :  { %159 = vmatprep.mubr.bf16.mxu0 %v417_v1  ;;  %199 = vmatprep.mubr.bf16.mxu1 %v417_v1 }
  0x12   :  { %359 = vmatmul.mubr.msk.bf16.gmra.mrb[4].mxu0 %vm92_vm0, %v411_v7  ;;  %363 = vmatmul.mubr.msk.bf16.gmra.mrb[4].mxu1 %vm92_vm0, %v412_v8 }
  0x13   :  { %169 = vmatprep.mubr.bf16.mxu0 %v417_v1  ;;  %209 = vmatprep.mubr.bf16.mxu1 %v417_v1 }
  0x1a   :  { %360 = vmatmul.mubr.msk.bf16.gmra.mrb[8].mxu0 %vm92_vm0, %v413_v9  ;;  %364 = vmatmul.mubr.msk.bf16.gmra.mrb[8].mxu1 %vm92_vm0, %v414_v10 }
  0x1b   :  { %179 = vmatprep.mubr.bf16.mxu0 %v417_v1  ;;  %219 = vmatprep.mubr.bf16.mxu1 %v417_v1 }
  0x22   :  { %361 = vmatmul.mubr.msk.bf16.gmra.mrb[12].mxu0 %vm92_vm0, %v415_v11  ;;  %365 = vmatmul.mubr.msk.bf16.gmra.mrb[12].mxu1 %vm92_vm0, %v416_v12 }
  0xdd   :  { %v151_v13 = vpop.f32.mrb[0].mxu0  ;;  %v191_v14 = vpop.f32.mrb[0].mxu1 }
  0xde   :  { %v153_v15 = vpop.f32.mrb[1].mxu0  ;;  %v193_v16 = vpop.f32.mrb[1].mxu1 }
  0xdf   :  { %v382_v17 = vpack.c.bf16 %v153_v15, %v151_v13  ;;  %v390_v18 = vpack.c.bf16 %v193_v16, %v191_v14  ;;  %v155_v19 = vpop.f32.mrb[2].mxu0  ;;  %v195_v20 = vpop.f32.mrb[2].mxu1 }
  0xe0   :  { %v157_v21 = vpop.f32.mrb[3].mxu0  ;;  %v197_v22 = vpop.f32.mrb[3].mxu1 }
  0xe1   :  { %326 = vst [vmem:[%s527_s2] sm:$0xff] %v382_v17  ;;  %334 = vst [vmem:[%s527_s2 + $0x40] sm:$0xff] %v390_v18  ;;  %v383_v23 = vpack.c.bf16 %v157_v21, %v155_v19  ;;  %v391_v24 = vpack.c.bf16 %v197_v22, %v195_v20 }
  0xe3   :  { %327 = vst [vmem:[%s527_s2 + $0x8] sm:$0xff] %v383_v23  ;;  %335 = vst [vmem:[%s527_s2 + $0x48] sm:$0xff] %v391_v24 }
  0xe5   :  { %v161_v25 = vpop.f32.mrb[4].mxu0  ;;  %v201_v26 = vpop.f32.mrb[4].mxu1 }
  0xe6   :  { %v163_v27 = vpop.f32.mrb[5].mxu0  ;;  %v203_v28 = vpop.f32.mrb[5].mxu1 }
  0xe7   :  { %v384_v29 = vpack.c.bf16 %v163_v27, %v161_v25  ;;  %v392_v30 = vpack.c.bf16 %v203_v28, %v201_v26  ;;  %v165_v31 = vpop.f32.mrb[6].mxu0  ;;  %v205_v32 = vpop.f32.mrb[6].mxu1 }
  0xe8   :  { %v167_v33 = vpop.f32.mrb[7].mxu0  ;;  %v207_v34 = vpop.f32.mrb[7].mxu1 }
  0xe9   :  { %328 = vst [vmem:[%s527_s2 + $0x10] sm:$0xff] %v384_v29  ;;  %336 = vst [vmem:[%s527_s2 + $0x50] sm:$0xff] %v392_v30  ;;  %v385_v35 = vpack.c.bf16 %v167_v33, %v165_v31  ;;  %v393_v36 = vpack.c.bf16 %v207_v34, %v205_v32 }
  0xeb   :  { %329 = vst [vmem:[%s527_s2 + $0x18] sm:$0xff] %v385_v35  ;;  %337 = vst [vmem:[%s527_s2 + $0x58] sm:$0xff] %v393_v36 }
  0xed   :  { %v171_v37 = vpop.f32.mrb[8].mxu0  ;;  %v211_v38 = vpop.f32.mrb[8].mxu1 }
  0xee   :  { %v173_v39 = vpop.f32.mrb[9].mxu0  ;;  %v213_v40 = vpop.f32.mrb[9].mxu1 }
  0xef   :  { %v386_v41 = vpack.c.bf16 %v173_v39, %v171_v37  ;;  %v394_v42 = vpack.c.bf16 %v213_v40, %v211_v38  ;;  %v175_v43 = vpop.f32.mrb[10].mxu0  ;;  %v215_v44 = vpop.f32.mrb[10].mxu1 }
  0xf0   :  { %v177_v45 = vpop.f32.mrb[11].mxu0  ;;  %v217_v46 = vpop.f32.mrb[11].mxu1 }
  0xf1   :  { %330 = vst [vmem:[%s527_s2 + $0x20] sm:$0xff] %v386_v41  ;;  %338 = vst [vmem:[%s527_s2 + $0x60] sm:$0xff] %v394_v42  ;;  %v387_v47 = vpack.c.bf16 %v177_v45, %v175_v43  ;;  %v395_v48 = vpack.c.bf16 %v217_v46, %v215_v44 }
  0xf3   :  { %331 = vst [vmem:[%s527_s2 + $0x28] sm:$0xff] %v387_v47  ;;  %339 = vst [vmem:[%s527_s2 + $0x68] sm:$0xff] %v395_v48 }
  0xf5   :  { %v181_v49 = vpop.f32.mrb[12].mxu0  ;;  %v221_v50 = vpop.f32.mrb[12].mxu1 }
  0xf6   :  { %v183_v51 = vpop.f32.mrb[13].mxu0  ;;  %v223_v52 = vpop.f32.mrb[13].mxu1 }
  0xf7   :  { %v388_v53 = vpack.c.bf16 %v183_v51, %v181_v49  ;;  %v396_v54 = vpack.c.bf16 %v223_v52, %v221_v50  ;;  %v185_v55 = vpop.f32.mrb[14].mxu0  ;;  %v225_v56 = vpop.f32.mrb[14].mxu1 }
  0xf8   :  { %v187_v57 = vpop.f32.mrb[15].mxu0  ;;  %v227_v58 = vpop.f32.mrb[15].mxu1 }
  0xf9   :  { %332 = vst [vmem:[%s527_s2 + $0x30] sm:$0xff] %v388_v53  ;;  %340 = vst [vmem:[%s527_s2 + $0x70] sm:$0xff] %v396_v54  ;;  %v389_v59 = vpack.c.bf16 %v187_v57, %v185_v55  ;;  %v397_v60 = vpack.c.bf16 %v227_v58, %v225_v56 }
  0xfb   :  { %333 = vst [vmem:[%s527_s2 + $0x38] sm:$0xff] %v389_v59  ;;  %341 = vst [vmem:[%s527_s2 + $0x78] sm:$0xff] %v397_v60 }

// kernel: tile.68
= control target key start
LH: loop header
LB: loop body
LE: loop exit
PB: predicated region body
PF: predicated region fallthrough
CT: control target
= control target key end

     0   :  { %s28_s0 = inlined_call_operand.vmem [shape: f32[16], index: 0, kind: input, shape index: {}]   ;;  %s29_s1 = inlined_call_operand.vmem [shape: f32[16,16], index: 1, kind: output, shape index: {}]  }
   0x1   :  { %v4_v0 = vld [vmem:[%s28_s0] ss:$0 sm:$0xff] }
   0x2   :  { %5 = vst [vmem:[%s29_s1] sm:$0xff] %v4_v0  ;;  %8 = vst [vmem:[%s29_s1 + $0x8] sm:$0xff] %v4_v0 }

// kernel: tile.69
= control target key start
LH: loop header
LB: loop body
LE: loop exit
PB: predicated region body
PF: predicated region fallthrough
CT: control target
= control target key end

     0   :  { %s7_s6 = smov 3  ;;  %s21_s9 = smov 3  ;;  %vm4_vm0 = vcmask 130048   ;;  %vm11_vm1 = vcmask 1048448   ;;  %vm18_vm2 = vcmask 917248   ;;  %vm25_vm3 = vcmask 786048   ;;  %s128_s0 = inlined_call_operand.vmem [shape: f32[16,16], index: 0, kind: input, shape index: {}]   ;;  %s129_s1 = inlined_call_operand.vmem [shape: f32[1,256], index: 1, kind: output, shape index: {}]  }
   0x1   :  { %v66_v0 = vld [vmem:[%s128_s0 + $0x7] ss:$8 sm:%s7_s6]   ;;  %s81_s10 = smov 112   ;;  %v68_v1 = vld [vmem:[%s128_s0 + $0x5] ss:$8 sm:%s21_s9]   ;;  %s14_s13 = smov 3 }
   0x2   :  { %9 = vrot.lane.b32.xlu0 %v66_v0, %s81_s10  ;;  %s82_s14 = smov 80   ;;  %v67_v2 = vld [vmem:[%s128_s0 + $0x6] ss:$8 sm:%s14_s13]   ;;  %s28_s17 = smov 3  ;;  %vm32_vm4 = vcmask 654848   ;;  %vm39_vm5 = vcmask 523648  }
   0x3   :  { %23 = vrot.lane.b32.xlu1 %v68_v1, %s82_s14  ;;  %v69_v3 = vld [vmem:[%s128_s0 + $0x4] ss:$8 sm:%s28_s17]   ;;  %s35_s20 = smov 3  ;;  %s42_s21 = smov 3  ;;  %vm46_vm6 = vcmask 392448   ;;  %vm53_vm7 = vcmask 261248  }
   0x4   :  { %s83_s22 = smov 96   ;;  %s84_s23 = smov 64   ;;  %v70_v4 = vld [vmem:[%s128_s0 + $0x3] ss:$8 sm:%s35_s20]   ;;  %v71_v5 = vld [vmem:[%s128_s0 + $0x2] ss:$8 sm:%s42_s21]  }
   0x5   :  { %s2_s26 = smov 3  ;;  %s49_s29 = smov 3 }
   0x6   :  { %16 = vrot.lane.b32.xlu0 %v67_v2, %s83_s22  ;;  %v3_v6 = vld [vmem:[%s128_s0] ss:$8 sm:%s2_s26]   ;;  %s85_s3 = smov 48   ;;  %s86_s4 = smov 32  }
   0x7   :  { %30 = vrot.lane.b32.xlu1 %v69_v3, %s84_s23  ;;  %5 = vst.msk [vmem:[#allocation0] ss:$8 sm:$0x3] %vm4_vm0, %v3_v6   ;;  %v72_v7 = vld [vmem:[%s128_s0 + $0x1] ss:$8 sm:%s49_s29]   ;;  %s87_s0 = smov 16  }
   0xa   :  { %37 = vrot.lane.b32.xlu0 %v70_v4, %s85_s3 }
   0xb   :  { %44 = vrot.lane.b32.xlu1 %v71_v5, %s86_s4 }
   0xe   :  { %51 = vrot.lane.b32.xlu0 %v72_v7, %s87_s0 }
  0x74   :  { %v10_v8 = vpop.permute.xlu0 %9  }
  0x75   :  { %12 = vst.msk [vmem:[#allocation0] ss:$8 sm:$0x3] %vm11_vm1, %v10_v8   ;;  %v24_v9 = vpop.permute.xlu1 %23  }
  0x78   :  { %v17_v10 = vpop.permute.xlu0 %16  }
  0x79   :  { %19 = vst.msk [vmem:[#allocation0] ss:$8 sm:$0x3] %vm18_vm2, %v17_v10   ;;  %v31_v11 = vpop.permute.xlu1 %30  }
  0x7a   :  { %26 = vst.msk [vmem:[#allocation0] ss:$8 sm:$0x3] %vm25_vm3, %v24_v9  }
  0x7b   :  { %33 = vst.msk [vmem:[#allocation0] ss:$8 sm:$0x3] %vm32_vm4, %v31_v11  }
  0x7c   :  { %v38_v12 = vpop.permute.xlu0 %37  }
  0x7d   :  { %40 = vst.msk [vmem:[#allocation0] ss:$8 sm:$0x3] %vm39_vm5, %v38_v12   ;;  %v45_v13 = vpop.permute.xlu1 %44  }
  0x7e   :  { %47 = vst.msk [vmem:[#allocation0] ss:$8 sm:$0x3] %vm46_vm6, %v45_v13  }
  0x80   :  { %v52_v14 = vpop.permute.xlu0 %51  }
  0x81   :  { %54 = vst.msk [vmem:[#allocation0] ss:$8 sm:$0x3] %vm53_vm7, %v52_v14  }
  0x88   :  { %v58_v15 = vld [vmem:[#allocation0] sm:$0x1]  ;;  %v62_v16 = vld [vmem:[#allocation0 + $0x8] sm:$0x1] }
  0x89   :  { %60 = vst [vmem:[%s129_s1] sm:$0x1] %v58_v15  ;;  %73 = vst [vmem:[%s129_s1 + $0x1] sm:$0x1] %v62_v16 }

// kernel: generator_forward.21
= control target key start
LH: loop header
LB: loop body
LE: loop exit
PB: predicated region body
PF: predicated region fallthrough
CT: control target
= control target key end

     0   :  { %v114_v0 = vmov 0.0   ;;  %v115_v33 = vmov 1966171168   ;;  %v42_v35 = vlaneseq  ;;  %s162_s1 = inlined_call_operand.vmem [shape: f32[8,256], index: 1, kind: output, shape index: {}]   ;;  %s163_s0 = inlined_call_operand.vmem [shape: f32[32,256], index: 0, kind: input, shape index: {}]  }
   0x1   :  { %16 = vst [vmem:[%s162_s1] sm:$0xff] %v114_v0  ;;  %17 = vst [vmem:[%s162_s1 + $0x8] sm:$0xff] %v114_v0  ;;  %v8_v1 = vld [vmem:[%s163_s0] sm:$0xff]  ;;  %v9_v2 = vld [vmem:[%s163_s0 + $0x8] sm:$0xff]  ;;  %v40_v34 = vunpack.c.l.s4 %v115_v33 }
   0x2   :  { %v10_v3 = vld [vmem:[%s163_s0 + $0x10] sm:$0xff]  ;;  %v11_v4 = vld [vmem:[%s163_s0 + $0x18] sm:$0xff]  ;;  %v12_v5 = vld [vmem:[%s163_s0 + $0x20] sm:$0xff]  ;;  %v60_v8 = vmul.f32 %v8_v1, %v8_v1  ;;  %v61_v12 = vmul.f32 %v9_v2, %v9_v2  ;;  %v43_v45 = vshrl.u32 %v42_v35, 7  ;;  %vm56_vm0 = vcmp.lt.s32.totalorder %v42_v35, 256 }
   0x3   :  { %v13_v6 = vld [vmem:[%s163_s0 + $0x28] sm:$0xff]  ;;  %v18_v7 = vadd.f32 %v10_v3, %v8_v1  ;;  %v14_v9 = vld [vmem:[%s163_s0 + $0x30] sm:$0xff]  ;;  %v15_v10 = vld [vmem:[%s163_s0 + $0x38] sm:$0xff]  ;;  %v27_v11 = vadd.f32 %v11_v4, %v9_v2  ;;  %v62_v13 = vmul.f32 %v10_v3, %v10_v3  ;;  %v63_v15 = vmul.f32 %v11_v4, %v11_v4 }
   0x4   :  { %v64_v16 = vmul.f32 %v12_v5, %v12_v5  ;;  %v65_v17 = vmul.f32 %v13_v6, %v13_v6  ;;  %v66_v19 = vmul.f32 %v14_v9, %v14_v9  ;;  %v67_v21 = vmul.f32 %v15_v10, %v15_v10 }
   0x5   :  { %v19_v14 = vadd.f32 %v18_v7, %v12_v5  ;;  %v28_v18 = vadd.f32 %v27_v11, %v13_v6  ;;  %v68_v22 = vadd.f32 %v62_v13, %v60_v8  ;;  %v77_v23 = vadd.f32 %v63_v15, %v61_v12 }
   0x6   :  { %v41_v44 = vunpack.c.0.s8 %v40_v34 }
   0x7   :  { %v20_v20 = vadd.f32 %v19_v14, %v14_v9  ;;  %v29_v24 = vadd.f32 %v28_v18, %v15_v10  ;;  %v69_v26 = vadd.f32 %v68_v22, %v64_v16  ;;  %v78_v27 = vadd.f32 %v77_v23, %v65_v17 }
   0x8   :  { %v44_v54 = vsub.s32 %v41_v44, %v43_v45 }
   0x9   :  { %v21_v25 = vrot.slane %v20_v20, 4  ;;  %v30_v28 = vrot.slane %v29_v24, 4  ;;  %v70_v30 = vadd.f32 %v69_v26, %v66_v19  ;;  %v79_v31 = vadd.f32 %v78_v27, %v67_v21 }
   0xb   :  { %v22_v29 = vadd.f32 %v21_v25, %v20_v20  ;;  %v31_v32 = vadd.f32 %v30_v28, %v29_v24  ;;  %v71_v37 = vrot.slane %v70_v30, 4  ;;  %v80_v38 = vrot.slane %v79_v31, 4 }
   0xd   :  { %v23_v36 = vrot.slane %v22_v29, 2  ;;  %v32_v39 = vrot.slane %v31_v32, 2  ;;  %v72_v41 = vadd.f32 %v71_v37, %v70_v30  ;;  %v81_v42 = vadd.f32 %v80_v38, %v79_v31 }
   0xf   :  { %v24_v40 = vadd.f32 %v23_v36, %v22_v29  ;;  %v33_v43 = vadd.f32 %v32_v39, %v31_v32  ;;  %v73_v47 = vrot.slane %v72_v41, 2  ;;  %v82_v48 = vrot.slane %v81_v42, 2 }
  0x11   :  { %v25_v46 = vrot.slane %v24_v40, 1  ;;  %v34_v49 = vrot.slane %v33_v43, 1  ;;  %v74_v51 = vadd.f32 %v73_v47, %v72_v41  ;;  %v83_v52 = vadd.f32 %v82_v48, %v81_v42 }
  0x13   :  { %v26_v50 = vadd.f32 %v25_v46, %v24_v40  ;;  %v35_v53 = vadd.f32 %v34_v49, %v33_v43  ;;  %v75_v55 = vrot.slane %v74_v51, 1  ;;  %v84_v56 = vrot.slane %v83_v52, 1 }
  0x15   :  { %v38_v57 = vcombine.low %v26_v50, %v35_v53  ;;  %v76_v58 = vadd.f32 %v75_v55, %v74_v51  ;;  %v85_v59 = vadd.f32 %v84_v56, %v83_v52 }
  0x17   :  { %v45_v60 = vrot.slane %v38_v57, %v44_v54  ;;  %v88_v61 = vcombine.low %v76_v58, %v85_v59 }
  0x19   :  { %v52_v62 = vrot.slane %v45_v60, %v44_v54  ;;  %v95_v63 = vrot.slane %v88_v61, %v44_v54 }
  0x1b   :  { %58 = vst.msk [vmem:[%s162_s1] ss:$8 sm:$0x3] %vm56_vm0, %v52_v62  ;;  %v102_v0 = vrot.slane %v95_v63, %v44_v54 }
  0x1d   :  { %111 = vst.msk [vmem:[%s162_s1 + $0x1] ss:$8 sm:$0x3] %vm56_vm0, %v102_v0 }

// kernel: generator_forward.22
= control target key start
LH: loop header
LB: loop body
LE: loop exit
PB: predicated region body
PF: predicated region fallthrough
CT: control target
= control target key end

     0   :  { %v24_v0 = vlaneseq  ;;  %s172_s1 = inlined_call_operand.vmem [shape: f32[1,256], index: 1, kind: input, shape index: {}]   ;;  %s173_s2 = inlined_call_operand.vmem [shape: f32[1,256], index: 2, kind: input, shape index: {}]   ;;  %s174_s0 = inlined_call_operand.vmem [shape: f32[32,256], index: 0, kind: input, shape index: {}]   ;;  %s175_s3 = inlined_call_operand.vmem [shape: bf16[32,256], index: 3, kind: output, shape index: {}]  }
   0x1   :  { %v22_v2 = vld [vmem:[%s172_s1] sm:$0x3]  ;;  %v15_v5 = vld [vmem:[%s174_s0 + $0x8] sm:$0xff]  ;;  %v16_v8 = vld [vmem:[%s174_s0 + $0x10] sm:$0xff] }
   0x2   :  { %v25_v1 = vshrl.u32 %v24_v0, 7  ;;  %v42_v3 = vld [vmem:[%s173_s2] sm:$0x3]  ;;  %v17_v9 = vld [vmem:[%s174_s0 + $0x18] sm:$0xff]  ;;  %v19_v15 = vld [vmem:[%s174_s0 + $0x28] sm:$0xff] }
   0x3   :  { %v14_v4 = vld [vmem:[%s174_s0] sm:$0xff]  ;;  %v20_v16 = vld [vmem:[%s174_s0 + $0x30] sm:$0xff]  ;;  %v21_v17 = vld [vmem:[%s174_s0 + $0x38] sm:$0xff] }
   0x4   :  { %v26_v6 = vsub.s32 0, %v25_v1  ;;  %v30_v7 = vsub.s32 1, %v25_v1  ;;  %v18_v10 = vld [vmem:[%s174_s0 + $0x20] sm:$0xff] }
   0x6   :  { %v27_v11 = vrot.slane %v22_v2, %v26_v6  ;;  %v31_v12 = vrot.slane %v22_v2, %v30_v7  ;;  %v47_v13 = vrot.slane %v42_v3, %v26_v6  ;;  %v51_v14 = vrot.slane %v42_v3, %v30_v7 }
   0x8   :  { %v34_v18 = vmul.f32 %v27_v11, %v14_v4  ;;  %v35_v19 = vmul.f32 %v31_v12, %v15_v5  ;;  %v36_v20 = vmul.f32 %v27_v11, %v16_v8  ;;  %v37_v21 = vmul.f32 %v31_v12, %v17_v9 }
   0x9   :  { %v38_v22 = vmul.f32 %v27_v11, %v18_v10  ;;  %v39_v23 = vmul.f32 %v31_v12, %v19_v15  ;;  %v40_v24 = vmul.f32 %v27_v11, %v20_v16  ;;  %v41_v25 = vmul.f32 %v31_v12, %v21_v17 }
   0xa   :  { %v54_v26 = vadd.f32 %v47_v13, %v34_v18  ;;  %v55_v27 = vadd.f32 %v51_v14, %v35_v19  ;;  %v56_v28 = vadd.f32 %v47_v13, %v36_v20  ;;  %v57_v29 = vadd.f32 %v51_v14, %v37_v21 }
   0xb   :  { %v58_v30 = vadd.f32 %v47_v13, %v38_v22  ;;  %v59_v31 = vadd.f32 %v51_v14, %v39_v23  ;;  %v60_v32 = vadd.f32 %v47_v13, %v40_v24  ;;  %v61_v33 = vadd.f32 %v51_v14, %v41_v25 }
   0xc   :  { %v62_v34 = vmax.f32 %v54_v26, 0.0  ;;  %v63_v35 = vmax.f32 %v55_v27, 0.0  ;;  %v64_v36 = vmax.f32 %v56_v28, 0.0  ;;  %v65_v37 = vmax.f32 %v57_v29, 0.0 }
   0xd   :  { %v66_v38 = vmax.f32 %v58_v30, 0.0  ;;  %v67_v39 = vmax.f32 %v59_v31, 0.0  ;;  %v68_v40 = vmax.f32 %v60_v32, 0.0  ;;  %v69_v41 = vmax.f32 %v61_v33, 0.0 }
   0xe   :  { %v106_v42 = vpack.c.bf16 %v63_v35, %v62_v34  ;;  %v107_v43 = vpack.c.bf16 %v65_v37, %v64_v36 }
   0xf   :  { %v108_v44 = vpack.c.bf16 %v67_v39, %v66_v38  ;;  %v109_v45 = vpack.c.bf16 %v69_v41, %v68_v40 }
  0x10   :  { %94 = vst [vmem:[%s175_s3] sm:$0xff] %v106_v42  ;;  %95 = vst [vmem:[%s175_s3 + $0x8] sm:$0xff] %v107_v43 }
  0x11   :  { %96 = vst [vmem:[%s175_s3 + $0x10] sm:$0xff] %v108_v44  ;;  %97 = vst [vmem:[%s175_s3 + $0x18] sm:$0xff] %v109_v45 }

// kernel: generator_forward.23
= control target key start
LH: loop header
LB: loop body
LE: loop exit
PB: predicated region body
PF: predicated region fallthrough
CT: control target
= control target key end

     0   :  { %vm244_vm0 = vcmask 130048   ;;  %s1714_s1 = inlined_call_operand.vmem [shape: bf16[16,128], index: 1, kind: input, shape index: {}]   ;;  %s1715_s0 = inlined_call_operand.vmem [shape: bf16[512,16], index: 0, kind: input, shape index: {}]   ;;  %s1716_s2 = inlined_call_operand.vmem [shape: bf16[512,128], index: 2, kind: output, shape index: {}]  }
   0x1   :  { %v1439_v0 = vld [vmem:[%s1714_s1] sm:$0xff]   ;;  %v1442_v3 = vld [vmem:[%s1715_s0 + $0x8] sm:$0xff]   ;;  %v1444_v5 = vld [vmem:[%s1715_s0 + $0x10] sm:$0xff]  }
   0x2   :  { %v1440_v1 = vld [vmem:[%s1715_s0] sm:$0xff]   ;;  %1371 = vmatprep.subr.bf16.mxu0 %v1439_v0  ;;  %1437 = vmatprep.subr.bf16.mxu1 %v1439_v0  ;;  %v1443_v4 = vld [vmem:[%s1715_s0 + $0x88] sm:$0xff]   ;;  %v1445_v6 = vld [vmem:[%s1715_s0 + $0x90] sm:$0xff]  }
   0x3   :  { %v1441_v2 = vld [vmem:[%s1715_s0 + $0x80] sm:$0xff]   ;;  %1372 = vmatpush3.bf16.msra.mxu0 %v1439_v0  ;;  %1438 = vmatpush3.bf16.msra.mxu1 %v1439_v0  ;;  %v1446_v7 = vld [vmem:[%s1715_s0 + $0x18] sm:$0xff]   ;;  %v1450_v11 = vld [vmem:[%s1715_s0 + $0x28] sm:$0xff]  }
   0x4   :  { %1373 = vmatprep.mubr.msk.bf16.mxu0 %vm244_vm0, %v1440_v1  ;;  %1405 = vmatprep.mubr.msk.bf16.mxu1 %vm244_vm0, %v1441_v2  ;;  %v1447_v8 = vld [vmem:[%s1715_s0 + $0x98] sm:$0xff]   ;;  %v1448_v9 = vld [vmem:[%s1715_s0 + $0x20] sm:$0xff]   ;;  %v1451_v12 = vld [vmem:[%s1715_s0 + $0xa8] sm:$0xff]  }
   0x5   :  { %v1449_v10 = vld [vmem:[%s1715_s0 + $0xa0] sm:$0xff]   ;;  %v1452_v13 = vld [vmem:[%s1715_s0 + $0x30] sm:$0xff]   ;;  %v1454_v15 = vld [vmem:[%s1715_s0 + $0x38] sm:$0xff]  }
   0x6   :  { %1374 = vmatmul.mubr.msk.bf16.vlgmr.msra.gmra.mrb[0].mxu0 %vm244_vm0, %v1442_v3  ;;  %1406 = vmatmul.mubr.msk.bf16.vlgmr.msra.gmra.mrb[0].mxu1 %vm244_vm0, %v1443_v4  ;;  %v1453_v14 = vld [vmem:[%s1715_s0 + $0xb0] sm:$0xff]   ;;  %v1455_v16 = vld [vmem:[%s1715_s0 + $0xb8] sm:$0xff]   ;;  %v1456_v17 = vld [vmem:[%s1715_s0 + $0x40] sm:$0xff]  }
   0x7   :  { %1377 = vmatprep.mubr.msk.bf16.mxu0 %vm244_vm0, %v1444_v5  ;;  %1409 = vmatprep.mubr.msk.bf16.mxu1 %vm244_vm0, %v1445_v6  ;;  %v1457_v18 = vld [vmem:[%s1715_s0 + $0xc0] sm:$0xff]   ;;  %v1458_v19 = vld [vmem:[%s1715_s0 + $0x48] sm:$0xff]   ;;  %v1460_v21 = vld [vmem:[%s1715_s0 + $0x50] sm:$0xff]  }
   0x8   :  { %v1459_v20 = vld [vmem:[%s1715_s0 + $0xc8] sm:$0xff]   ;;  %v1461_v22 = vld [vmem:[%s1715_s0 + $0xd0] sm:$0xff]   ;;  %v1462_v23 = vld [vmem:[%s1715_s0 + $0x58] sm:$0xff]  }
   0x9   :  { %v1463_v24 = vld [vmem:[%s1715_s0 + $0xd8] sm:$0xff]   ;;  %v1464_v25 = vld [vmem:[%s1715_s0 + $0x60] sm:$0xff]   ;;  %v1466_v27 = vld [vmem:[%s1715_s0 + $0x68] sm:$0xff]  }
   0xa   :  { %v1465_v26 = vld [vmem:[%s1715_s0 + $0xe0] sm:$0xff]   ;;  %v1467_v28 = vld [vmem:[%s1715_s0 + $0xe8] sm:$0xff]   ;;  %v1468_v29 = vld [vmem:[%s1715_s0 + $0x70] sm:$0xff]  }
   0xb   :  { %v1469_v30 = vld [vmem:[%s1715_s0 + $0xf0] sm:$0xff]   ;;  %v1470_v31 = vld [vmem:[%s1715_s0 + $0x78] sm:$0xff]  }
   0xc   :  { %v1471_v32 = vld [vmem:[%s1715_s0 + $0xf8] sm:$0xff]  }
   0xe   :  { %1378 = vmatmul.mubr.msk.bf16.gmra.mrb[4].mxu0 %vm244_vm0, %v1446_v7  ;;  %1410 = vmatmul.mubr.msk.bf16.gmra.mrb[4].mxu1 %vm244_vm0, %v1447_v8 }
   0xf   :  { %1381 = vmatprep.mubr.msk.bf16.mxu0 %vm244_vm0, %v1448_v9  ;;  %1413 = vmatprep.mubr.msk.bf16.mxu1 %vm244_vm0, %v1449_v10 }
  0x16   :  { %1382 = vmatmul.mubr.msk.bf16.gmra.mrb[8].mxu0 %vm244_vm0, %v1450_v11  ;;  %1414 = vmatmul.mubr.msk.bf16.gmra.mrb[8].mxu1 %vm244_vm0, %v1451_v12 }
  0x17   :  { %1385 = vmatprep.mubr.msk.bf16.mxu0 %vm244_vm0, %v1452_v13  ;;  %1417 = vmatprep.mubr.msk.bf16.mxu1 %vm244_vm0, %v1453_v14 }
  0x1e   :  { %1386 = vmatmul.mubr.msk.bf16.gmra.mrb[12].mxu0 %vm244_vm0, %v1454_v15  ;;  %1418 = vmatmul.mubr.msk.bf16.gmra.mrb[12].mxu1 %vm244_vm0, %v1455_v16 }
  0x1f   :  { %1389 = vmatprep.mubr.msk.bf16.mxu0 %vm244_vm0, %v1456_v17  ;;  %1421 = vmatprep.mubr.msk.bf16.mxu1 %vm244_vm0, %v1457_v18 }
  0x26   :  { %1390 = vmatmul.mubr.msk.bf16.gmra.mrb[16].mxu0 %vm244_vm0, %v1458_v19  ;;  %1422 = vmatmul.mubr.msk.bf16.gmra.mrb[16].mxu1 %vm244_vm0, %v1459_v20 }
  0x27   :  { %1393 = vmatprep.mubr.msk.bf16.mxu0 %vm244_vm0, %v1460_v21  ;;  %1425 = vmatprep.mubr.msk.bf16.mxu1 %vm244_vm0, %v1461_v22 }
  0x2e   :  { %1394 = vmatmul.mubr.msk.bf16.gmra.mrb[20].mxu0 %vm244_vm0, %v1462_v23  ;;  %1426 = vmatmul.mubr.msk.bf16.gmra.mrb[20].mxu1 %vm244_vm0, %v1463_v24 }
  0x2f   :  { %1397 = vmatprep.mubr.msk.bf16.mxu0 %vm244_vm0, %v1464_v25  ;;  %1429 = vmatprep.mubr.msk.bf16.mxu1 %vm244_vm0, %v1465_v26 }
  0x36   :  { %1398 = vmatmul.mubr.msk.bf16.gmra.mrb[24].mxu0 %vm244_vm0, %v1466_v27  ;;  %1430 = vmatmul.mubr.msk.bf16.gmra.mrb[24].mxu1 %vm244_vm0, %v1467_v28 }
  0x37   :  { %1401 = vmatprep.mubr.msk.bf16.mxu0 %vm244_vm0, %v1468_v29  ;;  %1433 = vmatprep.mubr.msk.bf16.mxu1 %vm244_vm0, %v1469_v30 }
  0x3e   :  { %1402 = vmatmul.mubr.msk.bf16.gmra.mrb[28].mxu0 %vm244_vm0, %v1470_v31  ;;  %1434 = vmatmul.mubr.msk.bf16.gmra.mrb[28].mxu1 %vm244_vm0, %v1471_v32 }
  0xd9   :  { %v1375_v33 = vpop.f32.mrb[0].mxu0  ;;  %v1407_v34 = vpop.f32.mrb[0].mxu1 }
  0xda   :  { %v375_v35 = vpop.f32.mrb[1].mxu0  ;;  %v503_v36 = vpop.f32.mrb[1].mxu1 }
  0xdb   :  { %v1376_v37 = vpop.f32.mrb[2].mxu0  ;;  %v1408_v38 = vpop.f32.mrb[2].mxu1 }
  0xdc   :  { %v1155_v39 = vpack.c.bf16 %v1376_v37, %v1375_v33  ;;  %v1235_v40 = vpack.c.bf16 %v1408_v38, %v1407_v34  ;;  %v378_v41 = vpop.f32.mrb[3].mxu0  ;;  %v506_v42 = vpop.f32.mrb[3].mxu1 }
  0xdd   :  { %v1150_v43 = vpack.c.bf16 %v378_v41, %v375_v35  ;;  %v1230_v44 = vpack.c.bf16 %v506_v42, %v503_v36 }
  0xde   :  { %1307 = vst [vmem:[%s1716_s2 + $0x8] sm:$0xff] %v1155_v39   ;;  %1323 = vst [vmem:[%s1716_s2 + $0x88] sm:$0xff] %v1235_v40  }
  0xdf   :  { %1151 = vst [vmem:[%s1716_s2] sm:$0xff] %v1150_v43   ;;  %1322 = vst [vmem:[%s1716_s2 + $0x80] sm:$0xff] %v1230_v44  }
  0xe1   :  { %v1379_v45 = vpop.f32.mrb[4].mxu0  ;;  %v1411_v46 = vpop.f32.mrb[4].mxu1 }
  0xe2   :  { %v391_v47 = vpop.f32.mrb[5].mxu0  ;;  %v519_v48 = vpop.f32.mrb[5].mxu1 }
  0xe3   :  { %v1380_v49 = vpop.f32.mrb[6].mxu0  ;;  %v1412_v50 = vpop.f32.mrb[6].mxu1 }
  0xe4   :  { %v1165_v51 = vpack.c.bf16 %v1380_v49, %v1379_v45  ;;  %v1245_v52 = vpack.c.bf16 %v1412_v50, %v1411_v46  ;;  %v394_v53 = vpop.f32.mrb[7].mxu0  ;;  %v522_v54 = vpop.f32.mrb[7].mxu1 }
  0xe5   :  { %v1160_v55 = vpack.c.bf16 %v394_v53, %v391_v47  ;;  %v1240_v56 = vpack.c.bf16 %v522_v54, %v519_v48 }
  0xe6   :  { %1309 = vst [vmem:[%s1716_s2 + $0x18] sm:$0xff] %v1165_v51   ;;  %1325 = vst [vmem:[%s1716_s2 + $0x98] sm:$0xff] %v1245_v52  }
  0xe7   :  { %1308 = vst [vmem:[%s1716_s2 + $0x10] sm:$0xff] %v1160_v55   ;;  %1324 = vst [vmem:[%s1716_s2 + $0x90] sm:$0xff] %v1240_v56  }
  0xe9   :  { %v1383_v57 = vpop.f32.mrb[8].mxu0  ;;  %v1415_v58 = vpop.f32.mrb[8].mxu1 }
  0xea   :  { %v407_v59 = vpop.f32.mrb[9].mxu0  ;;  %v535_v60 = vpop.f32.mrb[9].mxu1 }
  0xeb   :  { %v1384_v61 = vpop.f32.mrb[10].mxu0  ;;  %v1416_v62 = vpop.f32.mrb[10].mxu1 }
  0xec   :  { %v1175_v63 = vpack.c.bf16 %v1384_v61, %v1383_v57  ;;  %v1255_v0 = vpack.c.bf16 %v1416_v62, %v1415_v58  ;;  %v410_v1 = vpop.f32.mrb[11].mxu0  ;;  %v538_v2 = vpop.f32.mrb[11].mxu1 }
  0xed   :  { %v1170_v3 = vpack.c.bf16 %v410_v1, %v407_v59  ;;  %v1250_v4 = vpack.c.bf16 %v538_v2, %v535_v60 }
  0xee   :  { %1311 = vst [vmem:[%s1716_s2 + $0x28] sm:$0xff] %v1175_v63   ;;  %1327 = vst [vmem:[%s1716_s2 + $0xa8] sm:$0xff] %v1255_v0  }
  0xef   :  { %1310 = vst [vmem:[%s1716_s2 + $0x20] sm:$0xff] %v1170_v3   ;;  %1326 = vst [vmem:[%s1716_s2 + $0xa0] sm:$0xff] %v1250_v4  }
  0xf1   :  { %v1387_v5 = vpop.f32.mrb[12].mxu0  ;;  %v1419_v6 = vpop.f32.mrb[12].mxu1 }
  0xf2   :  { %v423_v7 = vpop.f32.mrb[13].mxu0  ;;  %v551_v8 = vpop.f32.mrb[13].mxu1 }
  0xf3   :  { %v1388_v9 = vpop.f32.mrb[14].mxu0  ;;  %v1420_v10 = vpop.f32.mrb[14].mxu1 }
  0xf4   :  { %v1185_v11 = vpack.c.bf16 %v1388_v9, %v1387_v5  ;;  %v1265_v12 = vpack.c.bf16 %v1420_v10, %v1419_v6  ;;  %v426_v13 = vpop.f32.mrb[15].mxu0  ;;  %v554_v14 = vpop.f32.mrb[15].mxu1 }
  0xf5   :  { %v1180_v15 = vpack.c.bf16 %v426_v13, %v423_v7  ;;  %v1260_v16 = vpack.c.bf16 %v554_v14, %v551_v8 }
  0xf6   :  { %1313 = vst [vmem:[%s1716_s2 + $0x38] sm:$0xff] %v1185_v11   ;;  %1329 = vst [vmem:[%s1716_s2 + $0xb8] sm:$0xff] %v1265_v12  }
  0xf7   :  { %1312 = vst [vmem:[%s1716_s2 + $0x30] sm:$0xff] %v1180_v15   ;;  %1328 = vst [vmem:[%s1716_s2 + $0xb0] sm:$0xff] %v1260_v16  }
  0xf9   :  { %v1391_v17 = vpop.f32.mrb[16].mxu0  ;;  %v1423_v18 = vpop.f32.mrb[16].mxu1 }
  0xfa   :  { %v439_v19 = vpop.f32.mrb[17].mxu0  ;;  %v567_v20 = vpop.f32.mrb[17].mxu1 }
  0xfb   :  { %v1392_v21 = vpop.f32.mrb[18].mxu0  ;;  %v1424_v22 = vpop.f32.mrb[18].mxu1 }
  0xfc   :  { %v1195_v23 = vpack.c.bf16 %v1392_v21, %v1391_v17  ;;  %v1275_v24 = vpack.c.bf16 %v1424_v22, %v1423_v18  ;;  %v442_v25 = vpop.f32.mrb[19].mxu0  ;;  %v570_v26 = vpop.f32.mrb[19].mxu1 }
  0xfd   :  { %v1190_v27 = vpack.c.bf16 %v442_v25, %v439_v19  ;;  %v1270_v28 = vpack.c.bf16 %v570_v26, %v567_v20 }
  0xfe   :  { %1315 = vst [vmem:[%s1716_s2 + $0x48] sm:$0xff] %v1195_v23   ;;  %1331 = vst [vmem:[%s1716_s2 + $0xc8] sm:$0xff] %v1275_v24  }
  0xff   :  { %1314 = vst [vmem:[%s1716_s2 + $0x40] sm:$0xff] %v1190_v27   ;;  %1330 = vst [vmem:[%s1716_s2 + $0xc0] sm:$0xff] %v1270_v28  }
 0x101   :  { %v1395_v29 = vpop.f32.mrb[20].mxu0  ;;  %v1427_v30 = vpop.f32.mrb[20].mxu1 }
 0x102   :  { %v455_v31 = vpop.f32.mrb[21].mxu0  ;;  %v583_v32 = vpop.f32.mrb[21].mxu1 }
 0x103   :  { %v1396_v33 = vpop.f32.mrb[22].mxu0  ;;  %v1428_v34 = vpop.f32.mrb[22].mxu1 }
 0x104   :  { %v1205_v35 = vpack.c.bf16 %v1396_v33, %v1395_v29  ;;  %v1285_v36 = vpack.c.bf16 %v1428_v34, %v1427_v30  ;;  %v458_v37 = vpop.f32.mrb[23].mxu0  ;;  %v586_v38 = vpop.f32.mrb[23].mxu1 }
 0x105   :  { %v1200_v39 = vpack.c.bf16 %v458_v37, %v455_v31  ;;  %v1280_v40 = vpack.c.bf16 %v586_v38, %v583_v32 }
 0x106   :  { %1317 = vst [vmem:[%s1716_s2 + $0x58] sm:$0xff] %v1205_v35   ;;  %1333 = vst [vmem:[%s1716_s2 + $0xd8] sm:$0xff] %v1285_v36  }
 0x107   :  { %1316 = vst [vmem:[%s1716_s2 + $0x50] sm:$0xff] %v1200_v39   ;;  %1332 = vst [vmem:[%s1716_s2 + $0xd0] sm:$0xff] %v1280_v40  }
 0x109   :  { %v1399_v41 = vpop.f32.mrb[24].mxu0  ;;  %v1431_v42 = vpop.f32.mrb[24].mxu1 }
 0x10a   :  { %v471_v43 = vpop.f32.mrb[25].mxu0  ;;  %v599_v44 = vpop.f32.mrb[25].mxu1 }
 0x10b   :  { %v1400_v45 = vpop.f32.mrb[26].mxu0  ;;  %v1432_v46 = vpop.f32.mrb[26].mxu1 }
 0x10c   :  { %v1215_v47 = vpack.c.bf16 %v1400_v45, %v1399_v41  ;;  %v1295_v48 = vpack.c.bf16 %v1432_v46, %v1431_v42  ;;  %v474_v49 = vpop.f32.mrb[27].mxu0  ;;  %v602_v50 = vpop.f32.mrb[27].mxu1 }
 0x10d   :  { %v1210_v51 = vpack.c.bf16 %v474_v49, %v471_v43  ;;  %v1290_v52 = vpack.c.bf16 %v602_v50, %v599_v44 }
 0x10e   :  { %1319 = vst [vmem:[%s1716_s2 + $0x68] sm:$0xff] %v1215_v47   ;;  %1335 = vst [vmem:[%s1716_s2 + $0xe8] sm:$0xff] %v1295_v48  }
 0x10f   :  { %1318 = vst [vmem:[%s1716_s2 + $0x60] sm:$0xff] %v1210_v51   ;;  %1334 = vst [vmem:[%s1716_s2 + $0xe0] sm:$0xff] %v1290_v52  }
 0x111   :  { %v1403_v53 = vpop.f32.mrb[28].mxu0  ;;  %v1435_v54 = vpop.f32.mrb[28].mxu1 }
 0x112   :  { %v487_v55 = vpop.f32.mrb[29].mxu0  ;;  %v615_v56 = vpop.f32.mrb[29].mxu1 }
 0x113   :  { %v1404_v57 = vpop.f32.mrb[30].mxu0  ;;  %v1436_v58 = vpop.f32.mrb[30].mxu1 }
 0x114   :  { %v1225_v59 = vpack.c.bf16 %v1404_v57, %v1403_v53  ;;  %v1305_v60 = vpack.c.bf16 %v1436_v58, %v1435_v54  ;;  %v490_v61 = vpop.f32.mrb[31].mxu0  ;;  %v618_v62 = vpop.f32.mrb[31].mxu1 }
 0x115   :  { %v1220_v63 = vpack.c.bf16 %v490_v61, %v487_v55  ;;  %v1300_v0 = vpack.c.bf16 %v618_v62, %v615_v56 }
 0x116   :  { %1321 = vst [vmem:[%s1716_s2 + $0x78] sm:$0xff] %v1225_v59   ;;  %1337 = vst [vmem:[%s1716_s2 + $0xf8] sm:$0xff] %v1305_v60  }
 0x117   :  { %1320 = vst [vmem:[%s1716_s2 + $0x70] sm:$0xff] %v1220_v63   ;;  %1336 = vst [vmem:[%s1716_s2 + $0xf0] sm:$0xff] %v1300_v0  }

// kernel: tile.78
= control target key start
LH: loop header
LB: loop body
LE: loop exit
PB: predicated region body
PF: predicated region fallthrough
CT: control target
= control target key end

     0   :  { %s40_s0 = inlined_call_operand.vmem [shape: f32[8], index: 0, kind: input, shape index: {}]   ;;  %s41_s1 = inlined_call_operand.vmem [shape: f32[32,8], index: 1, kind: output, shape index: {}]  }
   0x1   :  { %v4_v0 = vld [vmem:[%s40_s0] ss:$0 sm:$0xff] }
   0x2   :  { %5 = vst [vmem:[%s41_s1] sm:$0xff] %v4_v0  ;;  %12 = vst [vmem:[%s41_s1 + $0x8] sm:$0xff] %v4_v0 }
   0x3   :  { %13 = vst [vmem:[%s41_s1 + $0x10] sm:$0xff] %v4_v0  ;;  %14 = vst [vmem:[%s41_s1 + $0x18] sm:$0xff] %v4_v0 }

// kernel: tile.79
= control target key start
LH: loop header
LB: loop body
LE: loop exit
PB: predicated region body
PF: predicated region fallthrough
CT: control target
= control target key end

     0   :  { %s7_s6 = smov 3  ;;  %s21_s9 = smov 3  ;;  %vm4_vm0 = vcmask 64512   ;;  %vm11_vm1 = vcmask 1048512   ;;  %vm18_vm2 = vcmask 982912   ;;  %vm25_vm3 = vcmask 917312   ;;  %s232_s0 = inlined_call_operand.vmem [shape: f32[32,8], index: 0, kind: input, shape index: {}]   ;;  %s233_s1 = inlined_call_operand.vmem [shape: f32[1,256], index: 1, kind: output, shape index: {}]  }
   0x1   :  { %v122_v0 = vld [vmem:[%s232_s0 + $0xf] ss:$16 sm:%s7_s6]   ;;  %s153_s10 = smov 120   ;;  %v124_v1 = vld [vmem:[%s232_s0 + $0xd] ss:$16 sm:%s21_s9]   ;;  %s14_s13 = smov 3 }
   0x2   :  { %9 = vrot.lane.b32.xlu0 %v122_v0, %s153_s10  ;;  %s154_s14 = smov 104   ;;  %v123_v2 = vld [vmem:[%s232_s0 + $0xe] ss:$16 sm:%s14_s13]   ;;  %s28_s17 = smov 3  ;;  %vm32_vm4 = vcmask 851712   ;;  %vm39_vm5 = vcmask 786112  }
   0x3   :  { %23 = vrot.lane.b32.xlu1 %v124_v1, %s154_s14  ;;  %v125_v3 = vld [vmem:[%s232_s0 + $0xc] ss:$16 sm:%s28_s17]   ;;  %s35_s20 = smov 3  ;;  %s42_s21 = smov 3  ;;  %vm46_vm6 = vcmask 720512   ;;  %vm53_vm7 = vcmask 654912  }
   0x4   :  { %s155_s22 = smov 112   ;;  %s156_s23 = smov 96   ;;  %v126_v4 = vld [vmem:[%s232_s0 + $0xb] ss:$16 sm:%s35_s20]   ;;  %v127_v5 = vld [vmem:[%s232_s0 + $0xa] ss:$16 sm:%s42_s21]  }
   0x5   :  { %s49_s28 = smov 3  ;;  %s56_s29 = smov 3  ;;  %vm60_vm8 = vcmask 589312   ;;  %vm67_vm9 = vcmask 523712   ;;  %vm74_vm10 = vcmask 458112   ;;  %vm81_vm11 = vcmask 392512  }
   0x6   :  { %16 = vrot.lane.b32.xlu0 %v123_v2, %s155_s22  ;;  %s157_s30 = smov 88   ;;  %s158_s2 = smov 80   ;;  %v128_v6 = vld [vmem:[%s232_s0 + $0x9] ss:$16 sm:%s49_s28]   ;;  %vm88_vm12 = vcmask 326912   ;;  %vm95_vm13 = vcmask 261312  }
   0x7   :  { %30 = vrot.lane.b32.xlu1 %v125_v3, %s156_s23  ;;  %v129_v7 = vld [vmem:[%s232_s0 + $0x8] ss:$16 sm:%s56_s29]   ;;  %s63_s7 = smov 3  ;;  %s70_s8 = smov 3  ;;  %vm102_vm14 = vcmask 195712   ;;  %vm109_vm15 = vcmask 130112  }
   0x8   :  { %s159_s9 = smov 72   ;;  %s160_s10 = smov 64   ;;  %v130_v8 = vld [vmem:[%s232_s0 + $0x7] ss:$16 sm:%s63_s7]   ;;  %v131_v9 = vld [vmem:[%s232_s0 + $0x6] ss:$16 sm:%s70_s8]  }
   0x9   :  { %s2_s13 = smov 3  ;;  %s77_s16 = smov 3 }
   0xa   :  { %37 = vrot.lane.b32.xlu0 %v126_v4, %s157_s30  ;;  %v3_v10 = vld [vmem:[%s232_s0] ss:$16 sm:%s2_s13]   ;;  %s84_s19 = smov 3  ;;  %s161_s20 = smov 56  }
   0xb   :  { %44 = vrot.lane.b32.xlu1 %v127_v5, %s158_s2  ;;  %5 = vst.msk [vmem:[#allocation0] ss:$8 sm:$0x3] %vm4_vm0, %v3_v10   ;;  %s162_s21 = smov 48   ;;  %v132_v11 = vld [vmem:[%s232_s0 + $0x5] ss:$16 sm:%s77_s16]  }
   0xc   :  { %v133_v12 = vld [vmem:[%s232_s0 + $0x4] ss:$16 sm:%s84_s19]   ;;  %s91_s26 = smov 3  ;;  %s98_s27 = smov 3 }
   0xd   :  { %s163_s28 = smov 40   ;;  %s164_s29 = smov 32   ;;  %v134_v13 = vld [vmem:[%s232_s0 + $0x3] ss:$16 sm:%s91_s26]   ;;  %v135_v14 = vld [vmem:[%s232_s0 + $0x2] ss:$16 sm:%s98_s27]  }
   0xe   :  { %51 = vrot.lane.b32.xlu0 %v128_v6, %s159_s9  ;;  %s105_s5 = smov 3  ;;  %s165_s6 = smov 24  }
   0xf   :  { %58 = vrot.lane.b32.xlu1 %v129_v7, %s160_s10  ;;  %s166_s7 = smov 16   ;;  %v136_v15 = vld [vmem:[%s232_s0 + $0x1] ss:$16 sm:%s105_s5]   ;;  %s167_s0 = smov 8  }
  0x12   :  { %65 = vrot.lane.b32.xlu0 %v130_v8, %s161_s20 }
  0x13   :  { %72 = vrot.lane.b32.xlu1 %v131_v9, %s162_s21 }
  0x16   :  { %79 = vrot.lane.b32.xlu0 %v132_v11, %s163_s28 }
  0x17   :  { %86 = vrot.lane.b32.xlu1 %v133_v12, %s164_s29 }
  0x1a   :  { %93 = vrot.lane.b32.xlu0 %v134_v13, %s165_s6 }
  0x1b   :  { %100 = vrot.lane.b32.xlu1 %v135_v14, %s166_s7 }
  0x1e   :  { %107 = vrot.lane.b32.xlu0 %v136_v15, %s167_s0 }
  0x74   :  { %v10_v16 = vpop.permute.xlu0 %9  }
  0x75   :  { %12 = vst.msk [vmem:[#allocation0] ss:$8 sm:$0x3] %vm11_vm1, %v10_v16   ;;  %v24_v17 = vpop.permute.xlu1 %23  }
  0x78   :  { %v17_v18 = vpop.permute.xlu0 %16  }
  0x79   :  { %19 = vst.msk [vmem:[#allocation0] ss:$8 sm:$0x3] %vm18_vm2, %v17_v18   ;;  %v31_v19 = vpop.permute.xlu1 %30  }
  0x7a   :  { %26 = vst.msk [vmem:[#allocation0] ss:$8 sm:$0x3] %vm25_vm3, %v24_v17  }
  0x7b   :  { %33 = vst.msk [vmem:[#allocation0] ss:$8 sm:$0x3] %vm32_vm4, %v31_v19  }
  0x7c   :  { %v38_v20 = vpop.permute.xlu0 %37  }
  0x7d   :  { %40 = vst.msk [vmem:[#allocation0] ss:$8 sm:$0x3] %vm39_vm5, %v38_v20   ;;  %v45_v21 = vpop.permute.xlu1 %44  }
  0x7e   :  { %47 = vst.msk [vmem:[#allocation0] ss:$8 sm:$0x3] %vm46_vm6, %v45_v21  }
  0x80   :  { %v52_v22 = vpop.permute.xlu0 %51  }
  0x81   :  { %54 = vst.msk [vmem:[#allocation0] ss:$8 sm:$0x3] %vm53_vm7, %v52_v22   ;;  %v59_v23 = vpop.permute.xlu1 %58  }
  0x82   :  { %61 = vst.msk [vmem:[#allocation0] ss:$8 sm:$0x3] %vm60_vm8, %v59_v23  }
  0x84   :  { %v66_v24 = vpop.permute.xlu0 %65  }
  0x85   :  { %68 = vst.msk [vmem:[#allocation0] ss:$8 sm:$0x3] %vm67_vm9, %v66_v24   ;;  %v73_v25 = vpop.permute.xlu1 %72  }
  0x86   :  { %75 = vst.msk [vmem:[#allocation0] ss:$8 sm:$0x3] %vm74_vm10, %v73_v25  }
  0x88   :  { %v80_v26 = vpop.permute.xlu0 %79  }
  0x89   :  { %82 = vst.msk [vmem:[#allocation0] ss:$8 sm:$0x3] %vm81_vm11, %v80_v26   ;;  %v87_v27 = vpop.permute.xlu1 %86  }
  0x8a   :  { %89 = vst.msk [vmem:[#allocation0] ss:$8 sm:$0x3] %vm88_vm12, %v87_v27  }
  0x8c   :  { %v94_v28 = vpop.permute.xlu0 %93  }
  0x8d   :  { %96 = vst.msk [vmem:[#allocation0] ss:$8 sm:$0x3] %vm95_vm13, %v94_v28   ;;  %v101_v29 = vpop.permute.xlu1 %100  }
  0x8e   :  { %103 = vst.msk [vmem:[#allocation0] ss:$8 sm:$0x3] %vm102_vm14, %v101_v29  }
  0x90   :  { %v108_v30 = vpop.permute.xlu0 %107  }
  0x91   :  { %110 = vst.msk [vmem:[#allocation0] ss:$8 sm:$0x3] %vm109_vm15, %v108_v30  }
  0x98   :  { %v114_v31 = vld [vmem:[#allocation0] sm:$0x1]  ;;  %v118_v32 = vld [vmem:[#allocation0 + $0x8] sm:$0x1] }
  0x99   :  { %116 = vst [vmem:[%s233_s1] sm:$0x1] %v114_v31  ;;  %137 = vst [vmem:[%s233_s1 + $0x1] sm:$0x1] %v118_v32 }

// kernel: generator_forward.24
= control target key start
LH: loop header
LB: loop body
LE: loop exit
PB: predicated region body
PF: predicated region fallthrough
CT: control target
= control target key end

     0   :  { %v146_v0 = vmov 0.0   ;;  %v147_v62 = vmov 1966171168   ;;  %s218_s1 = inlined_call_operand.vmem [shape: f32[8,256], index: 1, kind: output, shape index: {}]   ;;  %s219_s0 = inlined_call_operand.vmem [shape: f32[64,256], index: 0, kind: input, shape index: {}]  }
   0x1   :  { %24 = vst [vmem:[%s218_s1] sm:$0xff] %v146_v0  ;;  %25 = vst [vmem:[%s218_s1 + $0x8] sm:$0xff] %v146_v0  ;;  %v8_v1 = vld [vmem:[%s219_s0] sm:$0xff]  ;;  %v10_v2 = vld [vmem:[%s219_s0 + $0x10] sm:$0xff]  ;;  %v56_v63 = vunpack.c.l.s4 %v147_v62  ;;  %v58_v0 = vlaneseq }
   0x2   :  { %v9_v3 = vld [vmem:[%s219_s0 + $0x8] sm:$0xff]  ;;  %v11_v4 = vld [vmem:[%s219_s0 + $0x18] sm:$0xff]  ;;  %v26_v5 = vadd.f32 %v10_v2, %v8_v1  ;;  %v12_v6 = vld [vmem:[%s219_s0 + $0x20] sm:$0xff]  ;;  %v76_v10 = vmul.f32 %v8_v1, %v8_v1  ;;  %v78_v11 = vmul.f32 %v10_v2, %v10_v2 }
   0x3   :  { %v39_v7 = vadd.f32 %v11_v4, %v9_v3  ;;  %v13_v8 = vld [vmem:[%s219_s0 + $0x28] sm:$0xff]  ;;  %v14_v12 = vld [vmem:[%s219_s0 + $0x30] sm:$0xff]  ;;  %v77_v14 = vmul.f32 %v9_v3, %v9_v3  ;;  %v79_v15 = vmul.f32 %v11_v4, %v11_v4  ;;  %v15_v16 = vld [vmem:[%s219_s0 + $0x38] sm:$0xff]  ;;  %v80_v18 = vmul.f32 %v12_v6, %v12_v6 }
   0x4   :  { %v27_v9 = vadd.f32 %v26_v5, %v12_v6  ;;  %v16_v19 = vld [vmem:[%s219_s0 + $0x40] sm:$0xff]  ;;  %v81_v21 = vmul.f32 %v13_v8, %v13_v8  ;;  %v17_v22 = vld [vmem:[%s219_s0 + $0x48] sm:$0xff]  ;;  %v82_v24 = vmul.f32 %v14_v12, %v14_v12  ;;  %v92_v25 = vadd.f32 %v78_v11, %v76_v10  ;;  %v18_v26 = vld [vmem:[%s219_s0 + $0x50] sm:$0xff] }
   0x5   :  { %v40_v13 = vadd.f32 %v39_v7, %v13_v8  ;;  %v83_v28 = vmul.f32 %v15_v16, %v15_v16  ;;  %v105_v29 = vadd.f32 %v79_v15, %v77_v14  ;;  %v19_v30 = vld [vmem:[%s219_s0 + $0x58] sm:$0xff]  ;;  %v84_v32 = vmul.f32 %v16_v19, %v16_v19  ;;  %v20_v34 = vld [vmem:[%s219_s0 + $0x60] sm:$0xff]  ;;  %v21_v38 = vld [vmem:[%s219_s0 + $0x68] sm:$0xff] }
   0x6   :  { %v28_v17 = vadd.f32 %v27_v9, %v14_v12  ;;  %v93_v33 = vadd.f32 %v92_v25, %v80_v18  ;;  %v85_v36 = vmul.f32 %v17_v22, %v17_v22  ;;  %v86_v40 = vmul.f32 %v18_v26, %v18_v26  ;;  %v22_v42 = vld [vmem:[%s219_s0 + $0x70] sm:$0xff]  ;;  %v23_v46 = vld [vmem:[%s219_s0 + $0x78] sm:$0xff] }
   0x7   :  { %v41_v20 = vadd.f32 %v40_v13, %v15_v16  ;;  %v106_v37 = vadd.f32 %v105_v29, %v81_v21  ;;  %v87_v44 = vmul.f32 %v19_v30, %v19_v30  ;;  %v88_v48 = vmul.f32 %v20_v34, %v20_v34 }
   0x8   :  { %v29_v23 = vadd.f32 %v28_v17, %v16_v19  ;;  %v94_v41 = vadd.f32 %v93_v33, %v82_v24  ;;  %v89_v51 = vmul.f32 %v21_v38, %v21_v38  ;;  %v90_v54 = vmul.f32 %v22_v42, %v22_v42 }
   0x9   :  { %v42_v27 = vadd.f32 %v41_v20, %v17_v22  ;;  %v107_v45 = vadd.f32 %v106_v37, %v83_v28  ;;  %v91_v57 = vmul.f32 %v23_v46, %v23_v46  ;;  %v57_v9 = vunpack.c.0.s8 %v56_v63 }
   0xa   :  { %v30_v31 = vadd.f32 %v29_v23, %v18_v26  ;;  %v95_v49 = vadd.f32 %v94_v41, %v84_v32  ;;  %v59_v10 = vshrl.u32 %v58_v0, 7  ;;  %vm72_vm0 = vcmp.lt.s32.totalorder %v58_v0, 256 }
   0xb   :  { %v43_v35 = vadd.f32 %v42_v27, %v19_v30  ;;  %v108_v52 = vadd.f32 %v107_v45, %v85_v36 }
   0xc   :  { %v31_v39 = vadd.f32 %v30_v31, %v20_v34  ;;  %v96_v55 = vadd.f32 %v95_v49, %v86_v40  ;;  %v60_v19 = vsub.s32 %v57_v9, %v59_v10 }
   0xd   :  { %v44_v43 = vadd.f32 %v43_v35, %v21_v38  ;;  %v109_v58 = vadd.f32 %v108_v52, %v87_v44 }
   0xe   :  { %v32_v47 = vadd.f32 %v31_v39, %v22_v42  ;;  %v97_v60 = vadd.f32 %v96_v55, %v88_v48 }
   0xf   :  { %v45_v50 = vadd.f32 %v44_v43, %v23_v46  ;;  %v110_v1 = vadd.f32 %v109_v58, %v89_v51 }
  0x10   :  { %v33_v53 = vrot.slane %v32_v47, 4  ;;  %v98_v3 = vadd.f32 %v97_v60, %v90_v54 }
  0x11   :  { %v46_v56 = vrot.slane %v45_v50, 4  ;;  %v111_v5 = vadd.f32 %v110_v1, %v91_v57 }
  0x12   :  { %v34_v59 = vadd.f32 %v33_v53, %v32_v47  ;;  %v99_v7 = vrot.slane %v98_v3, 4 }
  0x13   :  { %v47_v61 = vadd.f32 %v46_v56, %v45_v50  ;;  %v112_v11 = vrot.slane %v111_v5, 4 }
  0x14   :  { %v35_v2 = vrot.slane %v34_v59, 2  ;;  %v100_v13 = vadd.f32 %v99_v7, %v98_v3 }
  0x15   :  { %v48_v4 = vrot.slane %v47_v61, 2  ;;  %v113_v15 = vadd.f32 %v112_v11, %v111_v5 }
  0x16   :  { %v36_v6 = vadd.f32 %v35_v2, %v34_v59  ;;  %v101_v17 = vrot.slane %v100_v13, 2 }
  0x17   :  { %v49_v8 = vadd.f32 %v48_v4, %v47_v61  ;;  %v114_v20 = vrot.slane %v113_v15, 2 }
  0x18   :  { %v37_v12 = vrot.slane %v36_v6, 1  ;;  %v102_v21 = vadd.f32 %v101_v17, %v100_v13 }
  0x19   :  { %v50_v14 = vrot.slane %v49_v8, 1  ;;  %v115_v23 = vadd.f32 %v114_v20, %v113_v15 }
  0x1a   :  { %v38_v16 = vadd.f32 %v37_v12, %v36_v6  ;;  %v103_v24 = vrot.slane %v102_v21, 1 }
  0x1b   :  { %v51_v18 = vadd.f32 %v50_v14, %v49_v8  ;;  %v116_v26 = vrot.slane %v115_v23, 1 }
  0x1c   :  { %v104_v27 = vadd.f32 %v103_v24, %v102_v21 }
  0x1d   :  { %v54_v22 = vcombine.low %v38_v16, %v51_v18  ;;  %v117_v29 = vadd.f32 %v116_v26, %v115_v23 }
  0x1f   :  { %v61_v25 = vrot.slane %v54_v22, %v60_v19  ;;  %v120_v30 = vcombine.low %v104_v27, %v117_v29 }
  0x21   :  { %v68_v28 = vrot.slane %v61_v25, %v60_v19  ;;  %v127_v31 = vrot.slane %v120_v30, %v60_v19 }
  0x23   :  { %74 = vst.msk [vmem:[%s218_s1] ss:$8 sm:$0x3] %vm72_vm0, %v68_v28  ;;  %v134_v32 = vrot.slane %v127_v31, %v60_v19 }
  0x25   :  { %143 = vst.msk [vmem:[%s218_s1 + $0x1] ss:$8 sm:$0x3] %vm72_vm0, %v134_v32 }

// kernel: generator_forward.25
= control target key start
LH: loop header
LB: loop body
LE: loop exit
PB: predicated region body
PF: predicated region fallthrough
CT: control target
= control target key end

     0   :  { %v32_v0 = vlaneseq  ;;  %s296_s1 = inlined_call_operand.vmem [shape: f32[1,256], index: 1, kind: input, shape index: {}]   ;;  %s297_s2 = inlined_call_operand.vmem [shape: f32[1,256], index: 2, kind: input, shape index: {}]   ;;  %s298_s0 = inlined_call_operand.vmem [shape: f32[64,256], index: 0, kind: input, shape index: {}]   ;;  %s299_s3 = inlined_call_operand.vmem [shape: bf16[64,256], index: 3, kind: output, shape index: {}]  }
   0x1   :  { %v30_v2 = vld [vmem:[%s296_s1] sm:$0x3]  ;;  %v15_v5 = vld [vmem:[%s298_s0 + $0x8] sm:$0xff]  ;;  %v16_v8 = vld [vmem:[%s298_s0 + $0x10] sm:$0xff] }
   0x2   :  { %v33_v1 = vshrl.u32 %v32_v0, 7  ;;  %v58_v3 = vld [vmem:[%s297_s2] sm:$0x3]  ;;  %v17_v9 = vld [vmem:[%s298_s0 + $0x18] sm:$0xff]  ;;  %v19_v15 = vld [vmem:[%s298_s0 + $0x28] sm:$0xff] }
   0x3   :  { %v14_v4 = vld [vmem:[%s298_s0] sm:$0xff]  ;;  %v20_v16 = vld [vmem:[%s298_s0 + $0x30] sm:$0xff]  ;;  %v21_v17 = vld [vmem:[%s298_s0 + $0x38] sm:$0xff] }
   0x4   :  { %v34_v6 = vsub.s32 0, %v33_v1  ;;  %v38_v7 = vsub.s32 1, %v33_v1  ;;  %v18_v10 = vld [vmem:[%s298_s0 + $0x20] sm:$0xff]  ;;  %v23_v35 = vld [vmem:[%s298_s0 + $0x48] sm:$0xff]  ;;  %v24_v40 = vld [vmem:[%s298_s0 + $0x50] sm:$0xff] }
   0x5   :  { %v22_v34 = vld [vmem:[%s298_s0 + $0x40] sm:$0xff]  ;;  %v25_v41 = vld [vmem:[%s298_s0 + $0x58] sm:$0xff]  ;;  %v27_v47 = vld [vmem:[%s298_s0 + $0x68] sm:$0xff] }
   0x6   :  { %v35_v11 = vrot.slane %v30_v2, %v34_v6  ;;  %v39_v12 = vrot.slane %v30_v2, %v38_v7  ;;  %v219_v13 = vrot.slane %v58_v3, %v34_v6  ;;  %v221_v14 = vrot.slane %v58_v3, %v38_v7  ;;  %v26_v46 = vld [vmem:[%s298_s0 + $0x60] sm:$0xff]  ;;  %v28_v52 = vld [vmem:[%s298_s0 + $0x70] sm:$0xff]  ;;  %v29_v53 = vld [vmem:[%s298_s0 + $0x78] sm:$0xff] }
   0x8   :  { %v42_v18 = vmul.f32 %v35_v11, %v14_v4  ;;  %v43_v19 = vmul.f32 %v39_v12, %v15_v5  ;;  %v44_v20 = vmul.f32 %v35_v11, %v16_v8  ;;  %v45_v21 = vmul.f32 %v39_v12, %v17_v9 }
   0x9   :  { %v46_v22 = vmul.f32 %v35_v11, %v18_v10  ;;  %v47_v23 = vmul.f32 %v39_v12, %v19_v15  ;;  %v48_v24 = vmul.f32 %v35_v11, %v20_v16  ;;  %v49_v25 = vmul.f32 %v39_v12, %v21_v17 }
   0xa   :  { %v70_v26 = vadd.f32 %v219_v13, %v42_v18  ;;  %v71_v27 = vadd.f32 %v221_v14, %v43_v19  ;;  %v72_v28 = vadd.f32 %v219_v13, %v44_v20  ;;  %v73_v29 = vadd.f32 %v221_v14, %v45_v21 }
   0xb   :  { %v74_v30 = vadd.f32 %v219_v13, %v46_v22  ;;  %v75_v31 = vadd.f32 %v221_v14, %v47_v23  ;;  %v76_v32 = vadd.f32 %v219_v13, %v48_v24  ;;  %v77_v33 = vadd.f32 %v221_v14, %v49_v25 }
   0xc   :  { %v86_v36 = vmax.f32 %v70_v26, 0.0  ;;  %v87_v37 = vmax.f32 %v71_v27, 0.0  ;;  %v88_v38 = vmax.f32 %v72_v28, 0.0  ;;  %v89_v39 = vmax.f32 %v73_v29, 0.0 }
   0xd   :  { %v90_v42 = vmax.f32 %v74_v30, 0.0  ;;  %v91_v43 = vmax.f32 %v75_v31, 0.0  ;;  %v92_v44 = vmax.f32 %v76_v32, 0.0  ;;  %v93_v45 = vmax.f32 %v77_v33, 0.0 }
   0xe   :  { %v170_v48 = vpack.c.bf16 %v87_v37, %v86_v36  ;;  %v171_v49 = vpack.c.bf16 %v89_v39, %v88_v38  ;;  %v50_v50 = vmul.f32 %v35_v11, %v22_v34  ;;  %v51_v51 = vmul.f32 %v39_v12, %v23_v35 }
   0xf   :  { %v172_v54 = vpack.c.bf16 %v91_v43, %v90_v42  ;;  %v173_v55 = vpack.c.bf16 %v93_v45, %v92_v44  ;;  %v52_v56 = vmul.f32 %v35_v11, %v24_v40  ;;  %v53_v57 = vmul.f32 %v39_v12, %v25_v41 }
  0x10   :  { %150 = vst [vmem:[%s299_s3] sm:$0xff] %v170_v48  ;;  %151 = vst [vmem:[%s299_s3 + $0x8] sm:$0xff] %v171_v49  ;;  %v78_v58 = vadd.f32 %v219_v13, %v50_v50  ;;  %v79_v59 = vadd.f32 %v221_v14, %v51_v51  ;;  %v54_v60 = vmul.f32 %v35_v11, %v26_v46 }
  0x11   :  { %v55_v61 = vmul.f32 %v39_v12, %v27_v47  ;;  %152 = vst [vmem:[%s299_s3 + $0x10] sm:$0xff] %v172_v54  ;;  %153 = vst [vmem:[%s299_s3 + $0x18] sm:$0xff] %v173_v55  ;;  %v80_v62 = vadd.f32 %v219_v13, %v52_v56  ;;  %v81_v63 = vadd.f32 %v221_v14, %v53_v57 }
  0x12   :  { %v56_v0 = vmul.f32 %v35_v11, %v28_v52  ;;  %v57_v1 = vmul.f32 %v39_v12, %v29_v53  ;;  %v94_v2 = vmax.f32 %v78_v58, 0.0  ;;  %v95_v3 = vmax.f32 %v79_v59, 0.0 }
  0x13   :  { %v82_v4 = vadd.f32 %v219_v13, %v54_v60  ;;  %v83_v5 = vadd.f32 %v221_v14, %v55_v61  ;;  %v96_v6 = vmax.f32 %v80_v62, 0.0  ;;  %v97_v7 = vmax.f32 %v81_v63, 0.0 }
  0x14   :  { %v84_v8 = vadd.f32 %v219_v13, %v56_v0  ;;  %v85_v9 = vadd.f32 %v221_v14, %v57_v1  ;;  %v174_v10 = vpack.c.bf16 %v95_v3, %v94_v2 }
  0x15   :  { %v98_v15 = vmax.f32 %v82_v4, 0.0  ;;  %v99_v16 = vmax.f32 %v83_v5, 0.0  ;;  %v175_v17 = vpack.c.bf16 %v97_v7, %v96_v6 }
  0x16   :  { %v100_v18 = vmax.f32 %v84_v8, 0.0  ;;  %v101_v19 = vmax.f32 %v85_v9, 0.0  ;;  %154 = vst [vmem:[%s299_s3 + $0x20] sm:$0xff] %v174_v10 }
  0x17   :  { %v176_v11 = vpack.c.bf16 %v99_v16, %v98_v15  ;;  %155 = vst [vmem:[%s299_s3 + $0x28] sm:$0xff] %v175_v17 }
  0x18   :  { %v177_v12 = vpack.c.bf16 %v101_v19, %v100_v18 }
  0x19   :  { %156 = vst [vmem:[%s299_s3 + $0x30] sm:$0xff] %v176_v11 }
  0x1a   :  { %157 = vst [vmem:[%s299_s3 + $0x38] sm:$0xff] %v177_v12 }

// kernel: generator_forward.26
= control target key start
LH: loop header
LB: loop body
LE: loop exit
PB: predicated region body
PF: predicated region fallthrough
CT: control target
= control target key end

     0   :  { %s3107_s9 = smov 0   ;;  %s3330_s0 = inlined_call_operand.vmem [shape: bf16[2048,8], index: 0, kind: input, shape index: {}]   ;;  %s3331_s1 = inlined_call_operand.vmem [shape: bf16[8,128], index: 1, kind: input, shape index: {}]   ;;  %s3332_s2 = inlined_call_operand.vmem [shape: bf16[2048,128], index: 2, kind: output, shape index: {}]  }
   0x1 LB: > { %s2035_s10 = sadd.s32 4294967295, %s3090_s9   ;;  %p2039_p0 = scmp.ge.s32.totalorder %s3090_s9, 1  ;;  %s3090_s9 = sphi %s3107_s9, %s12_s9  }
   0x2   : > { %p113_p1 = scmp.lt.s32.totalorder %s3090_s9, 3 }
   0x4   : > { %p114_p2 = pnand %p2039_p0, %p113_p1 }
   0x5   : > { %v276_v0 = vld [vmem:[%s3331_s1] sm:$0xf] (!%p114_p2)  ;;  %vm790_vm0 = vcmask (!%p114_p2), 1043456   ;;  %s2040_s13 = sshll.u32 (!%p114_p2), %s2035_s10, 7  ;;  %vm597_vm1 = vcmask (!%p114_p2), 64512  }
   0x6   : > { %117 = sbr.rel (%p114_p2) target bundleno = 357 (0x165), region = 28  ;;  %3010 = vmatprep.subr.msk.bf16.mxu0 (!%p114_p2), %vm790_vm0, %v276_v0  ;;  %3011 = vmatprep.subr.msk.bf16.mxu1 (!%p114_p2), %vm790_vm0, %v276_v0  ;;  %v792_v1 = vsel (!%p114_p2), %vm790_vm0, %v276_v0, 0  ;;  %p136_p3 = scmp.lt.s32.totalorder (!%p114_p2), %s2040_s13, 255 }
   0x7   : > { %2879 = vmatpush3.bf16.msra.mxu0 (!%p114_p2), %v792_v1  ;;  %3009 = vmatpush3.bf16.msra.mxu1 (!%p114_p2), %v792_v1 }
   0xd   : > { %s3334_s13 = smov (!%p136_p3, %s2040_s13), 255 }
   0xe   : > { %s2041_s14 = sshll.u32 %s3334_s13, 2 }
   0xf   : > { %s3126_s17 = scalar_lea.vmem %s3330_s0, %s2041_s14  ;;  %s3261_s20 = scalar_lea.vmem %s3332_s2, %s2041_s14 }
  0x10   : > { %v3020_v2 = vld [vmem:[%s3126_s17] sm:$0xff]   ;;  %v3022_v4 = vld [vmem:[%s3126_s17 + $0x8] sm:$0xff]   ;;  %v3024_v6 = vld [vmem:[%s3126_s17 + $0x10] sm:$0xff]  }
  0x11   : > { %v3021_v3 = vld [vmem:[%s3126_s17 + $0x100] sm:$0xff]   ;;  %2880 = vmatprep.mubr.msk.bf16.mxu0 %vm597_vm1, %v3020_v2  ;;  %v3023_v5 = vld [vmem:[%s3126_s17 + $0x108] sm:$0xff]   ;;  %v3025_v7 = vld [vmem:[%s3126_s17 + $0x110] sm:$0xff]  }
  0x12   : > { %2944 = vmatprep.mubr.msk.bf16.mxu1 %vm597_vm1, %v3021_v3  ;;  %2881 = vmatmul.mubr.msk.bf16.vlgmr.msra.gmra.mrb[0].mxu0 %vm597_vm1, %v3022_v4  ;;  %v3026_v8 = vld [vmem:[%s3126_s17 + $0x18] sm:$0xff]   ;;  %v3028_v10 = vld [vmem:[%s3126_s17 + $0x20] sm:$0xff]   ;;  %v3030_v12 = vld [vmem:[%s3126_s17 + $0x28] sm:$0xff]  }
  0x13   : > { %2945 = vmatmul.mubr.msk.bf16.vlgmr.msra.gmra.mrb[0].mxu1 %vm597_vm1, %v3023_v5  ;;  %2884 = vmatprep.mubr.msk.bf16.mxu0 %vm597_vm1, %v3024_v6  ;;  %v3027_v9 = vld [vmem:[%s3126_s17 + $0x118] sm:$0xff]   ;;  %v3029_v11 = vld [vmem:[%s3126_s17 + $0x120] sm:$0xff]   ;;  %v3031_v13 = vld [vmem:[%s3126_s17 + $0x128] sm:$0xff]  }
  0x14   : > { %2948 = vmatprep.mubr.msk.bf16.mxu1 %vm597_vm1, %v3025_v7  ;;  %v3032_v14 = vld [vmem:[%s3126_s17 + $0x30] sm:$0xff]   ;;  %v3034_v16 = vld [vmem:[%s3126_s17 + $0x38] sm:$0xff]   ;;  %v3036_v18 = vld [vmem:[%s3126_s17 + $0x40] sm:$0xff]  }
  0x15   : > { %v3033_v15 = vld [vmem:[%s3126_s17 + $0x130] sm:$0xff]   ;;  %v3035_v17 = vld [vmem:[%s3126_s17 + $0x138] sm:$0xff]   ;;  %v3037_v19 = vld [vmem:[%s3126_s17 + $0x140] sm:$0xff]  }
  0x16   : > { %v3038_v20 = vld [vmem:[%s3126_s17 + $0x48] sm:$0xff]   ;;  %v3040_v22 = vld [vmem:[%s3126_s17 + $0x50] sm:$0xff]   ;;  %v3042_v24 = vld [vmem:[%s3126_s17 + $0x58] sm:$0xff]  }
  0x17   : > { %v3039_v21 = vld [vmem:[%s3126_s17 + $0x148] sm:$0xff]   ;;  %v3041_v23 = vld [vmem:[%s3126_s17 + $0x150] sm:$0xff]   ;;  %v3043_v25 = vld [vmem:[%s3126_s17 + $0x158] sm:$0xff]  }
  0x18   : > { %v3044_v26 = vld [vmem:[%s3126_s17 + $0x60] sm:$0xff]   ;;  %v3046_v28 = vld [vmem:[%s3126_s17 + $0x68] sm:$0xff]   ;;  %v3048_v30 = vld [vmem:[%s3126_s17 + $0x70] sm:$0xff]  }
  0x19   : > { %v3045_v27 = vld [vmem:[%s3126_s17 + $0x160] sm:$0xff]   ;;  %v3047_v29 = vld [vmem:[%s3126_s17 + $0x168] sm:$0xff]   ;;  %v3049_v31 = vld [vmem:[%s3126_s17 + $0x170] sm:$0xff]  }
  0x1a   : > { %2885 = vmatmul.mubr.msk.bf16.gmra.mrb[4].mxu0 %vm597_vm1, %v3026_v8  ;;  %v3050_v32 = vld [vmem:[%s3126_s17 + $0x78] sm:$0xff]   ;;  %v3052_v34 = vld [vmem:[%s3126_s17 + $0x80] sm:$0xff]   ;;  %v3054_v36 = vld [vmem:[%s3126_s17 + $0x88] sm:$0xff]  }
  0x1b   : > { %2949 = vmatmul.mubr.msk.bf16.gmra.mrb[4].mxu1 %vm597_vm1, %v3027_v9  ;;  %2888 = vmatprep.mubr.msk.bf16.mxu0 %vm597_vm1, %v3028_v10  ;;  %v3051_v33 = vld [vmem:[%s3126_s17 + $0x178] sm:$0xff]   ;;  %v3053_v35 = vld [vmem:[%s3126_s17 + $0x180] sm:$0xff]   ;;  %v3055_v37 = vld [vmem:[%s3126_s17 + $0x188] sm:$0xff]  }
  0x1c   : > { %2952 = vmatprep.mubr.msk.bf16.mxu1 %vm597_vm1, %v3029_v11  ;;  %v3056_v38 = vld [vmem:[%s3126_s17 + $0x90] sm:$0xff]   ;;  %v3058_v40 = vld [vmem:[%s3126_s17 + $0x98] sm:$0xff]   ;;  %v3060_v42 = vld [vmem:[%s3126_s17 + $0xa0] sm:$0xff]  }
  0x1d   : > { %v3057_v39 = vld [vmem:[%s3126_s17 + $0x190] sm:$0xff]   ;;  %v3059_v41 = vld [vmem:[%s3126_s17 + $0x198] sm:$0xff]   ;;  %v3061_v43 = vld [vmem:[%s3126_s17 + $0x1a0] sm:$0xff]  }
  0x1e   : > { %v3062_v44 = vld [vmem:[%s3126_s17 + $0xa8] sm:$0xff]   ;;  %v3064_v46 = vld [vmem:[%s3126_s17 + $0xb0] sm:$0xff]   ;;  %v3066_v48 = vld [vmem:[%s3126_s17 + $0xb8] sm:$0xff]  }
  0x1f   : > { %v3063_v45 = vld [vmem:[%s3126_s17 + $0x1a8] sm:$0xff]   ;;  %v3065_v47 = vld [vmem:[%s3126_s17 + $0x1b0] sm:$0xff]   ;;  %v3067_v49 = vld [vmem:[%s3126_s17 + $0x1b8] sm:$0xff]  }
  0x20   : > { %v3068_v50 = vld [vmem:[%s3126_s17 + $0xc0] sm:$0xff]   ;;  %v3070_v52 = vld [vmem:[%s3126_s17 + $0xc8] sm:$0xff]   ;;  %v3072_v54 = vld [vmem:[%s3126_s17 + $0xd0] sm:$0xff]  }
  0x21   : > { %v3069_v51 = vld [vmem:[%s3126_s17 + $0x1c0] sm:$0xff]   ;;  %v3071_v53 = vld [vmem:[%s3126_s17 + $0x1c8] sm:$0xff]   ;;  %v3073_v55 = vld [vmem:[%s3126_s17 + $0x1d0] sm:$0xff]  }
  0x22   : > { %2889 = vmatmul.mubr.msk.bf16.gmra.mrb[8].mxu0 %vm597_vm1, %v3030_v12  ;;  %v3074_v56 = vld [vmem:[%s3126_s17 + $0xd8] sm:$0xff]   ;;  %v3076_v58 = vld [vmem:[%s3126_s17 + $0xe0] sm:$0xff]   ;;  %v3078_v60 = vld [vmem:[%s3126_s17 + $0xe8] sm:$0xff]  }
  0x23   : > { %2953 = vmatmul.mubr.msk.bf16.gmra.mrb[8].mxu1 %vm597_vm1, %v3031_v13  ;;  %2892 = vmatprep.mubr.msk.bf16.mxu0 %vm597_vm1, %v3032_v14  ;;  %v3075_v57 = vld [vmem:[%s3126_s17 + $0x1d8] sm:$0xff]   ;;  %v3077_v59 = vld [vmem:[%s3126_s17 + $0x1e0] sm:$0xff]   ;;  %v3079_v61 = vld [vmem:[%s3126_s17 + $0x1e8] sm:$0xff]  }
  0x24   : > { %2956 = vmatprep.mubr.msk.bf16.mxu1 %vm597_vm1, %v3033_v15  ;;  %v3080_v62 = vld [vmem:[%s3126_s17 + $0xf0] sm:$0xff]   ;;  %v3082_v0 = vld [vmem:[%s3126_s17 + $0xf8] sm:$0xff]  }
  0x25   : > { %v3081_v63 = vld [vmem:[%s3126_s17 + $0x1f0] sm:$0xff]   ;;  %v3083_v1 = vld [vmem:[%s3126_s17 + $0x1f8] sm:$0xff]  }
  0x2a   : > { %2893 = vmatmul.mubr.msk.bf16.gmra.mrb[12].mxu0 %vm597_vm1, %v3034_v16 }
  0x2b   : > { %2957 = vmatmul.mubr.msk.bf16.gmra.mrb[12].mxu1 %vm597_vm1, %v3035_v17  ;;  %2896 = vmatprep.mubr.msk.bf16.mxu0 %vm597_vm1, %v3036_v18 }
  0x2c   : > { %2960 = vmatprep.mubr.msk.bf16.mxu1 %vm597_vm1, %v3037_v19 }
  0x32   : > { %2897 = vmatmul.mubr.msk.bf16.gmra.mrb[16].mxu0 %vm597_vm1, %v3038_v20 }
  0x33   : > { %2961 = vmatmul.mubr.msk.bf16.gmra.mrb[16].mxu1 %vm597_vm1, %v3039_v21  ;;  %2900 = vmatprep.mubr.msk.bf16.mxu0 %vm597_vm1, %v3040_v22 }
  0x34   : > { %2964 = vmatprep.mubr.msk.bf16.mxu1 %vm597_vm1, %v3041_v23 }
  0x3a   : > { %2901 = vmatmul.mubr.msk.bf16.gmra.mrb[20].mxu0 %vm597_vm1, %v3042_v24 }
  0x3b   : > { %2965 = vmatmul.mubr.msk.bf16.gmra.mrb[20].mxu1 %vm597_vm1, %v3043_v25  ;;  %2904 = vmatprep.mubr.msk.bf16.mxu0 %vm597_vm1, %v3044_v26 }
  0x3c   : > { %2968 = vmatprep.mubr.msk.bf16.mxu1 %vm597_vm1, %v3045_v27 }
  0x42   : > { %2905 = vmatmul.mubr.msk.bf16.gmra.mrb[24].mxu0 %vm597_vm1, %v3046_v28 }
  0x43   : > { %2969 = vmatmul.mubr.msk.bf16.gmra.mrb[24].mxu1 %vm597_vm1, %v3047_v29  ;;  %2908 = vmatprep.mubr.msk.bf16.mxu0 %vm597_vm1, %v3048_v30 }
  0x44   : > { %2972 = vmatprep.mubr.msk.bf16.mxu1 %vm597_vm1, %v3049_v31 }
  0x4a   : > { %2909 = vmatmul.mubr.msk.bf16.gmra.mrb[28].mxu0 %vm597_vm1, %v3050_v32 }
  0x4b   : > { %2973 = vmatmul.mubr.msk.bf16.gmra.mrb[28].mxu1 %vm597_vm1, %v3051_v33  ;;  %2912 = vmatprep.mubr.msk.bf16.mxu0 %vm597_vm1, %v3052_v34 }
  0x4c   : > { %2976 = vmatprep.mubr.msk.bf16.mxu1 %vm597_vm1, %v3053_v35 }
  0x52   : > { %2913 = vmatmul.mubr.msk.bf16.gmra.mrb[32].mxu0 %vm597_vm1, %v3054_v36 }
  0x53   : > { %2977 = vmatmul.mubr.msk.bf16.gmra.mrb[32].mxu1 %vm597_vm1, %v3055_v37  ;;  %2916 = vmatprep.mubr.msk.bf16.mxu0 %vm597_vm1, %v3056_v38 }
  0x54   : > { %2980 = vmatprep.mubr.msk.bf16.mxu1 %vm597_vm1, %v3057_v39 }
  0x5a   : > { %2917 = vmatmul.mubr.msk.bf16.gmra.mrb[36].mxu0 %vm597_vm1, %v3058_v40 }
  0x5b   : > { %2981 = vmatmul.mubr.msk.bf16.gmra.mrb[36].mxu1 %vm597_vm1, %v3059_v41  ;;  %2920 = vmatprep.mubr.msk.bf16.mxu0 %vm597_vm1, %v3060_v42 }
  0x5c   : > { %2984 = vmatprep.mubr.msk.bf16.mxu1 %vm597_vm1, %v3061_v43 }
  0x62   : > { %2921 = vmatmul.mubr.msk.bf16.gmra.mrb[40].mxu0 %vm597_vm1, %v3062_v44 }
  0x63   : > { %2985 = vmatmul.mubr.msk.bf16.gmra.mrb[40].mxu1 %vm597_vm1, %v3063_v45  ;;  %2924 = vmatprep.mubr.msk.bf16.mxu0 %vm597_vm1, %v3064_v46 }
  0x64   : > { %2988 = vmatprep.mubr.msk.bf16.mxu1 %vm597_vm1, %v3065_v47 }
  0x6a   : > { %2925 = vmatmul.mubr.msk.bf16.gmra.mrb[44].mxu0 %vm597_vm1, %v3066_v48 }
  0x6b   : > { %2989 = vmatmul.mubr.msk.bf16.gmra.mrb[44].mxu1 %vm597_vm1, %v3067_v49  ;;  %2928 = vmatprep.mubr.msk.bf16.mxu0 %vm597_vm1, %v3068_v50 }
  0x6c   : > { %2992 = vmatprep.mubr.msk.bf16.mxu1 %vm597_vm1, %v3069_v51 }
  0x72   : > { %2929 = vmatmul.mubr.msk.bf16.gmra.mrb[48].mxu0 %vm597_vm1, %v3070_v52 }
  0x73   : > { %2993 = vmatmul.mubr.msk.bf16.gmra.mrb[48].mxu1 %vm597_vm1, %v3071_v53  ;;  %2932 = vmatprep.mubr.msk.bf16.mxu0 %vm597_vm1, %v3072_v54 }
  0x74   : > { %2996 = vmatprep.mubr.msk.bf16.mxu1 %vm597_vm1, %v3073_v55 }
  0x7a   : > { %2933 = vmatmul.mubr.msk.bf16.gmra.mrb[52].mxu0 %vm597_vm1, %v3074_v56 }
  0x7b   : > { %2997 = vmatmul.mubr.msk.bf16.gmra.mrb[52].mxu1 %vm597_vm1, %v3075_v57  ;;  %2936 = vmatprep.mubr.msk.bf16.mxu0 %vm597_vm1, %v3076_v58 }
  0x7c   : > { %3000 = vmatprep.mubr.msk.bf16.mxu1 %vm597_vm1, %v3077_v59 }
  0x82   : > { %2937 = vmatmul.mubr.msk.bf16.gmra.mrb[56].mxu0 %vm597_vm1, %v3078_v60 }
  0x83   : > { %3001 = vmatmul.mubr.msk.bf16.gmra.mrb[56].mxu1 %vm597_vm1, %v3079_v61  ;;  %2940 = vmatprep.mubr.msk.bf16.mxu0 %vm597_vm1, %v3080_v62 }
  0x84   : > { %3004 = vmatprep.mubr.msk.bf16.mxu1 %vm597_vm1, %v3081_v63 }
  0x8a   : > { %2941 = vmatmul.mubr.msk.bf16.gmra.mrb[60].mxu0 %vm597_vm1, %v3082_v0 }
  0x8b   : > { %3005 = vmatmul.mubr.msk.bf16.gmra.mrb[60].mxu1 %vm597_vm1, %v3083_v1 }
  0xe5   : > { %v2882_v2 = vpop.f32.mrb[0].mxu0 }
  0xe6   : > { %v2946_v3 = vpop.f32.mrb[0].mxu1  ;;  %v828_v4 = vpop.f32.mrb[1].mxu0 }
  0xe7   : > { %v1084_v5 = vpop.f32.mrb[1].mxu1  ;;  %v2883_v6 = vpop.f32.mrb[2].mxu0 }
  0xe8   : > { %v2438_v7 = vpack.c.bf16 %v2883_v6, %v2882_v2  ;;  %v2947_v8 = vpop.f32.mrb[2].mxu1  ;;  %v831_v9 = vpop.f32.mrb[3].mxu0 }
  0xe9   : > { %v2598_v10 = vpack.c.bf16 %v2947_v8, %v2946_v3  ;;  %v2433_v11 = vpack.c.bf16 %v831_v9, %v828_v4  ;;  %v1087_v12 = vpop.f32.mrb[3].mxu1 }
  0xea   : > { %2750 = vst [vmem:[%s3261_s20 + $0x8] sm:$0xff] %v2438_v7   ;;  %v2593_v13 = vpack.c.bf16 %v1087_v12, %v1084_v5 }
  0xeb   : > { %2782 = vst [vmem:[%s3261_s20 + $0x108] sm:$0xff] %v2598_v10   ;;  %2434 = vst [vmem:[%s3261_s20] sm:$0xff] %v2433_v11  }
  0xec   : > { %2781 = vst [vmem:[%s3261_s20 + $0x100] sm:$0xff] %v2593_v13  }
  0xed   : > { %v2886_v14 = vpop.f32.mrb[4].mxu0 }
  0xee   : > { %v2950_v15 = vpop.f32.mrb[4].mxu1  ;;  %v844_v16 = vpop.f32.mrb[5].mxu0 }
  0xef   : > { %v1100_v17 = vpop.f32.mrb[5].mxu1  ;;  %v2887_v18 = vpop.f32.mrb[6].mxu0 }
  0xf0   : > { %v2448_v19 = vpack.c.bf16 %v2887_v18, %v2886_v14  ;;  %v2951_v20 = vpop.f32.mrb[6].mxu1  ;;  %v847_v21 = vpop.f32.mrb[7].mxu0 }
  0xf1   : > { %v2608_v22 = vpack.c.bf16 %v2951_v20, %v2950_v15  ;;  %v2443_v23 = vpack.c.bf16 %v847_v21, %v844_v16  ;;  %v1103_v24 = vpop.f32.mrb[7].mxu1 }
  0xf2   : > { %2752 = vst [vmem:[%s3261_s20 + $0x18] sm:$0xff] %v2448_v19   ;;  %v2603_v25 = vpack.c.bf16 %v1103_v24, %v1100_v17 }
  0xf3   : > { %2784 = vst [vmem:[%s3261_s20 + $0x118] sm:$0xff] %v2608_v22   ;;  %2751 = vst [vmem:[%s3261_s20 + $0x10] sm:$0xff] %v2443_v23  }
  0xf4   : > { %2783 = vst [vmem:[%s3261_s20 + $0x110] sm:$0xff] %v2603_v25  }
  0xf5   : > { %v2890_v26 = vpop.f32.mrb[8].mxu0 }
  0xf6   : > { %v2954_v27 = vpop.f32.mrb[8].mxu1  ;;  %v860_v28 = vpop.f32.mrb[9].mxu0 }
  0xf7   : > { %v1116_v29 = vpop.f32.mrb[9].mxu1  ;;  %v2891_v30 = vpop.f32.mrb[10].mxu0 }
  0xf8   : > { %v2458_v31 = vpack.c.bf16 %v2891_v30, %v2890_v26  ;;  %v2955_v32 = vpop.f32.mrb[10].mxu1  ;;  %v863_v33 = vpop.f32.mrb[11].mxu0 }
  0xf9   : > { %v2618_v34 = vpack.c.bf16 %v2955_v32, %v2954_v27  ;;  %v2453_v35 = vpack.c.bf16 %v863_v33, %v860_v28  ;;  %v1119_v36 = vpop.f32.mrb[11].mxu1 }
  0xfa   : > { %2754 = vst [vmem:[%s3261_s20 + $0x28] sm:$0xff] %v2458_v31   ;;  %v2613_v37 = vpack.c.bf16 %v1119_v36, %v1116_v29 }
  0xfb   : > { %2786 = vst [vmem:[%s3261_s20 + $0x128] sm:$0xff] %v2618_v34   ;;  %2753 = vst [vmem:[%s3261_s20 + $0x20] sm:$0xff] %v2453_v35  }
  0xfc   : > { %2785 = vst [vmem:[%s3261_s20 + $0x120] sm:$0xff] %v2613_v37  }
  0xfd   : > { %v2894_v38 = vpop.f32.mrb[12].mxu0 }
  0xfe   : > { %v2958_v39 = vpop.f32.mrb[12].mxu1  ;;  %v876_v40 = vpop.f32.mrb[13].mxu0 }
  0xff   : > { %v1132_v41 = vpop.f32.mrb[13].mxu1  ;;  %v2895_v42 = vpop.f32.mrb[14].mxu0 }
 0x100   : > { %v2468_v43 = vpack.c.bf16 %v2895_v42, %v2894_v38  ;;  %v2959_v44 = vpop.f32.mrb[14].mxu1  ;;  %v879_v45 = vpop.f32.mrb[15].mxu0 }
 0x101   : > { %v2628_v46 = vpack.c.bf16 %v2959_v44, %v2958_v39  ;;  %v2463_v47 = vpack.c.bf16 %v879_v45, %v876_v40  ;;  %v1135_v48 = vpop.f32.mrb[15].mxu1 }
 0x102   : > { %2756 = vst [vmem:[%s3261_s20 + $0x38] sm:$0xff] %v2468_v43   ;;  %v2623_v49 = vpack.c.bf16 %v1135_v48, %v1132_v41 }
 0x103   : > { %2788 = vst [vmem:[%s3261_s20 + $0x138] sm:$0xff] %v2628_v46   ;;  %2755 = vst [vmem:[%s3261_s20 + $0x30] sm:$0xff] %v2463_v47  }
 0x104   : > { %2787 = vst [vmem:[%s3261_s20 + $0x130] sm:$0xff] %v2623_v49  }
 0x105   : > { %v2898_v50 = vpop.f32.mrb[16].mxu0 }
 0x106   : > { %v2962_v51 = vpop.f32.mrb[16].mxu1  ;;  %v892_v52 = vpop.f32.mrb[17].mxu0 }
 0x107   : > { %v1148_v53 = vpop.f32.mrb[17].mxu1  ;;  %v2899_v54 = vpop.f32.mrb[18].mxu0 }
 0x108   : > { %v2478_v55 = vpack.c.bf16 %v2899_v54, %v2898_v50  ;;  %v2963_v56 = vpop.f32.mrb[18].mxu1  ;;  %v895_v57 = vpop.f32.mrb[19].mxu0 }
 0x109   : > { %v2638_v58 = vpack.c.bf16 %v2963_v56, %v2962_v51  ;;  %v2473_v59 = vpack.c.bf16 %v895_v57, %v892_v52  ;;  %v1151_v60 = vpop.f32.mrb[19].mxu1 }
 0x10a   : > { %2758 = vst [vmem:[%s3261_s20 + $0x48] sm:$0xff] %v2478_v55   ;;  %v2633_v61 = vpack.c.bf16 %v1151_v60, %v1148_v53 }
 0x10b   : > { %2790 = vst [vmem:[%s3261_s20 + $0x148] sm:$0xff] %v2638_v58   ;;  %2757 = vst [vmem:[%s3261_s20 + $0x40] sm:$0xff] %v2473_v59  }
 0x10c   : > { %2789 = vst [vmem:[%s3261_s20 + $0x140] sm:$0xff] %v2633_v61  }
 0x10d   : > { %v2902_v62 = vpop.f32.mrb[20].mxu0 }
 0x10e   : > { %v2966_v63 = vpop.f32.mrb[20].mxu1  ;;  %v908_v0 = vpop.f32.mrb[21].mxu0 }
 0x10f   : > { %v1164_v1 = vpop.f32.mrb[21].mxu1  ;;  %v2903_v2 = vpop.f32.mrb[22].mxu0 }
 0x110   : > { %v2488_v3 = vpack.c.bf16 %v2903_v2, %v2902_v62  ;;  %v2967_v4 = vpop.f32.mrb[22].mxu1  ;;  %v911_v5 = vpop.f32.mrb[23].mxu0 }
 0x111   : > { %v2648_v6 = vpack.c.bf16 %v2967_v4, %v2966_v63  ;;  %v2483_v7 = vpack.c.bf16 %v911_v5, %v908_v0  ;;  %v1167_v8 = vpop.f32.mrb[23].mxu1 }
 0x112   : > { %2760 = vst [vmem:[%s3261_s20 + $0x58] sm:$0xff] %v2488_v3   ;;  %v2643_v9 = vpack.c.bf16 %v1167_v8, %v1164_v1 }
 0x113   : > { %2792 = vst [vmem:[%s3261_s20 + $0x158] sm:$0xff] %v2648_v6   ;;  %2759 = vst [vmem:[%s3261_s20 + $0x50] sm:$0xff] %v2483_v7  }
 0x114   : > { %2791 = vst [vmem:[%s3261_s20 + $0x150] sm:$0xff] %v2643_v9  }
 0x115   : > { %v2906_v10 = vpop.f32.mrb[24].mxu0 }
 0x116   : > { %v2970_v11 = vpop.f32.mrb[24].mxu1  ;;  %v924_v12 = vpop.f32.mrb[25].mxu0 }
 0x117   : > { %v1180_v13 = vpop.f32.mrb[25].mxu1  ;;  %v2907_v14 = vpop.f32.mrb[26].mxu0 }
 0x118   : > { %v2498_v15 = vpack.c.bf16 %v2907_v14, %v2906_v10  ;;  %v2971_v16 = vpop.f32.mrb[26].mxu1  ;;  %v927_v17 = vpop.f32.mrb[27].mxu0 }
 0x119   : > { %v2658_v18 = vpack.c.bf16 %v2971_v16, %v2970_v11  ;;  %v2493_v19 = vpack.c.bf16 %v927_v17, %v924_v12  ;;  %v1183_v20 = vpop.f32.mrb[27].mxu1 }
 0x11a   : > { %2762 = vst [vmem:[%s3261_s20 + $0x68] sm:$0xff] %v2498_v15   ;;  %v2653_v21 = vpack.c.bf16 %v1183_v20, %v1180_v13 }
 0x11b   : > { %2794 = vst [vmem:[%s3261_s20 + $0x168] sm:$0xff] %v2658_v18   ;;  %2761 = vst [vmem:[%s3261_s20 + $0x60] sm:$0xff] %v2493_v19  }
 0x11c   : > { %2793 = vst [vmem:[%s3261_s20 + $0x160] sm:$0xff] %v2653_v21  }
 0x11d   : > { %v2910_v22 = vpop.f32.mrb[28].mxu0 }
 0x11e   : > { %v2974_v23 = vpop.f32.mrb[28].mxu1  ;;  %v940_v24 = vpop.f32.mrb[29].mxu0 }
 0x11f   : > { %v1196_v25 = vpop.f32.mrb[29].mxu1  ;;  %v2911_v26 = vpop.f32.mrb[30].mxu0 }
 0x120   : > { %v2508_v27 = vpack.c.bf16 %v2911_v26, %v2910_v22  ;;  %v2975_v28 = vpop.f32.mrb[30].mxu1  ;;  %v943_v29 = vpop.f32.mrb[31].mxu0 }
 0x121   : > { %v2668_v30 = vpack.c.bf16 %v2975_v28, %v2974_v23  ;;  %v2503_v31 = vpack.c.bf16 %v943_v29, %v940_v24  ;;  %v1199_v32 = vpop.f32.mrb[31].mxu1 }
 0x122   : > { %2764 = vst [vmem:[%s3261_s20 + $0x78] sm:$0xff] %v2508_v27   ;;  %v2663_v33 = vpack.c.bf16 %v1199_v32, %v1196_v25 }
 0x123   : > { %2796 = vst [vmem:[%s3261_s20 + $0x178] sm:$0xff] %v2668_v30   ;;  %2763 = vst [vmem:[%s3261_s20 + $0x70] sm:$0xff] %v2503_v31  }
 0x124   : > { %2795 = vst [vmem:[%s3261_s20 + $0x170] sm:$0xff] %v2663_v33  }
 0x125   : > { %v2914_v34 = vpop.f32.mrb[32].mxu0 }
 0x126   : > { %v2978_v35 = vpop.f32.mrb[32].mxu1  ;;  %v956_v36 = vpop.f32.mrb[33].mxu0 }
 0x127   : > { %v1212_v37 = vpop.f32.mrb[33].mxu1  ;;  %v2915_v38 = vpop.f32.mrb[34].mxu0 }
 0x128   : > { %v2518_v39 = vpack.c.bf16 %v2915_v38, %v2914_v34  ;;  %v2979_v40 = vpop.f32.mrb[34].mxu1  ;;  %v959_v41 = vpop.f32.mrb[35].mxu0 }
 0x129   : > { %v2678_v42 = vpack.c.bf16 %v2979_v40, %v2978_v35  ;;  %v2513_v43 = vpack.c.bf16 %v959_v41, %v956_v36  ;;  %v1215_v44 = vpop.f32.mrb[35].mxu1 }
 0x12a   : > { %2766 = vst [vmem:[%s3261_s20 + $0x88] sm:$0xff] %v2518_v39   ;;  %v2673_v45 = vpack.c.bf16 %v1215_v44, %v1212_v37 }
 0x12b   : > { %2798 = vst [vmem:[%s3261_s20 + $0x188] sm:$0xff] %v2678_v42   ;;  %2765 = vst [vmem:[%s3261_s20 + $0x80] sm:$0xff] %v2513_v43  }
 0x12c   : > { %2797 = vst [vmem:[%s3261_s20 + $0x180] sm:$0xff] %v2673_v45  }
 0x12d   : > { %v2918_v46 = vpop.f32.mrb[36].mxu0 }
 0x12e   : > { %v2982_v47 = vpop.f32.mrb[36].mxu1  ;;  %v972_v48 = vpop.f32.mrb[37].mxu0 }
 0x12f   : > { %v1228_v49 = vpop.f32.mrb[37].mxu1  ;;  %v2919_v50 = vpop.f32.mrb[38].mxu0 }
 0x130   : > { %v2528_v51 = vpack.c.bf16 %v2919_v50, %v2918_v46  ;;  %v2983_v52 = vpop.f32.mrb[38].mxu1  ;;  %v975_v53 = vpop.f32.mrb[39].mxu0 }
 0x131   : > { %v2688_v54 = vpack.c.bf16 %v2983_v52, %v2982_v47  ;;  %v2523_v55 = vpack.c.bf16 %v975_v53, %v972_v48  ;;  %v1231_v56 = vpop.f32.mrb[39].mxu1 }
 0x132   : > { %2768 = vst [vmem:[%s3261_s20 + $0x98] sm:$0xff] %v2528_v51   ;;  %v2683_v57 = vpack.c.bf16 %v1231_v56, %v1228_v49 }
 0x133   : > { %2800 = vst [vmem:[%s3261_s20 + $0x198] sm:$0xff] %v2688_v54   ;;  %2767 = vst [vmem:[%s3261_s20 + $0x90] sm:$0xff] %v2523_v55  }
 0x134   : > { %2799 = vst [vmem:[%s3261_s20 + $0x190] sm:$0xff] %v2683_v57  }
 0x135   : > { %v2922_v58 = vpop.f32.mrb[40].mxu0 }
 0x136   : > { %v2986_v59 = vpop.f32.mrb[40].mxu1  ;;  %v988_v60 = vpop.f32.mrb[41].mxu0 }
 0x137   : > { %v1244_v61 = vpop.f32.mrb[41].mxu1  ;;  %v2923_v62 = vpop.f32.mrb[42].mxu0 }
 0x138   : > { %v2538_v63 = vpack.c.bf16 %v2923_v62, %v2922_v58  ;;  %v2987_v0 = vpop.f32.mrb[42].mxu1  ;;  %v991_v1 = vpop.f32.mrb[43].mxu0 }
 0x139   : > { %v2698_v2 = vpack.c.bf16 %v2987_v0, %v2986_v59  ;;  %v2533_v3 = vpack.c.bf16 %v991_v1, %v988_v60  ;;  %v1247_v4 = vpop.f32.mrb[43].mxu1 }
 0x13a   : > { %2770 = vst [vmem:[%s3261_s20 + $0xa8] sm:$0xff] %v2538_v63   ;;  %v2693_v5 = vpack.c.bf16 %v1247_v4, %v1244_v61 }
 0x13b   : > { %2802 = vst [vmem:[%s3261_s20 + $0x1a8] sm:$0xff] %v2698_v2   ;;  %2769 = vst [vmem:[%s3261_s20 + $0xa0] sm:$0xff] %v2533_v3  }
 0x13c   : > { %2801 = vst [vmem:[%s3261_s20 + $0x1a0] sm:$0xff] %v2693_v5  }
 0x13d   : > { %v2926_v6 = vpop.f32.mrb[44].mxu0 }
 0x13e   : > { %v2990_v7 = vpop.f32.mrb[44].mxu1  ;;  %v1004_v8 = vpop.f32.mrb[45].mxu0 }
 0x13f   : > { %v1260_v9 = vpop.f32.mrb[45].mxu1  ;;  %v2927_v10 = vpop.f32.mrb[46].mxu0 }
 0x140   : > { %v2548_v11 = vpack.c.bf16 %v2927_v10, %v2926_v6  ;;  %v2991_v12 = vpop.f32.mrb[46].mxu1  ;;  %v1007_v13 = vpop.f32.mrb[47].mxu0 }
 0x141   : > { %v2708_v14 = vpack.c.bf16 %v2991_v12, %v2990_v7  ;;  %v2543_v15 = vpack.c.bf16 %v1007_v13, %v1004_v8  ;;  %v1263_v16 = vpop.f32.mrb[47].mxu1 }
 0x142   : > { %2772 = vst [vmem:[%s3261_s20 + $0xb8] sm:$0xff] %v2548_v11   ;;  %v2703_v17 = vpack.c.bf16 %v1263_v16, %v1260_v9 }
 0x143   : > { %2804 = vst [vmem:[%s3261_s20 + $0x1b8] sm:$0xff] %v2708_v14   ;;  %2771 = vst [vmem:[%s3261_s20 + $0xb0] sm:$0xff] %v2543_v15  }
 0x144   : > { %2803 = vst [vmem:[%s3261_s20 + $0x1b0] sm:$0xff] %v2703_v17  }
 0x145   : > { %v2930_v18 = vpop.f32.mrb[48].mxu0 }
 0x146   : > { %v2994_v19 = vpop.f32.mrb[48].mxu1  ;;  %v1020_v20 = vpop.f32.mrb[49].mxu0 }
 0x147   : > { %v1276_v21 = vpop.f32.mrb[49].mxu1  ;;  %v2931_v22 = vpop.f32.mrb[50].mxu0 }
 0x148   : > { %v2558_v23 = vpack.c.bf16 %v2931_v22, %v2930_v18  ;;  %v2995_v24 = vpop.f32.mrb[50].mxu1  ;;  %v1023_v25 = vpop.f32.mrb[51].mxu0 }
 0x149   : > { %v2718_v26 = vpack.c.bf16 %v2995_v24, %v2994_v19  ;;  %v2553_v27 = vpack.c.bf16 %v1023_v25, %v1020_v20  ;;  %v1279_v28 = vpop.f32.mrb[51].mxu1 }
 0x14a   : > { %2774 = vst [vmem:[%s3261_s20 + $0xc8] sm:$0xff] %v2558_v23   ;;  %v2713_v29 = vpack.c.bf16 %v1279_v28, %v1276_v21 }
 0x14b   : > { %2806 = vst [vmem:[%s3261_s20 + $0x1c8] sm:$0xff] %v2718_v26   ;;  %2773 = vst [vmem:[%s3261_s20 + $0xc0] sm:$0xff] %v2553_v27  }
 0x14c   : > { %2805 = vst [vmem:[%s3261_s20 + $0x1c0] sm:$0xff] %v2713_v29  }
 0x14d   : > { %v2934_v30 = vpop.f32.mrb[52].mxu0 }
 0x14e   : > { %v2998_v31 = vpop.f32.mrb[52].mxu1  ;;  %v1036_v32 = vpop.f32.mrb[53].mxu0 }
 0x14f   : > { %v1292_v33 = vpop.f32.mrb[53].mxu1  ;;  %v2935_v34 = vpop.f32.mrb[54].mxu0 }
 0x150   : > { %v2568_v35 = vpack.c.bf16 %v2935_v34, %v2934_v30  ;;  %v2999_v36 = vpop.f32.mrb[54].mxu1  ;;  %v1039_v37 = vpop.f32.mrb[55].mxu0 }
 0x151   : > { %v2728_v38 = vpack.c.bf16 %v2999_v36, %v2998_v31  ;;  %v2563_v39 = vpack.c.bf16 %v1039_v37, %v1036_v32  ;;  %v1295_v40 = vpop.f32.mrb[55].mxu1 }
 0x152   : > { %2776 = vst [vmem:[%s3261_s20 + $0xd8] sm:$0xff] %v2568_v35   ;;  %v2723_v41 = vpack.c.bf16 %v1295_v40, %v1292_v33 }
 0x153   : > { %2808 = vst [vmem:[%s3261_s20 + $0x1d8] sm:$0xff] %v2728_v38   ;;  %2775 = vst [vmem:[%s3261_s20 + $0xd0] sm:$0xff] %v2563_v39  }
 0x154   : > { %2807 = vst [vmem:[%s3261_s20 + $0x1d0] sm:$0xff] %v2723_v41  }
 0x155   : > { %v2938_v42 = vpop.f32.mrb[56].mxu0 }
 0x156   : > { %v3002_v43 = vpop.f32.mrb[56].mxu1  ;;  %v1052_v44 = vpop.f32.mrb[57].mxu0 }
 0x157   : > { %v1308_v45 = vpop.f32.mrb[57].mxu1  ;;  %v2939_v46 = vpop.f32.mrb[58].mxu0 }
 0x158   : > { %v2578_v47 = vpack.c.bf16 %v2939_v46, %v2938_v42  ;;  %v3003_v48 = vpop.f32.mrb[58].mxu1  ;;  %v1055_v49 = vpop.f32.mrb[59].mxu0 }
 0x159   : > { %v2738_v50 = vpack.c.bf16 %v3003_v48, %v3002_v43  ;;  %v2573_v51 = vpack.c.bf16 %v1055_v49, %v1052_v44  ;;  %v1311_v52 = vpop.f32.mrb[59].mxu1 }
 0x15a   : > { %2778 = vst [vmem:[%s3261_s20 + $0xe8] sm:$0xff] %v2578_v47   ;;  %v2733_v53 = vpack.c.bf16 %v1311_v52, %v1308_v45 }
 0x15b   : > { %2810 = vst [vmem:[%s3261_s20 + $0x1e8] sm:$0xff] %v2738_v50   ;;  %2777 = vst [vmem:[%s3261_s20 + $0xe0] sm:$0xff] %v2573_v51  }
 0x15c   : > { %2809 = vst [vmem:[%s3261_s20 + $0x1e0] sm:$0xff] %v2733_v53  }
 0x15d   : > { %v2942_v54 = vpop.f32.mrb[60].mxu0 }
 0x15e   : > { %v3006_v55 = vpop.f32.mrb[60].mxu1  ;;  %v1068_v56 = vpop.f32.mrb[61].mxu0 }
 0x15f   : > { %v1324_v57 = vpop.f32.mrb[61].mxu1  ;;  %v2943_v58 = vpop.f32.mrb[62].mxu0 }
 0x160   : > { %v2588_v59 = vpack.c.bf16 %v2943_v58, %v2942_v54  ;;  %v3007_v60 = vpop.f32.mrb[62].mxu1  ;;  %v1071_v61 = vpop.f32.mrb[63].mxu0 }
 0x161   : > { %v2748_v62 = vpack.c.bf16 %v3007_v60, %v3006_v55  ;;  %v2583_v63 = vpack.c.bf16 %v1071_v61, %v1068_v56  ;;  %v1327_v0 = vpop.f32.mrb[63].mxu1 }
 0x162   : > { %2780 = vst [vmem:[%s3261_s20 + $0xf8] sm:$0xff] %v2588_v59   ;;  %v2743_v1 = vpack.c.bf16 %v1327_v0, %v1324_v57 }
 0x163   : > { %2812 = vst [vmem:[%s3261_s20 + $0x1f8] sm:$0xff] %v2748_v62   ;;  %2779 = vst [vmem:[%s3261_s20 + $0xf0] sm:$0xff] %v2583_v63  }
 0x164   : > { %2811 = vst [vmem:[%s3261_s20 + $0x1f0] sm:$0xff] %v2743_v1  }
 0x165 PF: > { %s12_s9 = sadd.s32 1, %s3090_s9  }
 0x166   : > { %p9_p4 = scmp.ge.s32.totalorder %s12_s9, 4  }
 0x168   :  { %11 = sbr.rel (!%p9_p4) target bundleno = 1 (0x1), region = 58 }

// kernel: tile.88
= control target key start
LH: loop header
LB: loop body
LE: loop exit
PB: predicated region body
PF: predicated region fallthrough
CT: control target
= control target key end

     0   :  { %s64_s0 = inlined_call_operand.vmem [shape: f32[8], index: 0, kind: input, shape index: {}]   ;;  %s65_s1 = inlined_call_operand.vmem [shape: f32[64,8], index: 1, kind: output, shape index: {}]  }
   0x1   :  { %v4_v0 = vld [vmem:[%s64_s0] ss:$0 sm:$0xff] }
   0x2   :  { %5 = vst [vmem:[%s65_s1] sm:$0xff] %v4_v0  ;;  %20 = vst [vmem:[%s65_s1 + $0x8] sm:$0xff] %v4_v0 }
   0x3   :  { %21 = vst [vmem:[%s65_s1 + $0x10] sm:$0xff] %v4_v0  ;;  %22 = vst [vmem:[%s65_s1 + $0x18] sm:$0xff] %v4_v0 }
   0x4   :  { %23 = vst [vmem:[%s65_s1 + $0x20] sm:$0xff] %v4_v0  ;;  %24 = vst [vmem:[%s65_s1 + $0x28] sm:$0xff] %v4_v0 }
   0x5   :  { %25 = vst [vmem:[%s65_s1 + $0x30] sm:$0xff] %v4_v0  ;;  %26 = vst [vmem:[%s65_s1 + $0x38] sm:$0xff] %v4_v0 }

// kernel: tile.89
= control target key start
LH: loop header
LB: loop body
LE: loop exit
PB: predicated region body
PF: predicated region fallthrough
CT: control target
= control target key end

     0   :  { %vm6_vm0 = vcmask 1043458   ;;  %s11_s6 = smov 3  ;;  %s14_s7 = smov 12  ;;  %vm8_vm1 = vcmask 64512   ;;  %vm20_vm2 = vcmask 1048512   ;;  %vm32_vm3 = vcmask 982912   ;;  %s412_s0 = inlined_call_operand.vmem [shape: f32[64,8], index: 0, kind: input, shape index: {}]   ;;  %s413_s1 = inlined_call_operand.vmem [shape: f32[1,512], index: 1, kind: output, shape index: {}]  }
   0x1   :  { %v215_v0 = vld [vmem:[%s412_s0 + $0xf] ss:$16 sm:%s11_s6]   ;;  %s35_s12 = smov 3  ;;  %s38_s15 = smov 12  ;;  %vm44_vm4 = vcmask 917312   ;;  %vm56_vm5 = vcmask 851712  }
   0x2   :  { %v216_v1 = vld [vmem:[%s412_s0 + $0xf] ss:$16 sm:%s14_s7]   ;;  %v219_v3 = vld [vmem:[%s412_s0 + $0xd] ss:$16 sm:%s35_s12]   ;;  %s263_s16 = smov 120   ;;  %s23_s19 = smov 3 }
   0x3   :  { %v17_v2 = vsel %vm6_vm0, %v216_v1, %v215_v0  ;;  %v220_v4 = vld [vmem:[%s412_s0 + $0xd] ss:$16 sm:%s38_s15]   ;;  %s26_s20 = smov 12  ;;  %v217_v6 = vld [vmem:[%s412_s0 + $0xe] ss:$16 sm:%s23_s19]   ;;  %s47_s25 = smov 3 }
   0x4   :  { %18 = vrot.lane.b32.xlu0 %v17_v2, %s263_s16  ;;  %v41_v5 = vsel %vm6_vm0, %v220_v4, %v219_v3  ;;  %v218_v7 = vld [vmem:[%s412_s0 + $0xe] ss:$16 sm:%s26_s20]   ;;  %s264_s26 = smov 104   ;;  %s50_s29 = smov 12  ;;  %vm68_vm6 = vcmask 786112   ;;  %vm80_vm7 = vcmask 720512  }
   0x5   :  { %42 = vrot.lane.b32.xlu1 %v41_v5, %s264_s26  ;;  %v29_v8 = vsel %vm6_vm0, %v218_v7, %v217_v6  ;;  %v221_v9 = vld [vmem:[%s412_s0 + $0xc] ss:$16 sm:%s47_s25]   ;;  %s59_s3 = smov 3  ;;  %s62_s4 = smov 12  ;;  %vm92_vm8 = vcmask 654912   ;;  %vm104_vm9 = vcmask 589312  }
   0x6   :  { %v222_v10 = vld [vmem:[%s412_s0 + $0xc] ss:$16 sm:%s50_s29]   ;;  %s265_s5 = smov 112   ;;  %v223_v12 = vld [vmem:[%s412_s0 + $0xb] ss:$16 sm:%s59_s3]   ;;  %s71_s8 = smov 3 }
   0x7   :  { %v53_v11 = vsel %vm6_vm0, %v222_v10, %v221_v9  ;;  %v224_v13 = vld [vmem:[%s412_s0 + $0xb] ss:$16 sm:%s62_s4]   ;;  %v225_v14 = vld [vmem:[%s412_s0 + $0xa] ss:$16 sm:%s71_s8]   ;;  %s74_s13 = smov 12  ;;  %s266_s14 = smov 96  }
   0x8   :  { %30 = vrot.lane.b32.xlu0 %v29_v8, %s265_s5  ;;  %v65_v15 = vsel %vm6_vm0, %v224_v13, %v223_v12  ;;  %v226_v16 = vld [vmem:[%s412_s0 + $0xa] ss:$16 sm:%s74_s13]   ;;  %s83_s17 = smov 3  ;;  %s86_s18 = smov 12  ;;  %vm116_vm10 = vcmask 523712   ;;  %vm128_vm11 = vcmask 458112  }
   0x9   :  { %54 = vrot.lane.b32.xlu1 %v53_v11, %s266_s14  ;;  %v77_v17 = vsel %vm6_vm0, %v226_v16, %v225_v14  ;;  %v227_v18 = vld [vmem:[%s412_s0 + $0x9] ss:$16 sm:%s83_s17]   ;;  %s95_s23 = smov 3  ;;  %s267_s24 = smov 88   ;;  %vm140_vm12 = vcmask 392512   ;;  %vm152_vm13 = vcmask 326912  }
   0xa   :  { %v228_v19 = vld [vmem:[%s412_s0 + $0x9] ss:$16 sm:%s86_s18]   ;;  %v229_v20 = vld [vmem:[%s412_s0 + $0x8] ss:$16 sm:%s95_s23]   ;;  %s98_s27 = smov 12  ;;  %s107_s30 = smov 3 }
   0xb   :  { %v89_v21 = vsel %vm6_vm0, %v228_v19, %v227_v18  ;;  %v230_v22 = vld [vmem:[%s412_s0 + $0x8] ss:$16 sm:%s98_s27]   ;;  %s110_s2 = smov 12  ;;  %s268_s3 = smov 80   ;;  %v231_v23 = vld [vmem:[%s412_s0 + $0x7] ss:$16 sm:%s107_s30]  }
   0xc   :  { %66 = vrot.lane.b32.xlu0 %v65_v15, %s267_s24  ;;  %s119_s6 = smov 3  ;;  %v101_v24 = vsel %vm6_vm0, %v230_v22, %v229_v20  ;;  %v232_v25 = vld [vmem:[%s412_s0 + $0x7] ss:$16 sm:%s110_s2]   ;;  %s122_s11 = smov 12  ;;  %vm164_vm14 = vcmask 261312   ;;  %vm176_vm15 = vcmask 195712  }
   0xd   :  { %78 = vrot.lane.b32.xlu1 %v77_v17, %s268_s3  ;;  %v233_v26 = vld [vmem:[%s412_s0 + $0x6] ss:$16 sm:%s119_s6]   ;;  %s269_s12 = smov 72   ;;  %s131_s15 = smov 3  ;;  %v113_v28 = vsel %vm6_vm0, %v232_v25, %v231_v23 }
   0xe   :  { %v234_v27 = vld [vmem:[%s412_s0 + $0x6] ss:$16 sm:%s122_s11]   ;;  %s134_s16 = smov 12  ;;  %v235_v29 = vld [vmem:[%s412_s0 + $0x5] ss:$16 sm:%s131_s15]   ;;  %s143_s19 = smov 3 }
   0xf   :  { %s270_s20 = smov 64   ;;  %v236_v30 = vld [vmem:[%s412_s0 + $0x5] ss:$16 sm:%s134_s16]   ;;  %s146_s23 = smov 12  ;;  %v125_v31 = vsel %vm6_vm0, %v234_v27, %v233_v26  ;;  %v237_v32 = vld [vmem:[%s412_s0 + $0x4] ss:$16 sm:%s143_s19]  }
  0x10   :  { %90 = vrot.lane.b32.xlu0 %v89_v21, %s269_s12  ;;  %s155_s26 = smov 3  ;;  %s158_s27 = smov 12  ;;  %v238_v33 = vld [vmem:[%s412_s0 + $0x4] ss:$16 sm:%s146_s23]   ;;  %v137_v34 = vsel %vm6_vm0, %v236_v30, %v235_v29 }
  0x11   :  { %102 = vrot.lane.b32.xlu1 %v101_v24, %s270_s20  ;;  %s271_s28 = smov 56   ;;  %s167_s2 = smov 3  ;;  %v239_v35 = vld [vmem:[%s412_s0 + $0x3] ss:$16 sm:%s155_s26]   ;;  %v149_v37 = vsel %vm6_vm0, %v238_v33, %v237_v32 }
  0x12   :  { %s170_s5 = smov 12  ;;  %s272_s6 = smov 48   ;;  %v240_v36 = vld [vmem:[%s412_s0 + $0x3] ss:$16 sm:%s158_s27]   ;;  %v241_v38 = vld [vmem:[%s412_s0 + $0x2] ss:$16 sm:%s167_s2]  }
  0x13   :  { %s179_s9 = smov 3  ;;  %v242_v39 = vld [vmem:[%s412_s0 + $0x2] ss:$16 sm:%s170_s5]   ;;  %s182_s14 = smov 12  ;;  %v161_v41 = vsel %vm6_vm0, %v240_v36, %v239_v35 }
  0x14   :  { %114 = vrot.lane.b32.xlu0 %v113_v28, %s271_s28  ;;  %s2_s15 = smov 3  ;;  %s273_s16 = smov 40   ;;  %v243_v42 = vld [vmem:[%s412_s0 + $0x1] ss:$16 sm:%s179_s9]   ;;  %v173_v46 = vsel %vm6_vm0, %v242_v39, %v241_v38 }
  0x15   :  { %126 = vrot.lane.b32.xlu1 %v125_v31, %s272_s6  ;;  %v3_v40 = vld [vmem:[%s412_s0] ss:$16 sm:%s2_s15]   ;;  %s4_s19 = smov 12  ;;  %s274_s24 = smov 32  }
  0x16   :  { %v5_v43 = vld [vmem:[%s412_s0] ss:$16 sm:%s4_s19]   ;;  %v244_v44 = vld [vmem:[%s412_s0 + $0x1] ss:$16 sm:%s182_s14]   ;;  %s275_s0 = smov 24   ;;  %s276_s27 = smov 16  }
  0x17   :  { %v7_v45 = vsel %vm6_vm0, %v5_v43, %v3_v40  ;;  %v185_v47 = vsel %vm6_vm0, %v244_v44, %v243_v42  ;;  %s277_s28 = smov 8   ;;  %vm188_vm0 = vcmask 130112  }
  0x18   :  { %138 = vrot.lane.b32.xlu0 %v137_v34, %s273_s16  ;;  %9 = vst.msk [vmem:[#allocation0] ss:$8 sm:$0xf] %vm8_vm1, %v7_v45  }
  0x19   :  { %150 = vrot.lane.b32.xlu1 %v149_v37, %s274_s24 }
  0x1c   :  { %162 = vrot.lane.b32.xlu0 %v161_v41, %s275_s0 }
  0x1d   :  { %174 = vrot.lane.b32.xlu1 %v173_v46, %s276_s27 }
  0x20   :  { %186 = vrot.lane.b32.xlu0 %v185_v47, %s277_s28 }
  0x76   :  { %v19_v48 = vpop.permute.xlu0 %18  }
  0x77   :  { %21 = vst.msk [vmem:[#allocation0] ss:$8 sm:$0xf] %vm20_vm2, %v19_v48   ;;  %v43_v49 = vpop.permute.xlu1 %42  }
  0x7a   :  { %v31_v50 = vpop.permute.xlu0 %30  }
  0x7b   :  { %33 = vst.msk [vmem:[#allocation0] ss:$8 sm:$0xf] %vm32_vm3, %v31_v50   ;;  %v55_v51 = vpop.permute.xlu1 %54  }
  0x7c   :  { %45 = vst.msk [vmem:[#allocation0] ss:$8 sm:$0xf] %vm44_vm4, %v43_v49  }
  0x7d   :  { %57 = vst.msk [vmem:[#allocation0] ss:$8 sm:$0xf] %vm56_vm5, %v55_v51  }
  0x7e   :  { %v67_v52 = vpop.permute.xlu0 %66  }
  0x7f   :  { %69 = vst.msk [vmem:[#allocation0] ss:$8 sm:$0xf] %vm68_vm6, %v67_v52   ;;  %v79_v53 = vpop.permute.xlu1 %78  }
  0x80   :  { %81 = vst.msk [vmem:[#allocation0] ss:$8 sm:$0xf] %vm80_vm7, %v79_v53  }
  0x82   :  { %v91_v54 = vpop.permute.xlu0 %90  }
  0x83   :  { %93 = vst.msk [vmem:[#allocation0] ss:$8 sm:$0xf] %vm92_vm8, %v91_v54   ;;  %v103_v55 = vpop.permute.xlu1 %102  }
  0x84   :  { %105 = vst.msk [vmem:[#allocation0] ss:$8 sm:$0xf] %vm104_vm9, %v103_v55  }
  0x86   :  { %v115_v56 = vpop.permute.xlu0 %114  }
  0x87   :  { %117 = vst.msk [vmem:[#allocation0] ss:$8 sm:$0xf] %vm116_vm10, %v115_v56   ;;  %v127_v57 = vpop.permute.xlu1 %126  }
  0x88   :  { %129 = vst.msk [vmem:[#allocation0] ss:$8 sm:$0xf] %vm128_vm11, %v127_v57  }
  0x8a   :  { %v139_v58 = vpop.permute.xlu0 %138  }
  0x8b   :  { %141 = vst.msk [vmem:[#allocation0] ss:$8 sm:$0xf] %vm140_vm12, %v139_v58   ;;  %v151_v59 = vpop.permute.xlu1 %150  }
  0x8c   :  { %153 = vst.msk [vmem:[#allocation0] ss:$8 sm:$0xf] %vm152_vm13, %v151_v59  }
  0x8e   :  { %v163_v60 = vpop.permute.xlu0 %162  }
  0x8f   :  { %165 = vst.msk [vmem:[#allocation0] ss:$8 sm:$0xf] %vm164_vm14, %v163_v60   ;;  %v175_v61 = vpop.permute.xlu1 %174  }
  0x90   :  { %177 = vst.msk [vmem:[#allocation0] ss:$8 sm:$0xf] %vm176_vm15, %v175_v61  }
  0x92   :  { %v187_v62 = vpop.permute.xlu0 %186  }
  0x93   :  { %189 = vst.msk [vmem:[#allocation0] ss:$8 sm:$0xf] %vm188_vm0, %v187_v62  }
  0x9a   :  { %v193_v63 = vld [vmem:[#allocation0] sm:$0x1]  ;;  %v197_v0 = vld [vmem:[#allocation0 + $0x8] sm:$0x1]  ;;  %v202_v1 = vld [vmem:[#allocation0 + $0x10] sm:$0x1] }
  0x9b   :  { %195 = vst [vmem:[%s413_s1] sm:$0x1] %v193_v63  ;;  %245 = vst [vmem:[%s413_s1 + $0x1] sm:$0x1] %v197_v0  ;;  %v208_v2 = vld [vmem:[#allocation0 + $0x18] sm:$0x1] }
  0x9c   :  { %246 = vst [vmem:[%s413_s1 + $0x2] sm:$0x1] %v202_v1  ;;  %247 = vst [vmem:[%s413_s1 + $0x3] sm:$0x1] %v208_v2 }

// kernel: generator_forward.27
= control target key start
LH: loop header
LB: loop body
LE: loop exit
PB: predicated region body
PF: predicated region fallthrough
CT: control target
= control target key end

     0   :  { %v77_v0 = vlaneseq  ;;  %s895_s1 = inlined_call_operand.vmem [shape: f32[1,512], index: 1, kind: input, shape index: {}]   ;;  %s896_s0 = inlined_call_operand.vmem [shape: f32[128,512], index: 0, kind: input, shape index: {}]   ;;  %s897_s2 = inlined_call_operand.vmem [shape: f32[128,512], index: 2, kind: output, shape index: {}]  }
   0x1   :  { %v75_v2 = vld [vmem:[%s895_s1] sm:$0xf]  ;;  %v12_v8 = vld [vmem:[%s896_s0 + $0x8] sm:$0xff]  ;;  %v13_v9 = vld [vmem:[%s896_s0 + $0x10] sm:$0xff] }
   0x2   :  { %v78_v1 = vshrl.u32 %v77_v0, 7  ;;  %v11_v7 = vld [vmem:[%s896_s0] sm:$0xff]  ;;  %v14_v13 = vld [vmem:[%s896_s0 + $0x18] sm:$0xff]  ;;  %v16_v19 = vld [vmem:[%s896_s0 + $0x28] sm:$0xff] }
   0x3   :  { %v15_v15 = vld [vmem:[%s896_s0 + $0x20] sm:$0xff]  ;;  %v17_v21 = vld [vmem:[%s896_s0 + $0x30] sm:$0xff]  ;;  %v18_v23 = vld [vmem:[%s896_s0 + $0x38] sm:$0xff] }
   0x4   :  { %v79_v3 = vsub.s32 0, %v78_v1  ;;  %v83_v4 = vsub.s32 1, %v78_v1  ;;  %v87_v5 = vsub.s32 2, %v78_v1  ;;  %v91_v6 = vsub.s32 3, %v78_v1  ;;  %v19_v25 = vld [vmem:[%s896_s0 + $0x40] sm:$0xff]  ;;  %v20_v27 = vld [vmem:[%s896_s0 + $0x48] sm:$0xff] }
   0x5   :  { %v21_v29 = vld [vmem:[%s896_s0 + $0x50] sm:$0xff]  ;;  %v22_v31 = vld [vmem:[%s896_s0 + $0x58] sm:$0xff]  ;;  %v23_v33 = vld [vmem:[%s896_s0 + $0x60] sm:$0xff] }
   0x6   :  { %v448_v10 = vrot.slane %v75_v2, %v79_v3  ;;  %v450_v11 = vrot.slane %v75_v2, %v83_v4  ;;  %v452_v12 = vrot.slane %v75_v2, %v87_v5  ;;  %v457_v14 = vrot.slane %v75_v2, %v91_v6  ;;  %v24_v35 = vld [vmem:[%s896_s0 + $0x68] sm:$0xff]  ;;  %v25_v37 = vld [vmem:[%s896_s0 + $0x70] sm:$0xff]  ;;  %v26_v39 = vld [vmem:[%s896_s0 + $0x78] sm:$0xff] }
   0x7   :  { %v27_v41 = vld [vmem:[%s896_s0 + $0x80] sm:$0xff]  ;;  %v28_v44 = vld [vmem:[%s896_s0 + $0x88] sm:$0xff]  ;;  %v29_v47 = vld [vmem:[%s896_s0 + $0x90] sm:$0xff] }
   0x8   :  { %v97_v16 = vadd.f32 %v448_v10, %v11_v7  ;;  %v98_v17 = vadd.f32 %v450_v11, %v12_v8  ;;  %v99_v18 = vadd.f32 %v452_v12, %v13_v9  ;;  %v100_v20 = vadd.f32 %v457_v14, %v14_v13  ;;  %v30_v50 = vld [vmem:[%s896_s0 + $0x98] sm:$0xff]  ;;  %v31_v53 = vld [vmem:[%s896_s0 + $0xa0] sm:$0xff]  ;;  %v32_v56 = vld [vmem:[%s896_s0 + $0xa8] sm:$0xff] }
   0x9   :  { %v101_v22 = vadd.f32 %v448_v10, %v15_v15  ;;  %v102_v24 = vadd.f32 %v450_v11, %v16_v19  ;;  %v103_v26 = vadd.f32 %v452_v12, %v17_v21  ;;  %v104_v28 = vadd.f32 %v457_v14, %v18_v23  ;;  %v33_v59 = vld [vmem:[%s896_s0 + $0xb0] sm:$0xff]  ;;  %v34_v62 = vld [vmem:[%s896_s0 + $0xb8] sm:$0xff]  ;;  %v35_v1 = vld [vmem:[%s896_s0 + $0xc0] sm:$0xff] }
   0xa   :  { %293 = vtanh.f32 %v97_v16  ;;  %v105_v30 = vadd.f32 %v448_v10, %v19_v25  ;;  %v106_v32 = vadd.f32 %v450_v11, %v20_v27  ;;  %v107_v34 = vadd.f32 %v452_v12, %v21_v29  ;;  %v36_v4 = vld [vmem:[%s896_s0 + $0xc8] sm:$0xff]  ;;  %v37_v7 = vld [vmem:[%s896_s0 + $0xd0] sm:$0xff]  ;;  %v38_v13 = vld [vmem:[%s896_s0 + $0xd8] sm:$0xff] }
   0xb   :  { %295 = vtanh.f32 %v98_v17  ;;  %v108_v36 = vadd.f32 %v457_v14, %v22_v31  ;;  %v109_v38 = vadd.f32 %v448_v10, %v23_v33  ;;  %v110_v40 = vadd.f32 %v450_v11, %v24_v35  ;;  %v39_v17 = vld [vmem:[%s896_s0 + $0xe0] sm:$0xff]  ;;  %v41_v23 = vld [vmem:[%s896_s0 + $0xf0] sm:$0xff] }
   0xc   :  { %297 = vtanh.f32 %v99_v18  ;;  %v111_v43 = vadd.f32 %v452_v12, %v25_v37  ;;  %v112_v46 = vadd.f32 %v457_v14, %v26_v39  ;;  %v113_v49 = vadd.f32 %v448_v10, %v27_v41  ;;  %v43_v29 = vld [vmem:[%s896_s0 + $0x100] sm:$0xff]  ;;  %v45_v35 = vld [vmem:[%s896_s0 + $0x110] sm:$0xff] }
   0xd   :  { %299 = vtanh.f32 %v100_v20  ;;  %v114_v52 = vadd.f32 %v450_v11, %v28_v44  ;;  %v115_v55 = vadd.f32 %v452_v12, %v29_v47  ;;  %v116_v58 = vadd.f32 %v457_v14, %v30_v50  ;;  %v40_v20 = vld [vmem:[%s896_s0 + $0xe8] sm:$0xff]  ;;  %v47_v41 = vld [vmem:[%s896_s0 + $0x120] sm:$0xff]  ;;  %v49_v47 = vld [vmem:[%s896_s0 + $0x130] sm:$0xff] }
   0xe   :  { %301 = vtanh.f32 %v101_v22  ;;  %v117_v61 = vadd.f32 %v448_v10, %v31_v53  ;;  %v118_v0 = vadd.f32 %v450_v11, %v32_v56  ;;  %v119_v3 = vadd.f32 %v452_v12, %v33_v59  ;;  %v48_v44 = vld [vmem:[%s896_s0 + $0x128] sm:$0xff]  ;;  %v50_v50 = vld [vmem:[%s896_s0 + $0x138] sm:$0xff]  ;;  %v51_v53 = vld [vmem:[%s896_s0 + $0x140] sm:$0xff] }
   0xf   :  { %303 = vtanh.f32 %v102_v24  ;;  %v120_v6 = vadd.f32 %v457_v14, %v34_v62  ;;  %v121_v9 = vadd.f32 %v448_v10, %v35_v1  ;;  %v122_v16 = vadd.f32 %v450_v11, %v36_v4  ;;  %v52_v56 = vld [vmem:[%s896_s0 + $0x148] sm:$0xff]  ;;  %v53_v59 = vld [vmem:[%s896_s0 + $0x150] sm:$0xff]  ;;  %v54_v62 = vld [vmem:[%s896_s0 + $0x158] sm:$0xff] }
  0x10   :  { %305 = vtanh.f32 %v103_v26  ;;  %v123_v19 = vadd.f32 %v452_v12, %v37_v7  ;;  %v124_v22 = vadd.f32 %v457_v14, %v38_v13  ;;  %v125_v25 = vadd.f32 %v448_v10, %v39_v17  ;;  %v42_v26 = vld [vmem:[%s896_s0 + $0xf8] sm:$0xff]  ;;  %v55_v1 = vld [vmem:[%s896_s0 + $0x160] sm:$0xff]  ;;  %v56_v4 = vld [vmem:[%s896_s0 + $0x168] sm:$0xff] }
  0x11   :  { %307 = vtanh.f32 %v104_v28  ;;  %v126_v28 = vadd.f32 %v450_v11, %v40_v20  ;;  %v127_v31 = vadd.f32 %v452_v12, %v41_v23  ;;  %v129_v37 = vadd.f32 %v448_v10, %v43_v29  ;;  %v57_v7 = vld [vmem:[%s896_s0 + $0x170] sm:$0xff]  ;;  %v58_v13 = vld [vmem:[%s896_s0 + $0x178] sm:$0xff]  ;;  %v59_v17 = vld [vmem:[%s896_s0 + $0x180] sm:$0xff] }
  0x12   :  { %309 = vtanh.f32 %v105_v30  ;;  %v60_v20 = vld [vmem:[%s896_s0 + $0x188] sm:$0xff]  ;;  %v61_v23 = vld [vmem:[%s896_s0 + $0x190] sm:$0xff]  ;;  %v63_v29 = vld [vmem:[%s896_s0 + $0x1a0] sm:$0xff] }
  0x13   :  { %311 = vtanh.f32 %v106_v32  ;;  %v44_v32 = vld [vmem:[%s896_s0 + $0x108] sm:$0xff] }
  0x14   :  { %v294_v42 = vpop.eup %293  ;;  %313 = vtanh.f32 %v107_v34  ;;  %v128_v34 = vadd.f32 %v457_v14, %v42_v26  ;;  %v62_v26 = vld [vmem:[%s896_s0 + $0x198] sm:$0xff] }
  0x15   :  { %v296_v45 = vpop.eup %295  ;;  %225 = vst [vmem:[%s897_s2] sm:$0xff] %v294_v42  ;;  %315 = vtanh.f32 %v108_v36 }
  0x16   :  { %v298_v48 = vpop.eup %297  ;;  %226 = vst [vmem:[%s897_s2 + $0x8] sm:$0xff] %v296_v45  ;;  %317 = vtanh.f32 %v109_v38  ;;  %v46_v38 = vld [vmem:[%s896_s0 + $0x118] sm:$0xff] }
  0x17   :  { %v300_v51 = vpop.eup %299  ;;  %227 = vst [vmem:[%s897_s2 + $0x10] sm:$0xff] %v298_v48  ;;  %319 = vtanh.f32 %v110_v40  ;;  %v130_v40 = vadd.f32 %v450_v11, %v44_v32  ;;  %v64_v32 = vld [vmem:[%s896_s0 + $0x1a8] sm:$0xff] }
  0x18   :  { %v302_v54 = vpop.eup %301  ;;  %228 = vst [vmem:[%s897_s2 + $0x18] sm:$0xff] %v300_v51  ;;  %321 = vtanh.f32 %v111_v43  ;;  %v131_v43 = vadd.f32 %v452_v12, %v45_v35  ;;  %v65_v35 = vld [vmem:[%s896_s0 + $0x1b0] sm:$0xff] }
  0x19   :  { %v304_v57 = vpop.eup %303  ;;  %229 = vst [vmem:[%s897_s2 + $0x20] sm:$0xff] %v302_v54  ;;  %323 = vtanh.f32 %v112_v46  ;;  %v132_v46 = vadd.f32 %v457_v14, %v46_v38  ;;  %v66_v38 = vld [vmem:[%s896_s0 + $0x1b8] sm:$0xff] }
  0x1a   :  { %v306_v60 = vpop.eup %305  ;;  %230 = vst [vmem:[%s897_s2 + $0x28] sm:$0xff] %v304_v57  ;;  %325 = vtanh.f32 %v113_v49  ;;  %v133_v49 = vadd.f32 %v448_v10, %v47_v41  ;;  %v67_v41 = vld [vmem:[%s896_s0 + $0x1c0] sm:$0xff] }
  0x1b   :  { %v308_v63 = vpop.eup %307  ;;  %231 = vst [vmem:[%s897_s2 + $0x30] sm:$0xff] %v306_v60  ;;  %327 = vtanh.f32 %v114_v52  ;;  %v134_v52 = vadd.f32 %v450_v11, %v48_v44  ;;  %v68_v44 = vld [vmem:[%s896_s0 + $0x1c8] sm:$0xff] }
  0x1c   :  { %v310_v2 = vpop.eup %309  ;;  %232 = vst [vmem:[%s897_s2 + $0x38] sm:$0xff] %v308_v63  ;;  %329 = vtanh.f32 %v115_v55  ;;  %v135_v55 = vadd.f32 %v452_v12, %v49_v47  ;;  %v69_v47 = vld [vmem:[%s896_s0 + $0x1d0] sm:$0xff] }
  0x1d   :  { %v312_v5 = vpop.eup %311  ;;  %233 = vst [vmem:[%s897_s2 + $0x40] sm:$0xff] %v310_v2  ;;  %331 = vtanh.f32 %v116_v58  ;;  %v136_v58 = vadd.f32 %v457_v14, %v50_v50  ;;  %v70_v50 = vld [vmem:[%s896_s0 + $0x1d8] sm:$0xff] }
  0x1e   :  { %v314_v8 = vpop.eup %313  ;;  %234 = vst [vmem:[%s897_s2 + $0x48] sm:$0xff] %v312_v5  ;;  %333 = vtanh.f32 %v117_v61  ;;  %v137_v61 = vadd.f32 %v448_v10, %v51_v53  ;;  %v71_v53 = vld [vmem:[%s896_s0 + $0x1e0] sm:$0xff] }
  0x1f   :  { %v316_v15 = vpop.eup %315  ;;  %235 = vst [vmem:[%s897_s2 + $0x50] sm:$0xff] %v314_v8  ;;  %335 = vtanh.f32 %v118_v0  ;;  %v138_v0 = vadd.f32 %v450_v11, %v52_v56  ;;  %v72_v56 = vld [vmem:[%s896_s0 + $0x1e8] sm:$0xff] }
  0x20   :  { %v318_v18 = vpop.eup %317  ;;  %236 = vst [vmem:[%s897_s2 + $0x58] sm:$0xff] %v316_v15  ;;  %337 = vtanh.f32 %v119_v3  ;;  %v139_v3 = vadd.f32 %v452_v12, %v53_v59  ;;  %v73_v59 = vld [vmem:[%s896_s0 + $0x1f0] sm:$0xff] }
  0x21   :  { %v320_v21 = vpop.eup %319  ;;  %237 = vst [vmem:[%s897_s2 + $0x60] sm:$0xff] %v318_v18  ;;  %339 = vtanh.f32 %v120_v6  ;;  %v140_v6 = vadd.f32 %v457_v14, %v54_v62  ;;  %v74_v62 = vld [vmem:[%s896_s0 + $0x1f8] sm:$0xff] }
  0x22   :  { %v322_v24 = vpop.eup %321  ;;  %238 = vst [vmem:[%s897_s2 + $0x68] sm:$0xff] %v320_v21  ;;  %341 = vtanh.f32 %v121_v9  ;;  %v141_v9 = vadd.f32 %v448_v10, %v55_v1 }
  0x23   :  { %v324_v27 = vpop.eup %323  ;;  %239 = vst [vmem:[%s897_s2 + $0x70] sm:$0xff] %v322_v24  ;;  %343 = vtanh.f32 %v122_v16  ;;  %v142_v16 = vadd.f32 %v450_v11, %v56_v4 }
  0x24   :  { %v326_v30 = vpop.eup %325  ;;  %240 = vst [vmem:[%s897_s2 + $0x78] sm:$0xff] %v324_v27  ;;  %345 = vtanh.f32 %v123_v19  ;;  %v143_v19 = vadd.f32 %v452_v12, %v57_v7 }
  0x25   :  { %v328_v33 = vpop.eup %327  ;;  %241 = vst [vmem:[%s897_s2 + $0x80] sm:$0xff] %v326_v30  ;;  %347 = vtanh.f32 %v124_v22  ;;  %v144_v22 = vadd.f32 %v457_v14, %v58_v13 }
  0x26   :  { %v330_v36 = vpop.eup %329  ;;  %242 = vst [vmem:[%s897_s2 + $0x88] sm:$0xff] %v328_v33  ;;  %349 = vtanh.f32 %v125_v25  ;;  %v145_v25 = vadd.f32 %v448_v10, %v59_v17 }
  0x27   :  { %v332_v39 = vpop.eup %331  ;;  %243 = vst [vmem:[%s897_s2 + $0x90] sm:$0xff] %v330_v36  ;;  %351 = vtanh.f32 %v126_v28  ;;  %v146_v28 = vadd.f32 %v450_v11, %v60_v20 }
  0x28   :  { %v334_v42 = vpop.eup %333  ;;  %244 = vst [vmem:[%s897_s2 + $0x98] sm:$0xff] %v332_v39  ;;  %353 = vtanh.f32 %v127_v31  ;;  %v147_v31 = vadd.f32 %v452_v12, %v61_v23 }
  0x29   :  { %v336_v45 = vpop.eup %335  ;;  %245 = vst [vmem:[%s897_s2 + $0xa0] sm:$0xff] %v334_v42  ;;  %355 = vtanh.f32 %v128_v34  ;;  %v148_v34 = vadd.f32 %v457_v14, %v62_v26 }
  0x2a   :  { %v338_v48 = vpop.eup %337  ;;  %246 = vst [vmem:[%s897_s2 + $0xa8] sm:$0xff] %v336_v45  ;;  %357 = vtanh.f32 %v129_v37  ;;  %v149_v37 = vadd.f32 %v448_v10, %v63_v29 }
  0x2b   :  { %v340_v51 = vpop.eup %339  ;;  %247 = vst [vmem:[%s897_s2 + $0xb0] sm:$0xff] %v338_v48  ;;  %359 = vtanh.f32 %v130_v40  ;;  %v150_v40 = vadd.f32 %v450_v11, %v64_v32 }
  0x2c   :  { %v342_v54 = vpop.eup %341  ;;  %248 = vst [vmem:[%s897_s2 + $0xb8] sm:$0xff] %v340_v51  ;;  %361 = vtanh.f32 %v131_v43  ;;  %v151_v43 = vadd.f32 %v452_v12, %v65_v35 }
  0x2d   :  { %v344_v57 = vpop.eup %343  ;;  %249 = vst [vmem:[%s897_s2 + $0xc0] sm:$0xff] %v342_v54  ;;  %363 = vtanh.f32 %v132_v46  ;;  %v152_v46 = vadd.f32 %v457_v14, %v66_v38 }
  0x2e   :  { %v346_v60 = vpop.eup %345  ;;  %250 = vst [vmem:[%s897_s2 + $0xc8] sm:$0xff] %v344_v57  ;;  %365 = vtanh.f32 %v133_v49  ;;  %v153_v49 = vadd.f32 %v448_v10, %v67_v41 }
  0x2f   :  { %v348_v63 = vpop.eup %347  ;;  %251 = vst [vmem:[%s897_s2 + $0xd0] sm:$0xff] %v346_v60  ;;  %367 = vtanh.f32 %v134_v52  ;;  %v154_v52 = vadd.f32 %v450_v11, %v68_v44 }
  0x30   :  { %v350_v2 = vpop.eup %349  ;;  %252 = vst [vmem:[%s897_s2 + $0xd8] sm:$0xff] %v348_v63  ;;  %369 = vtanh.f32 %v135_v55  ;;  %v155_v55 = vadd.f32 %v452_v12, %v69_v47 }
  0x31   :  { %v352_v5 = vpop.eup %351  ;;  %253 = vst [vmem:[%s897_s2 + $0xe0] sm:$0xff] %v350_v2  ;;  %371 = vtanh.f32 %v136_v58  ;;  %v156_v58 = vadd.f32 %v457_v14, %v70_v50 }
  0x32   :  { %v354_v8 = vpop.eup %353  ;;  %254 = vst [vmem:[%s897_s2 + $0xe8] sm:$0xff] %v352_v5  ;;  %373 = vtanh.f32 %v137_v61  ;;  %v157_v61 = vadd.f32 %v448_v10, %v71_v53  ;;  %v159_v10 = vadd.f32 %v452_v12, %v73_v59 }
  0x33   :  { %v356_v15 = vpop.eup %355  ;;  %255 = vst [vmem:[%s897_s2 + $0xf0] sm:$0xff] %v354_v8  ;;  %375 = vtanh.f32 %v138_v0  ;;  %v158_v0 = vadd.f32 %v450_v11, %v72_v56 }
  0x34   :  { %v358_v18 = vpop.eup %357  ;;  %256 = vst [vmem:[%s897_s2 + $0xf8] sm:$0xff] %v356_v15  ;;  %377 = vtanh.f32 %v139_v3  ;;  %v160_v3 = vadd.f32 %v457_v14, %v74_v62 }
  0x35   :  { %v360_v21 = vpop.eup %359  ;;  %257 = vst [vmem:[%s897_s2 + $0x100] sm:$0xff] %v358_v18  ;;  %379 = vtanh.f32 %v140_v6 }
  0x36   :  { %v362_v24 = vpop.eup %361  ;;  %258 = vst [vmem:[%s897_s2 + $0x108] sm:$0xff] %v360_v21  ;;  %381 = vtanh.f32 %v141_v9 }
  0x37   :  { %v364_v27 = vpop.eup %363  ;;  %259 = vst [vmem:[%s897_s2 + $0x110] sm:$0xff] %v362_v24  ;;  %383 = vtanh.f32 %v142_v16 }
  0x38   :  { %v366_v30 = vpop.eup %365  ;;  %260 = vst [vmem:[%s897_s2 + $0x118] sm:$0xff] %v364_v27  ;;  %385 = vtanh.f32 %v143_v19 }
  0x39   :  { %v368_v33 = vpop.eup %367  ;;  %261 = vst [vmem:[%s897_s2 + $0x120] sm:$0xff] %v366_v30  ;;  %387 = vtanh.f32 %v144_v22 }
  0x3a   :  { %v370_v36 = vpop.eup %369  ;;  %262 = vst [vmem:[%s897_s2 + $0x128] sm:$0xff] %v368_v33  ;;  %389 = vtanh.f32 %v145_v25 }
  0x3b   :  { %v372_v39 = vpop.eup %371  ;;  %263 = vst [vmem:[%s897_s2 + $0x130] sm:$0xff] %v370_v36  ;;  %391 = vtanh.f32 %v146_v28 }
  0x3c   :  { %v374_v42 = vpop.eup %373  ;;  %264 = vst [vmem:[%s897_s2 + $0x138] sm:$0xff] %v372_v39  ;;  %393 = vtanh.f32 %v147_v31 }
  0x3d   :  { %v376_v45 = vpop.eup %375  ;;  %265 = vst [vmem:[%s897_s2 + $0x140] sm:$0xff] %v374_v42  ;;  %395 = vtanh.f32 %v148_v34 }
  0x3e   :  { %v378_v48 = vpop.eup %377  ;;  %266 = vst [vmem:[%s897_s2 + $0x148] sm:$0xff] %v376_v45  ;;  %397 = vtanh.f32 %v149_v37 }
  0x3f   :  { %v380_v51 = vpop.eup %379  ;;  %267 = vst [vmem:[%s897_s2 + $0x150] sm:$0xff] %v378_v48  ;;  %399 = vtanh.f32 %v150_v40 }
  0x40   :  { %v382_v54 = vpop.eup %381  ;;  %268 = vst [vmem:[%s897_s2 + $0x158] sm:$0xff] %v380_v51  ;;  %401 = vtanh.f32 %v151_v43 }
  0x41   :  { %v384_v57 = vpop.eup %383  ;;  %269 = vst [vmem:[%s897_s2 + $0x160] sm:$0xff] %v382_v54  ;;  %403 = vtanh.f32 %v152_v46 }
  0x42   :  { %v386_v60 = vpop.eup %385  ;;  %270 = vst [vmem:[%s897_s2 + $0x168] sm:$0xff] %v384_v57  ;;  %405 = vtanh.f32 %v153_v49 }
  0x43   :  { %v388_v63 = vpop.eup %387  ;;  %271 = vst [vmem:[%s897_s2 + $0x170] sm:$0xff] %v386_v60  ;;  %407 = vtanh.f32 %v154_v52 }
  0x44   :  { %v390_v1 = vpop.eup %389  ;;  %272 = vst [vmem:[%s897_s2 + $0x178] sm:$0xff] %v388_v63  ;;  %409 = vtanh.f32 %v155_v55 }
  0x45   :  { %v392_v2 = vpop.eup %391  ;;  %273 = vst [vmem:[%s897_s2 + $0x180] sm:$0xff] %v390_v1  ;;  %411 = vtanh.f32 %v156_v58 }
  0x46   :  { %v394_v4 = vpop.eup %393  ;;  %274 = vst [vmem:[%s897_s2 + $0x188] sm:$0xff] %v392_v2  ;;  %413 = vtanh.f32 %v157_v61 }
  0x47   :  { %v396_v11 = vpop.eup %395  ;;  %275 = vst [vmem:[%s897_s2 + $0x190] sm:$0xff] %v394_v4  ;;  %415 = vtanh.f32 %v158_v0 }
  0x48   :  { %v398_v12 = vpop.eup %397  ;;  %276 = vst [vmem:[%s897_s2 + $0x198] sm:$0xff] %v396_v11  ;;  %417 = vtanh.f32 %v159_v10 }
  0x49   :  { %v400_v5 = vpop.eup %399  ;;  %277 = vst [vmem:[%s897_s2 + $0x1a0] sm:$0xff] %v398_v12  ;;  %419 = vtanh.f32 %v160_v3 }
  0x4a   :  { %v402_v14 = vpop.eup %401  ;;  %278 = vst [vmem:[%s897_s2 + $0x1a8] sm:$0xff] %v400_v5 }
  0x4b   :  { %v404_v6 = vpop.eup %403  ;;  %279 = vst [vmem:[%s897_s2 + $0x1b0] sm:$0xff] %v402_v14 }
  0x4c   :  { %v406_v7 = vpop.eup %405  ;;  %280 = vst [vmem:[%s897_s2 + $0x1b8] sm:$0xff] %v404_v6 }
  0x4d   :  { %v408_v8 = vpop.eup %407  ;;  %281 = vst [vmem:[%s897_s2 + $0x1c0] sm:$0xff] %v406_v7 }
  0x4e   :  { %v410_v9 = vpop.eup %409  ;;  %282 = vst [vmem:[%s897_s2 + $0x1c8] sm:$0xff] %v408_v8 }
  0x4f   :  { %v412_v13 = vpop.eup %411  ;;  %283 = vst [vmem:[%s897_s2 + $0x1d0] sm:$0xff] %v410_v9 }
  0x50   :  { %v414_v15 = vpop.eup %413  ;;  %284 = vst [vmem:[%s897_s2 + $0x1d8] sm:$0xff] %v412_v13 }
  0x51   :  { %v416_v16 = vpop.eup %415  ;;  %285 = vst [vmem:[%s897_s2 + $0x1e0] sm:$0xff] %v414_v15 }
  0x52   :  { %v418_v17 = vpop.eup %417  ;;  %286 = vst [vmem:[%s897_s2 + $0x1e8] sm:$0xff] %v416_v16 }
  0x53   :  { %v420_v18 = vpop.eup %419  ;;  %287 = vst [vmem:[%s897_s2 + $0x1f0] sm:$0xff] %v418_v17 }
  0x54   :  { %288 = vst [vmem:[%s897_s2 + $0x1f8] sm:$0xff] %v420_v18 }

</bundles_post_ra>
